<compile_context>
chip_gen: v7x
topology: tpu7x:2x2x1
jax: 0.10.0
libtpu: 0.0.40
codegen_flags: <defaults>
</compile_context>

<pallas_src>
import jax
import jax.numpy as jnp
from jax.experimental import pallas as pl
from jax.experimental.pallas import tpu as pltpu


def _round_up(n, m):
    return ((n + m - 1) // m) * m


def _leaky(x, slope=0.2):
    return jnp.where(x > 0, x, slope * x)


# ----------------------------------------------------------------------------
# Fused kernel: conv1+LReLU -> conv2+LReLU -> Linear, one batch tile per step
# ----------------------------------------------------------------------------
def _disc_kernel(cols_ref, w1_ref, b1m_ref, w2_ref, b2_ref, wl_ref, bl_ref,
                 feat_ref, out_ref):
    TB = cols_ref.shape[0]

    # ---- conv1 (+ masked bias, LeakyReLU) as ONE lane-dense MXU matmul --------------
    # cols: (TB, 4, 16, 256), lanes = b*16 + k (patch feature).  Reshape merges leading
    # dims only (second-minor 16 is a whole bf16 sublane tile) -> layout-free.
    cols = cols_ref[...].reshape(TB * 64, 256)
    h = jnp.dot(cols, w1_ref[...], preferred_element_type=jnp.float32)   # (TB*64, 256)
    # b1m is the conv1 bias pre-multiplied by conv2's zero-padding mask, so padded grid
    # positions come out exactly 0 (cols are exactly 0 there -> matmul is exactly 0).
    h = _leaky(h.reshape(TB, 4, 16, 256) + b1m_ref[...])                 # lanes = b*16 + c

    # ---- conv2: 8 matmuls, one per (phase grid, row offset dt); both kw/column taps of
    # a slab are folded into the (256, 256) weight, which maps (b, cin) lane groups to
    # (ow, cout) lane groups directly.  No lane slicing needed.
    acc = None
    for g2 in range(8):
        gid, dt = g2 // 2, g2 % 2
        slab = h[:, gid, dt:dt + 8, :].reshape(TB * 8, 256).astype(jnp.bfloat16)
        contrib = jnp.dot(slab, w2_ref[g2], preferred_element_type=jnp.float32)
        acc = contrib if acc is None else acc + contrib
    feat = _leaky(acc + b2_ref[...])                                     # (TB*8, 256) f32
    feat = feat.reshape(TB, 8, 256)                                      # (n, oh, ow*32+c)
    feat_ref[...] = feat                                                 # lane-dense store

    # ---- classifier: Flatten + Linear fused as a VPU/XLU reduction -------------------
    prod = feat * wl_ref[...]                       # wl is zero at padded oh/ow positions
    s = jnp.sum(prod, axis=2)                       # (TB, 8)
    out_ref[...] = jnp.sum(s, axis=1, keepdims=True) + bl_ref[...]


# ----------------------------------------------------------------------------
# Wrapper-side layout prep (cheap HLO, no 16x im2col blow-up in HBM)
# ----------------------------------------------------------------------------
def _build_phase_patches(x_pad):
    """x_pad: (N, 30, 30) -> conv1 patch tensor in conv2 phase-grid layout.

    Returns (N, 4, 9, 16, 16):
      axis1: phase gid = row_parity*2 + col_parity
      axis2: a (9 = 8 used rows + 1 spare so dt=1 slices stay in bounds)
      axis3: b (padded 9 -> 16, kept 16 so lanes merge to a dense 256)
      axis4: conv1 patch feature k = kh*4 + kw  (Cin = 1)
    Entry (gid,a,b) is the conv1 input patch for h_pad[2a+p, 2b+q]
    (h_pad = conv1 output with conv2's 1-pixel zero padding); out-of-range
    positions hold exact zeros.
    """
    taps = [x_pad[:, kh:kh + 28:2, kw:kw + 28:2]
            for kh in range(4) for kw in range(4)]
    patch = jnp.stack(taps, axis=-1)                           # (N, 14, 14, 16)
    grids = []
    for p in (0, 1):
        rows = patch[:, 1::2] if p == 0 else patch[:, 0::2]    # (N, 7, 14, 16)
        for q in (0, 1):
            g = rows[:, :, 1::2] if q == 0 else rows[:, :, 0::2]   # (N, 7, 7, 16)
            a0, b0 = 1 - p, 1 - q
            g = jnp.pad(g, ((0, 0), (a0, 2 - a0), (b0, 9 - b0), (0, 0)))
            grids.append(g)
    return jnp.stack(grids, axis=1)                            # (N, 4, 9, 16, 16)


def _build_phase_mask():
    """(1,4,9,16,16) mask: 1 where the phase-grid position is a real conv1 output."""
    blocks = []
    ones = jnp.ones((1, 7, 7, 16), jnp.float32)
    for p in (0, 1):
        for q in (0, 1):
            a0, b0 = 1 - p, 1 - q
            blocks.append(jnp.pad(ones, ((0, 0), (a0, 2 - a0), (b0, 9 - b0), (0, 0))))
    return jnp.stack(blocks, axis=1)                           # (1, 4, 9, 16, 16)


# ----------------------------------------------------------------------------
# Discriminator forward (params follow the PyTorch layouts)
# ----------------------------------------------------------------------------
def discriminator_forward(params, x, *, tile_n=32):
    N = x.shape[0]
    TB = min(tile_n, _round_up(N, 8))          # multiple of 8 -> legal (TB,1) out block
    N_pad = _round_up(N, TB)

    # conv1 patches in lane-dense layout: (N_pad, 4, 16, 256), lanes = b*16 + k.
    x_pad = jnp.pad(x[:, 0], ((0, N_pad - N), (1, 1), (1, 1)))           # (N_pad, 30, 30)
    cols5 = _build_phase_patches(x_pad)                                  # (N_pad,4,9,16,16)
    cols = jnp.pad(cols5, ((0, 0), (0, 0), (0, 7), (0, 0), (0, 0)))      # a: 9 -> 16
    cols = cols.reshape(N_pad, 4, 16, 256).astype(jnp.bfloat16)

    # conv1 weight expanded block-diagonally over the 16 "b" lane groups: (256, 256).
    w1col = params["w1"].reshape(16, 16).T                               # (k, cout)
    eye16 = jnp.eye(16, dtype=w1col.dtype)
    w1 = jnp.einsum('bB,kc->bkBc', eye16, w1col).reshape(256, 256).astype(jnp.bfloat16)

    # conv1 bias pre-masked with conv2's zero-padding mask: (1, 4, 16, 256).
    b1m = _build_phase_mask() * params["b1"].reshape(1, 1, 1, 1, 16)
    b1m = jnp.pad(b1m, ((0, 0), (0, 0), (0, 7), (0, 0), (0, 0)))
    b1m = b1m.reshape(1, 4, 16, 256).astype(jnp.float32)

    # conv2 weights: one (256, 256) block matrix per (phase grid gid, row offset dt);
    # the two column offsets du are folded in as shifted block-diagonals:
    #   Wc[b*16+ci, j*32+co] = sum_du [b == j+du] * w2[co, ci, 2*dt+p, 2*du+q]
    w2t = jnp.transpose(params["w2"], (2, 3, 1, 0))                      # (kh, kw, ci, co)
    blocks = []
    for gid in range(4):
        p, q = gid // 2, gid % 2
        for dt in range(2):
            wc = jnp.zeros((16, 16, 8, 32), w2t.dtype)                   # (b, ci, j, co)
            for du in range(2):
                sel = (jnp.arange(16)[:, None] == (jnp.arange(8)[None, :] + du))
                wc = wc + (sel.astype(wc.dtype)[:, None, :, None]
                           * w2t[2 * dt + p, 2 * du + q][None, :, None, :])
            blocks.append(wc.reshape(256, 256))
    w2 = jnp.stack(blocks, axis=0).astype(jnp.bfloat16)                  # (8, 256, 256)

    b2 = jnp.tile(params["b2"], 8).reshape(1, 256).astype(jnp.float32)   # lanes = ow*32+co
    # Linear weight permuted to the kernel's (oh, ow*32+co) feat layout, zero at pads.
    wl = params["wl"].reshape(32, 7, 7).transpose(1, 2, 0)               # (7, 7, 32)
    wl = jnp.pad(wl, ((0, 1), (0, 1), (0, 0))).reshape(1, 8, 256).astype(jnp.float32)
    bl = params["bl"].reshape(1, 1).astype(jnp.float32)

    feat_raw, out_raw = pl.pallas_call(
        _disc_kernel,
        out_shape=(jax.ShapeDtypeStruct((N_pad, 8, 256), jnp.float32),
                   jax.ShapeDtypeStruct((N_pad, 1), jnp.float32)),
        grid=(N_pad // TB,),
        in_specs=[
            pl.BlockSpec((TB, 4, 16, 256), lambda i: (i, 0, 0, 0)),
            pl.BlockSpec((256, 256), lambda i: (0, 0)),
            pl.BlockSpec((1, 4, 16, 256), lambda i: (0, 0, 0, 0)),
            pl.BlockSpec((8, 256, 256), lambda i: (0, 0, 0)),
            pl.BlockSpec((1, 256), lambda i: (0, 0)),
            pl.BlockSpec((1, 8, 256), lambda i: (0, 0, 0)),
            pl.BlockSpec((1, 1), lambda i: (0, 0)),
        ],
        out_specs=(
            pl.BlockSpec((TB, 8, 256), lambda i: (i, 0, 0)),
            pl.BlockSpec((TB, 1), lambda i: (i, 0)),
        ),
        compiler_params=pltpu.CompilerParams(
            dimension_semantics=("parallel",),
            vmem_limit_bytes=32 * 1024 * 1024,
        ),
    )(cols, w1, b1m, w2, b2, wl, bl)

    feat = feat_raw[:N].reshape(N, 8, 8, 32)[:, :7, :7, :]
    feat = jnp.transpose(feat, (0, 3, 1, 2))                             # (N, 32, 7, 7)
    out = out_raw[:N]                                                    # (N, 1)
    return out, feat


# ----------------------------------------------------------------------------
# Parameter init (mimics PyTorch defaults) and a plain-JAX reference
# ----------------------------------------------------------------------------
def init_params(key):
    k1, k2, k3 = jax.random.split(key, 3)

    def uniform_fan_in(k, shape, fan_in):
        bound = 1.0 / jnp.sqrt(fan_in)
        return jax.random.uniform(k, shape, jnp.float32, -bound, bound)

    kw1, kb1 = jax.random.split(k1)
    kw2, kb2 = jax.random.split(k2)
    kw3, kb3 = jax.random.split(k3)
    return {
        "w1": uniform_fan_in(kw1, (16, 1, 4, 4), 1 * 4 * 4),
        "b1": uniform_fan_in(kb1, (16,), 1 * 4 * 4),
        "w2": uniform_fan_in(kw2, (32, 16, 4, 4), 16 * 4 * 4),
        "b2": uniform_fan_in(kb2, (32,), 16 * 4 * 4),
        "wl": uniform_fan_in(kw3, (1, 32 * 7 * 7), 32 * 7 * 7),          # PyTorch (out, in)
        "bl": uniform_fan_in(kb3, (1,), 32 * 7 * 7),
    }


def _reference_forward(params, x):
    dn = ("NCHW", "OIHW", "NCHW")
    h = jax.lax.conv_general_dilated(x, params["w1"], (2, 2), ((1, 1), (1, 1)),
                                     dimension_numbers=dn)
    h = _leaky(h + params["b1"].reshape(1, 16, 1, 1))
    f = jax.lax.conv_general_dilated(h, params["w2"], (2, 2), ((1, 1), (1, 1)),
                                     dimension_numbers=dn)
    f = _leaky(f + params["b2"].reshape(1, 32, 1, 1))
    o = f.reshape(x.shape[0], -1) @ params["wl"].T + params["bl"]
    return o, f


if __name__ == "__main__":
    key = jax.random.PRNGKey(0)
    pkey, xkey = jax.random.split(key)
    params = init_params(pkey)

    fwd = jax.jit(discriminator_forward)

    # Input implied by the module (Linear expects 32*7*7 => 28x28 single-channel).
    x = jax.random.normal(xkey, (2, 1, 28, 28), jnp.float32)
    out, feat = fwd(params, x)
    jax.block_until_ready((out, feat))
    assert out.shape == (2, 1), out.shape
    assert feat.shape == (2, 32, 7, 7), feat.shape

    # Numerical check vs plain-JAX reference (bf16 matmul inputs => loose tolerance).
    out_ref, feat_ref = _reference_forward(params, x)
    assert float(jnp.max(jnp.abs(feat - feat_ref))) < 1e-1
    assert float(jnp.max(jnp.abs(out - out_ref))) < 5e-2

    # Exercise the multi-tile (grid > 1) path with batch padding.
    x_big = jax.random.normal(xkey, (80, 1, 28, 28), jnp.float32)
    out_b, feat_b = fwd(params, x_big)
    jax.block_until_ready((out_b, feat_b))
    assert out_b.shape == (80, 1) and feat_b.shape == (80, 32, 7, 7)
    out_rb, feat_rb = _reference_forward(params, x_big)
    assert float(jnp.max(jnp.abs(feat_b - feat_rb))) < 1e-1
    assert float(jnp.max(jnp.abs(out_b - out_rb))) < 5e-2

    print("KERNEL_OK")
</pallas_src>

<mosaic_0001>
module attributes {stable_mosaic.version = 11 : i64} {
  func.func @_disc_kernel(%arg0: i32, %arg1: memref<8x4x16x256xbf16, #tpu.memory_space<vmem>>, %arg2: memref<256x256xbf16, #tpu.memory_space<vmem>>, %arg3: memref<1x4x16x256xf32, #tpu.memory_space<vmem>>, %arg4: memref<8x256x256xbf16, #tpu.memory_space<vmem>>, %arg5: memref<1x256xf32, #tpu.memory_space<vmem>>, %arg6: memref<1x8x256xf32, #tpu.memory_space<vmem>>, %arg7: memref<1x1xf32, #tpu.memory_space<vmem>>, %arg8: memref<8x8x256xf32, #tpu.memory_space<vmem>>, %arg9: memref<8x1xf32, #tpu.memory_space<vmem>>) attributes {dimension_semantics = [#tpu.dimension_semantics<parallel>], iteration_bounds = array<i64: 1>, scalar_prefetch = 0 : i64, scratch_operands = 0 : i64, tpu.core_type = #tpu.core_type<tc>, window_params = [{transform_indices = @transform_0, window_bounds = array<i64: 8, 4, 16, 256>}, {pipeline_mode = #tpu.pipeline_mode<synchronous>, transform_indices = @transform_1, window_bounds = array<i64: 256, 256>}, {pipeline_mode = #tpu.pipeline_mode<synchronous>, transform_indices = @transform_2, window_bounds = array<i64: 1, 4, 16, 256>}, {pipeline_mode = #tpu.pipeline_mode<synchronous>, transform_indices = @transform_3, window_bounds = array<i64: 8, 256, 256>}, {pipeline_mode = #tpu.pipeline_mode<synchronous>, transform_indices = @transform_4, window_bounds = array<i64: 1, 256>}, {pipeline_mode = #tpu.pipeline_mode<synchronous>, transform_indices = @transform_5, window_bounds = array<i64: 1, 8, 256>}, {pipeline_mode = #tpu.pipeline_mode<synchronous>, transform_indices = @transform_6, window_bounds = array<i64: 1, 1>}, {transform_indices = @transform_7, window_bounds = array<i64: 8, 8, 256>}, {transform_indices = @transform_8, window_bounds = array<i64: 8, 1>}]} {
    %c0 = arith.constant 0 : index
    %c0_0 = arith.constant 0 : index
    %c0_1 = arith.constant 0 : index
    %c0_2 = arith.constant 0 : index
    %0 = vector.load %arg1[%c0, %c0_0, %c0_1, %c0_2] : memref<8x4x16x256xbf16, #tpu.memory_space<vmem>>, vector<8x4x16x256xbf16>
    %1 = vector.shape_cast %0 : vector<8x4x16x256xbf16> to vector<512x256xbf16>
    %c0_3 = arith.constant 0 : index
    %c0_4 = arith.constant 0 : index
    %2 = vector.load %arg2[%c0_3, %c0_4] : memref<256x256xbf16, #tpu.memory_space<vmem>>, vector<256x256xbf16>
    %cst = arith.constant dense<0.000000e+00> : vector<512x256xf32>
    %3 = tpu.matmul %1, %2, %cst {dimension_numbers = #tpu.dot_dimension_numbers<[1], [0], [0], [1], [0, 0, 1, 1], [], []>} : vector<512x256xbf16>, vector<256x256xbf16>, vector<512x256xf32> -> vector<512x256xf32>
    %4 = vector.shape_cast %3 : vector<512x256xf32> to vector<8x4x16x256xf32>
    %c0_5 = arith.constant 0 : index
    %c0_6 = arith.constant 0 : index
    %c0_7 = arith.constant 0 : index
    %c0_8 = arith.constant 0 : index
    %5 = vector.load %arg3[%c0_5, %c0_6, %c0_7, %c0_8] : memref<1x4x16x256xf32, #tpu.memory_space<vmem>>, vector<1x4x16x256xf32>
    %6 = vector.broadcast %5 : vector<1x4x16x256xf32> to vector<8x4x16x256xf32>
    %7 = arith.addf %4, %6 : vector<8x4x16x256xf32>
    %cst_9 = arith.constant 0.000000e+00 : f32
    %8 = vector.broadcast %cst_9 : f32 to vector<8x4x16x256xf32>
    %9 = arith.cmpf ogt, %7, %8 : vector<8x4x16x256xf32>
    %cst_10 = arith.constant 2.000000e-01 : f32
    %10 = vector.broadcast %cst_10 : f32 to vector<8x4x16x256xf32>
    %11 = arith.mulf %10, %7 : vector<8x4x16x256xf32>
    %12 = arith.select %9, %7, %11 : vector<8x4x16x256xi1>, vector<8x4x16x256xf32>
    %13 = vector.extract_strided_slice %12 {offsets = [0, 0, 0, 0], sizes = [8, 1, 8, 256], strides = [1, 1, 1, 1]} : vector<8x4x16x256xf32> to vector<8x1x8x256xf32>
    %14 = vector.shape_cast %13 : vector<8x1x8x256xf32> to vector<8x8x256xf32>
    %15 = vector.shape_cast %14 : vector<8x8x256xf32> to vector<64x256xf32>
    %16 = arith.truncf %15 : vector<64x256xf32> to vector<64x256xbf16>
    %c0_11 = arith.constant 0 : index
    %c0_12 = arith.constant 0 : index
    %c0_13 = arith.constant 0 : index
    %17 = vector.load %arg4[%c0_11, %c0_12, %c0_13] : memref<8x256x256xbf16, #tpu.memory_space<vmem>>, vector<1x256x256xbf16>
    %18 = vector.shape_cast %17 : vector<1x256x256xbf16> to vector<256x256xbf16>
    %cst_14 = arith.constant dense<0.000000e+00> : vector<64x256xf32>
    %19 = tpu.matmul %16, %18, %cst_14 {dimension_numbers = #tpu.dot_dimension_numbers<[1], [0], [0], [1], [0, 0, 1, 1], [], []>} : vector<64x256xbf16>, vector<256x256xbf16>, vector<64x256xf32> -> vector<64x256xf32>
    %20 = vector.extract_strided_slice %12 {offsets = [0, 0, 1, 0], sizes = [8, 1, 8, 256], strides = [1, 1, 1, 1]} : vector<8x4x16x256xf32> to vector<8x1x8x256xf32>
    %21 = vector.shape_cast %20 : vector<8x1x8x256xf32> to vector<8x8x256xf32>
    %22 = vector.shape_cast %21 : vector<8x8x256xf32> to vector<64x256xf32>
    %23 = arith.truncf %22 : vector<64x256xf32> to vector<64x256xbf16>
    %c1 = arith.constant 1 : index
    %c0_15 = arith.constant 0 : index
    %c0_16 = arith.constant 0 : index
    %24 = vector.load %arg4[%c1, %c0_15, %c0_16] : memref<8x256x256xbf16, #tpu.memory_space<vmem>>, vector<1x256x256xbf16>
    %25 = vector.shape_cast %24 : vector<1x256x256xbf16> to vector<256x256xbf16>
    %cst_17 = arith.constant dense<0.000000e+00> : vector<64x256xf32>
    %26 = tpu.matmul %23, %25, %cst_17 {dimension_numbers = #tpu.dot_dimension_numbers<[1], [0], [0], [1], [0, 0, 1, 1], [], []>} : vector<64x256xbf16>, vector<256x256xbf16>, vector<64x256xf32> -> vector<64x256xf32>
    %27 = arith.addf %19, %26 : vector<64x256xf32>
    %28 = vector.extract_strided_slice %12 {offsets = [0, 1, 0, 0], sizes = [8, 1, 8, 256], strides = [1, 1, 1, 1]} : vector<8x4x16x256xf32> to vector<8x1x8x256xf32>
    %29 = vector.shape_cast %28 : vector<8x1x8x256xf32> to vector<8x8x256xf32>
    %30 = vector.shape_cast %29 : vector<8x8x256xf32> to vector<64x256xf32>
    %31 = arith.truncf %30 : vector<64x256xf32> to vector<64x256xbf16>
    %c2 = arith.constant 2 : index
    %c0_18 = arith.constant 0 : index
    %c0_19 = arith.constant 0 : index
    %32 = vector.load %arg4[%c2, %c0_18, %c0_19] : memref<8x256x256xbf16, #tpu.memory_space<vmem>>, vector<1x256x256xbf16>
    %33 = vector.shape_cast %32 : vector<1x256x256xbf16> to vector<256x256xbf16>
    %cst_20 = arith.constant dense<0.000000e+00> : vector<64x256xf32>
    %34 = tpu.matmul %31, %33, %cst_20 {dimension_numbers = #tpu.dot_dimension_numbers<[1], [0], [0], [1], [0, 0, 1, 1], [], []>} : vector<64x256xbf16>, vector<256x256xbf16>, vector<64x256xf32> -> vector<64x256xf32>
    %35 = arith.addf %27, %34 : vector<64x256xf32>
    %36 = vector.extract_strided_slice %12 {offsets = [0, 1, 1, 0], sizes = [8, 1, 8, 256], strides = [1, 1, 1, 1]} : vector<8x4x16x256xf32> to vector<8x1x8x256xf32>
    %37 = vector.shape_cast %36 : vector<8x1x8x256xf32> to vector<8x8x256xf32>
    %38 = vector.shape_cast %37 : vector<8x8x256xf32> to vector<64x256xf32>
    %39 = arith.truncf %38 : vector<64x256xf32> to vector<64x256xbf16>
    %c3 = arith.constant 3 : index
    %c0_21 = arith.constant 0 : index
    %c0_22 = arith.constant 0 : index
    %40 = vector.load %arg4[%c3, %c0_21, %c0_22] : memref<8x256x256xbf16, #tpu.memory_space<vmem>>, vector<1x256x256xbf16>
    %41 = vector.shape_cast %40 : vector<1x256x256xbf16> to vector<256x256xbf16>
    %cst_23 = arith.constant dense<0.000000e+00> : vector<64x256xf32>
    %42 = tpu.matmul %39, %41, %cst_23 {dimension_numbers = #tpu.dot_dimension_numbers<[1], [0], [0], [1], [0, 0, 1, 1], [], []>} : vector<64x256xbf16>, vector<256x256xbf16>, vector<64x256xf32> -> vector<64x256xf32>
    %43 = arith.addf %35, %42 : vector<64x256xf32>
    %44 = vector.extract_strided_slice %12 {offsets = [0, 2, 0, 0], sizes = [8, 1, 8, 256], strides = [1, 1, 1, 1]} : vector<8x4x16x256xf32> to vector<8x1x8x256xf32>
    %45 = vector.shape_cast %44 : vector<8x1x8x256xf32> to vector<8x8x256xf32>
    %46 = vector.shape_cast %45 : vector<8x8x256xf32> to vector<64x256xf32>
    %47 = arith.truncf %46 : vector<64x256xf32> to vector<64x256xbf16>
    %c4 = arith.constant 4 : index
    %c0_24 = arith.constant 0 : index
    %c0_25 = arith.constant 0 : index
    %48 = vector.load %arg4[%c4, %c0_24, %c0_25] : memref<8x256x256xbf16, #tpu.memory_space<vmem>>, vector<1x256x256xbf16>
    %49 = vector.shape_cast %48 : vector<1x256x256xbf16> to vector<256x256xbf16>
    %cst_26 = arith.constant dense<0.000000e+00> : vector<64x256xf32>
    %50 = tpu.matmul %47, %49, %cst_26 {dimension_numbers = #tpu.dot_dimension_numbers<[1], [0], [0], [1], [0, 0, 1, 1], [], []>} : vector<64x256xbf16>, vector<256x256xbf16>, vector<64x256xf32> -> vector<64x256xf32>
    %51 = arith.addf %43, %50 : vector<64x256xf32>
    %52 = vector.extract_strided_slice %12 {offsets = [0, 2, 1, 0], sizes = [8, 1, 8, 256], strides = [1, 1, 1, 1]} : vector<8x4x16x256xf32> to vector<8x1x8x256xf32>
    %53 = vector.shape_cast %52 : vector<8x1x8x256xf32> to vector<8x8x256xf32>
    %54 = vector.shape_cast %53 : vector<8x8x256xf32> to vector<64x256xf32>
    %55 = arith.truncf %54 : vector<64x256xf32> to vector<64x256xbf16>
    %c5 = arith.constant 5 : index
    %c0_27 = arith.constant 0 : index
    %c0_28 = arith.constant 0 : index
    %56 = vector.load %arg4[%c5, %c0_27, %c0_28] : memref<8x256x256xbf16, #tpu.memory_space<vmem>>, vector<1x256x256xbf16>
    %57 = vector.shape_cast %56 : vector<1x256x256xbf16> to vector<256x256xbf16>
    %cst_29 = arith.constant dense<0.000000e+00> : vector<64x256xf32>
    %58 = tpu.matmul %55, %57, %cst_29 {dimension_numbers = #tpu.dot_dimension_numbers<[1], [0], [0], [1], [0, 0, 1, 1], [], []>} : vector<64x256xbf16>, vector<256x256xbf16>, vector<64x256xf32> -> vector<64x256xf32>
    %59 = arith.addf %51, %58 : vector<64x256xf32>
    %60 = vector.extract_strided_slice %12 {offsets = [0, 3, 0, 0], sizes = [8, 1, 8, 256], strides = [1, 1, 1, 1]} : vector<8x4x16x256xf32> to vector<8x1x8x256xf32>
    %61 = vector.shape_cast %60 : vector<8x1x8x256xf32> to vector<8x8x256xf32>
    %62 = vector.shape_cast %61 : vector<8x8x256xf32> to vector<64x256xf32>
    %63 = arith.truncf %62 : vector<64x256xf32> to vector<64x256xbf16>
    %c6 = arith.constant 6 : index
    %c0_30 = arith.constant 0 : index
    %c0_31 = arith.constant 0 : index
    %64 = vector.load %arg4[%c6, %c0_30, %c0_31] : memref<8x256x256xbf16, #tpu.memory_space<vmem>>, vector<1x256x256xbf16>
    %65 = vector.shape_cast %64 : vector<1x256x256xbf16> to vector<256x256xbf16>
    %cst_32 = arith.constant dense<0.000000e+00> : vector<64x256xf32>
    %66 = tpu.matmul %63, %65, %cst_32 {dimension_numbers = #tpu.dot_dimension_numbers<[1], [0], [0], [1], [0, 0, 1, 1], [], []>} : vector<64x256xbf16>, vector<256x256xbf16>, vector<64x256xf32> -> vector<64x256xf32>
    %67 = arith.addf %59, %66 : vector<64x256xf32>
    %68 = vector.extract_strided_slice %12 {offsets = [0, 3, 1, 0], sizes = [8, 1, 8, 256], strides = [1, 1, 1, 1]} : vector<8x4x16x256xf32> to vector<8x1x8x256xf32>
    %69 = vector.shape_cast %68 : vector<8x1x8x256xf32> to vector<8x8x256xf32>
    %70 = vector.shape_cast %69 : vector<8x8x256xf32> to vector<64x256xf32>
    %71 = arith.truncf %70 : vector<64x256xf32> to vector<64x256xbf16>
    %c7 = arith.constant 7 : index
    %c0_33 = arith.constant 0 : index
    %c0_34 = arith.constant 0 : index
    %72 = vector.load %arg4[%c7, %c0_33, %c0_34] : memref<8x256x256xbf16, #tpu.memory_space<vmem>>, vector<1x256x256xbf16>
    %73 = vector.shape_cast %72 : vector<1x256x256xbf16> to vector<256x256xbf16>
    %cst_35 = arith.constant dense<0.000000e+00> : vector<64x256xf32>
    %74 = tpu.matmul %71, %73, %cst_35 {dimension_numbers = #tpu.dot_dimension_numbers<[1], [0], [0], [1], [0, 0, 1, 1], [], []>} : vector<64x256xbf16>, vector<256x256xbf16>, vector<64x256xf32> -> vector<64x256xf32>
    %75 = arith.addf %67, %74 : vector<64x256xf32>
    %c0_36 = arith.constant 0 : index
    %c0_37 = arith.constant 0 : index
    %76 = vector.load %arg5[%c0_36, %c0_37] : memref<1x256xf32, #tpu.memory_space<vmem>>, vector<1x256xf32>
    %77 = vector.broadcast %76 : vector<1x256xf32> to vector<64x256xf32>
    %78 = arith.addf %75, %77 : vector<64x256xf32>
    %cst_38 = arith.constant 0.000000e+00 : f32
    %79 = vector.broadcast %cst_38 : f32 to vector<64x256xf32>
    %80 = arith.cmpf ogt, %78, %79 : vector<64x256xf32>
    %cst_39 = arith.constant 2.000000e-01 : f32
    %81 = vector.broadcast %cst_39 : f32 to vector<64x256xf32>
    %82 = arith.mulf %81, %78 : vector<64x256xf32>
    %83 = arith.select %80, %78, %82 : vector<64x256xi1>, vector<64x256xf32>
    %84 = vector.shape_cast %83 : vector<64x256xf32> to vector<8x8x256xf32>
    %c0_40 = arith.constant 0 : index
    %c0_41 = arith.constant 0 : index
    %c0_42 = arith.constant 0 : index
    %85 = vector.load %arg8[%c0_40, %c0_41, %c0_42] : memref<8x8x256xf32, #tpu.memory_space<vmem>>, vector<8x8x256xf32>
    tpu.vector_store %arg8[%c0_40, %c0_41, %c0_42], %84 {strides = array<i32>} : memref<8x8x256xf32, #tpu.memory_space<vmem>>, vector<8x8x256xf32>,
    %c0_43 = arith.constant 0 : index
    %c0_44 = arith.constant 0 : index
    %c0_45 = arith.constant 0 : index
    %86 = vector.load %arg6[%c0_43, %c0_44, %c0_45] : memref<1x8x256xf32, #tpu.memory_space<vmem>>, vector<1x8x256xf32>
    %87 = vector.broadcast %86 : vector<1x8x256xf32> to vector<8x8x256xf32>
    %88 = arith.mulf %84, %87 : vector<8x8x256xf32>
    %cst_46 = arith.constant dense<0.000000e+00> : vector<8x8xf32>
    %89 = vector.multi_reduction <add>, %88, %cst_46 [2] : vector<8x8x256xf32> to vector<8x8xf32>
    %cst_47 = arith.constant dense<0.000000e+00> : vector<8xf32>
    %90 = vector.multi_reduction <add>, %89, %cst_47 [1] : vector<8x8xf32> to vector<8xf32>
    %91 = vector.shape_cast %90 : vector<8xf32> to vector<8x1xf32>
    %c0_48 = arith.constant 0 : index
    %c0_49 = arith.constant 0 : index
    %92 = vector.load %arg7[%c0_48, %c0_49] : memref<1x1xf32, #tpu.memory_space<vmem>>, vector<1x1xf32>
    %93 = vector.broadcast %92 : vector<1x1xf32> to vector<8x1xf32>
    %94 = arith.addf %91, %93 : vector<8x1xf32>
    %c0_50 = arith.constant 0 : index
    %c0_51 = arith.constant 0 : index
    %95 = vector.load %arg9[%c0_50, %c0_51] : memref<8x1xf32, #tpu.memory_space<vmem>>, vector<8x1xf32>
    tpu.vector_store %arg9[%c0_50, %c0_51], %94 {strides = array<i32>} : memref<8x1xf32, #tpu.memory_space<vmem>>, vector<8x1xf32>,
    return
  }
  func.func @transform_0(%arg0: i32) -> (i32, i32, i32, i32) {
    %c0_i32 = arith.constant 0 : i32
    %c0_i32_0 = arith.constant 0 : i32
    %c0_i32_1 = arith.constant 0 : i32
    %c0_i32_2 = arith.constant 0 : i32
    return %arg0, %c0_i32, %c0_i32_0, %c0_i32_1 : i32, i32, i32, i32
  }
  func.func @transform_1(%arg0: i32) -> (i32, i32) {
    %c0_i32 = arith.constant 0 : i32
    %c0_i32_0 = arith.constant 0 : i32
    %c0_i32_1 = arith.constant 0 : i32
    return %c0_i32, %c0_i32_0 : i32, i32
  }
  func.func @transform_2(%arg0: i32) -> (i32, i32, i32, i32) {
    %c0_i32 = arith.constant 0 : i32
    %c0_i32_0 = arith.constant 0 : i32
    %c0_i32_1 = arith.constant 0 : i32
    %c0_i32_2 = arith.constant 0 : i32
    %c0_i32_3 = arith.constant 0 : i32
    return %c0_i32, %c0_i32_0, %c0_i32_1, %c0_i32_2 : i32, i32, i32, i32
  }
  func.func @transform_3(%arg0: i32) -> (i32, i32, i32) {
    %c0_i32 = arith.constant 0 : i32
    %c0_i32_0 = arith.constant 0 : i32
    %c0_i32_1 = arith.constant 0 : i32
    %c0_i32_2 = arith.constant 0 : i32
    return %c0_i32, %c0_i32_0, %c0_i32_1 : i32, i32, i32
  }
  func.func @transform_4(%arg0: i32) -> (i32, i32) {
    %c0_i32 = arith.constant 0 : i32
    %c0_i32_0 = arith.constant 0 : i32
    %c0_i32_1 = arith.constant 0 : i32
    return %c0_i32, %c0_i32_0 : i32, i32
  }
  func.func @transform_5(%arg0: i32) -> (i32, i32, i32) {
    %c0_i32 = arith.constant 0 : i32
    %c0_i32_0 = arith.constant 0 : i32
    %c0_i32_1 = arith.constant 0 : i32
    %c0_i32_2 = arith.constant 0 : i32
    return %c0_i32, %c0_i32_0, %c0_i32_1 : i32, i32, i32
  }
  func.func @transform_6(%arg0: i32) -> (i32, i32) {
    %c0_i32 = arith.constant 0 : i32
    %c0_i32_0 = arith.constant 0 : i32
    %c0_i32_1 = arith.constant 0 : i32
    return %c0_i32, %c0_i32_0 : i32, i32
  }
  func.func @transform_7(%arg0: i32) -> (i32, i32, i32) {
    %c0_i32 = arith.constant 0 : i32
    %c0_i32_0 = arith.constant 0 : i32
    %c0_i32_1 = arith.constant 0 : i32
    return %arg0, %c0_i32, %c0_i32_0 : i32, i32, i32
  }
  func.func @transform_8(%arg0: i32) -> (i32, i32) {
    %c0_i32 = arith.constant 0 : i32
    %c0_i32_0 = arith.constant 0 : i32
    return %arg0, %c0_i32 : i32, i32
  }
}

</mosaic_0001>

<bundles_post_ra>
// kernel: tile.9
= control target key start
LH: loop header
LB: loop body
LE: loop exit
PB: predicated region body
PF: predicated region fallthrough
CT: control target
= control target key end

     0   :  { %s7_s6 = smov 3  ;;  %s14_s9 = smov 3  ;;  %vm4_vm0 = vcmask 261120   ;;  %vm11_vm1 = vcmask 1048320   ;;  %vm18_vm2 = vcmask 785920   ;;  %vm25_vm3 = vcmask 523520   ;;  %s76_s0 = inlined_call_operand.vmem [shape: f32[8,32], index: 0, kind: input, shape index: {}]   ;;  %s77_s1 = inlined_call_operand.vmem [shape: f32[1,256], index: 1, kind: output, shape index: {}]  }
   0x1   :  { %v38_v0 = vld [vmem:[%s76_s0 + $0x3] ss:$4 sm:%s7_s6]   ;;  %s45_s10 = smov 96   ;;  %s21_s11 = smov 3  ;;  %v39_v1 = vld [vmem:[%s76_s0 + $0x2] ss:$4 sm:%s14_s9]  }
   0x2   :  { %9 = vrot.lane.b32.xlu0 %v38_v0, %s45_s10  ;;  %v40_v2 = vld [vmem:[%s76_s0 + $0x1] ss:$4 sm:%s21_s11]   ;;  %s2_s16 = smov 3  ;;  %s46_s17 = smov 32  }
   0x3   :  { %23 = vrot.lane.b32.xlu1 %v40_v2, %s46_s17  ;;  %v3_v3 = vld [vmem:[%s76_s0] ss:$4 sm:%s2_s16]   ;;  %s47_s0 = smov 64  }
   0x4   :  { %5 = vst.msk [vmem:[#allocation0] ss:$8 sm:$0x3] %vm4_vm0, %v3_v3  }
   0x6   :  { %16 = vrot.lane.b32.xlu0 %v39_v1, %s47_s0 }
  0x74   :  { %v10_v4 = vpop.permute.xlu0 %9  }
  0x75   :  { %12 = vst.msk [vmem:[#allocation0] ss:$8 sm:$0x3] %vm11_vm1, %v10_v4   ;;  %v24_v5 = vpop.permute.xlu1 %23  }
  0x78   :  { %v17_v6 = vpop.permute.xlu0 %16  }
  0x79   :  { %19 = vst.msk [vmem:[#allocation0] ss:$8 sm:$0x3] %vm18_vm2, %v17_v6  }
  0x7a   :  { %26 = vst.msk [vmem:[#allocation0] ss:$8 sm:$0x3] %vm25_vm3, %v24_v5  }
  0x81   :  { %v30_v7 = vld [vmem:[#allocation0] sm:$0x1]  ;;  %v34_v8 = vld [vmem:[#allocation0 + $0x8] sm:$0x1] }
  0x82   :  { %32 = vst [vmem:[%s77_s1] sm:$0x1] %v30_v7  ;;  %41 = vst [vmem:[%s77_s1 + $0x1] sm:$0x1] %v34_v8 }

// kernel: tile.8
= control target key start
LH: loop header
LB: loop body
LE: loop exit
PB: predicated region body
PF: predicated region fallthrough
CT: control target
= control target key end

     0   :  { %2 = vsyncpa [#allocation1], 0  ;;  %s44_s6 = smov [#allocation0]   ;;  %s70_s0 = inlined_call_operand.hbm [shape: f32[32], index: 0, kind: input, shape index: {}]   ;;  %s71_s1 = inlined_call_operand.vmem [shape: f32[8,32], index: 1, kind: output, shape index: {}]  }
   0x1   :  { %s9_s7 = sshll.u32 %s44_s6, 4  ;;  %s20_s10 = scalar_lea.hbm %s70_s0, 16  ;;  %s10_s7 = int_to_ptr.vmem [resolvable:$true] %s9_s7 }
   0x2   :  { %p21_p0 = scmp.ne.s32.totalorder %s70_s0, %s20_s10  ;;  %p24_p1 = scmp.lt.u32.totalorder %s20_s10, %s70_s0 }
   0x4   :  { %p26_p2 = pnand %p24_p1, %p21_p0 }
   0x6   :  { %29 = shalt.err (!%p26_p2)
}
   0x7   :  { %s30_s15 = scalar_lea.vmem %s10_s7, 16  ;;  %s34_s16 = scalar_lea.vmem %s10_s7, 32 }
   0x8   :  { %p31_p3 = scmp.ne.s32.totalorder %s10_s7, %s30_s15  ;;  %p35_p4 = scmp.lt.s32.totalorder %s10_s7, %s10_s7 }
   0x9   :  { %p36_p5 = scmp.lt.s32.totalorder %s34_s16, %s30_s15 }
   0xb   :  { %p37_p6 = por %p36_p5, %p35_p4 }
   0xd   :  { %p38_p7 = pnand %p37_p6, %p31_p3 }
   0xf   :  { %41 = shalt.err (!%p38_p7)
}
  0x10   :  { %12 = dma.hbm_to_vmem [thread:$0]  %s70_s0, 16, %s10_s7, [#allocation1]  }
  0x11   :  { %42 = dma.done.wait [#allocation1], 16  }
  0x12   :  { %43 = vsyncadd [#allocation1], 4294967280  ;;  %v16_v0 = vld [vmem:[#allocation0] ss:$0 sm:$0xff] }
  0x13   :  { %17 = vst [vmem:[%s71_s1] sm:$0xff] %v16_v0 }
  0x14   :  { %18 = vsyncpa [#allocation1], 1 }

// kernel: discriminator_forward.1
= control target key start
LH: loop header
LB: loop body
LE: loop exit
PB: predicated region body
PF: predicated region fallthrough
CT: control target
= control target key end

     0   :  { %vm1559_vm4 = vcmask 1046528   ;;  %s7762_s1 = inlined_call_operand.vmem [shape: bf16[256,256], index: 1, kind: input, shape index: {}]   ;;  %s7763_s0 = inlined_call_operand.vmem [shape: bf16[8,4,16,256], index: 0, kind: input, shape index: {}]   ;;  %s7764_s3 = inlined_call_operand.vmem [shape: bf16[8,256,256], index: 3, kind: input, shape index: {}]   ;;  %s7765_s2 = inlined_call_operand.vmem [shape: f32[1,4,16,256], index: 2, kind: input, shape index: {}]   ;;  %s7766_s4 = inlined_call_operand.vmem [shape: f32[1,256], index: 4, kind: input, shape index: {}]   ;;  %s7767_s5 = inlined_call_operand.vmem [shape: f32[1,8,256], index: 5, kind: input, shape index: {}]   ;;  %s7768_s7 = inlined_call_operand.vmem [shape: f32[8,8,256], index: 7, kind: output, shape index: {0}]   ;;  %s7769_s6 = inlined_call_operand.<no memory space> [shape: f32[1,1], index: 6, kind: input, shape index: {}]   ;;  %s7770_s8 = inlined_call_operand.vmem [shape: f32[8,1], index: 8, kind: output, shape index: {1}]  }
   0x1   :  { %v5061_v0 = vld [vmem:[%s7762_s1 + $0x4] ss:$8 sps:$4 sm:$0xff]   ;;  %v5063_v1 = vld [vmem:[%s7762_s1] ss:$8 sps:$4 sm:$0xff]   ;;  %v5064_v2 = vld [vmem:[%s7762_s1 + $0x14] ss:$8 sps:$4 sm:$0xff]  }
   0x2   :  { %606 = vmatprep.subr.bf16.mxu0 %v5061_v0  ;;  %v5066_v3 = vld [vmem:[%s7762_s1 + $0x10] ss:$8 sps:$4 sm:$0xff]   ;;  %v5067_v4 = vld [vmem:[%s7762_s1 + $0x24] ss:$8 sps:$4 sm:$0xff]   ;;  %v5069_v5 = vld [vmem:[%s7762_s1 + $0x20] ss:$8 sps:$4 sm:$0xff]  }
   0x3   :  { %607 = vmatpush1.bf16.msra.mxu0 %v5063_v1  ;;  %v5070_v6 = vld [vmem:[%s7762_s1 + $0x34] ss:$8 sps:$4 sm:$0xff]   ;;  %v5072_v7 = vld [vmem:[%s7762_s1 + $0x30] ss:$8 sps:$4 sm:$0xff]   ;;  %v5073_v8 = vld [vmem:[%s7762_s1 + $0x44] ss:$8 sps:$4 sm:$0xff]  }
   0x4   :  { %608 = vmatprep.subr.bf16.mxu0 %v5064_v2  ;;  %v5075_v9 = vld [vmem:[%s7762_s1 + $0x40] ss:$8 sps:$4 sm:$0xff]   ;;  %v5076_v10 = vld [vmem:[%s7762_s1 + $0x54] ss:$8 sps:$4 sm:$0xff]   ;;  %v5078_v11 = vld [vmem:[%s7762_s1 + $0x50] ss:$8 sps:$4 sm:$0xff]  }
   0x5   :  { %v5079_v12 = vld [vmem:[%s7762_s1 + $0x64] ss:$8 sps:$4 sm:$0xff]   ;;  %v5081_v14 = vld [vmem:[%s7762_s1 + $0x60] ss:$8 sps:$4 sm:$0xff]   ;;  %v5082_v15 = vld [vmem:[%s7762_s1 + $0x74] ss:$8 sps:$4 sm:$0xff]  }
   0x6   :  { %v5111_v13 = vld [vmem:[%s7763_s0 + $0x4] ss:$8 sps:$4 sm:$0xff]   ;;  %v5084_v16 = vld [vmem:[%s7762_s1 + $0x70] ss:$8 sps:$4 sm:$0xff]   ;;  %v5087_v18 = vld [vmem:[%s7762_s1 + $0x80] ss:$8 sps:$4 sm:$0xff]  }
   0x7   :  { %609 = vmatpush1.bf16.msra.mxu0 %v5066_v3  ;;  %638 = vmatprep.mubr.bf16.mxu0 %v5111_v13  ;;  %v5085_v17 = vld [vmem:[%s7762_s1 + $0x84] ss:$8 sps:$4 sm:$0xff]   ;;  %v5088_v19 = vld [vmem:[%s7762_s1 + $0x94] ss:$8 sps:$4 sm:$0xff]   ;;  %v5090_v20 = vld [vmem:[%s7762_s1 + $0x90] ss:$8 sps:$4 sm:$0xff]  }
   0x8   :  { %610 = vmatprep.subr.bf16.mxu0 %v5067_v4  ;;  %v5091_v21 = vld [vmem:[%s7762_s1 + $0xa4] ss:$8 sps:$4 sm:$0xff]   ;;  %v5093_v22 = vld [vmem:[%s7762_s1 + $0xa0] ss:$8 sps:$4 sm:$0xff]   ;;  %v5094_v23 = vld [vmem:[%s7762_s1 + $0xb4] ss:$8 sps:$4 sm:$0xff]  }
   0x9   :  { %v5096_v24 = vld [vmem:[%s7762_s1 + $0xb0] ss:$8 sps:$4 sm:$0xff]   ;;  %v5097_v25 = vld [vmem:[%s7762_s1 + $0xc4] ss:$8 sps:$4 sm:$0xff]   ;;  %v5099_v26 = vld [vmem:[%s7762_s1 + $0xc0] ss:$8 sps:$4 sm:$0xff]  }
   0xa   :  { %v5100_v27 = vld [vmem:[%s7762_s1 + $0xd4] ss:$8 sps:$4 sm:$0xff]   ;;  %v5102_v28 = vld [vmem:[%s7762_s1 + $0xd0] ss:$8 sps:$4 sm:$0xff]   ;;  %v5103_v29 = vld [vmem:[%s7762_s1 + $0xe4] ss:$8 sps:$4 sm:$0xff]  }
   0xb   :  { %611 = vmatpush1.bf16.msra.mxu0 %v5069_v5  ;;  %v5105_v30 = vld [vmem:[%s7762_s1 + $0xe0] ss:$8 sps:$4 sm:$0xff]   ;;  %v5106_v31 = vld [vmem:[%s7762_s1 + $0xf4] ss:$8 sps:$4 sm:$0xff]   ;;  %v5108_v32 = vld [vmem:[%s7762_s1 + $0xf0] ss:$8 sps:$4 sm:$0xff]  }
   0xc   :  { %612 = vmatprep.subr.bf16.mxu0 %v5070_v6  ;;  %v5109_v33 = vld [vmem:[%s7763_s0] ss:$8 sps:$4 sm:$0xff]   ;;  %v5112_v34 = vld [vmem:[%s7763_s0 + $0x14] ss:$8 sps:$4 sm:$0xff]   ;;  %v5114_v35 = vld [vmem:[%s7763_s0 + $0x10] ss:$8 sps:$4 sm:$0xff]  }
   0xd   :  { %v5115_v36 = vld [vmem:[%s7763_s0 + $0x24] ss:$8 sps:$4 sm:$0xff]   ;;  %v5117_v37 = vld [vmem:[%s7763_s0 + $0x20] ss:$8 sps:$4 sm:$0xff]   ;;  %v5118_v38 = vld [vmem:[%s7763_s0 + $0x34] ss:$8 sps:$4 sm:$0xff]  }
   0xe   :  { %v5120_v39 = vld [vmem:[%s7763_s0 + $0x30] ss:$8 sps:$4 sm:$0xff]   ;;  %v5121_v40 = vld [vmem:[%s7763_s0 + $0x44] ss:$8 sps:$4 sm:$0xff]   ;;  %v5123_v41 = vld [vmem:[%s7763_s0 + $0x40] ss:$8 sps:$4 sm:$0xff]  }
   0xf   :  { %613 = vmatpush1.bf16.msra.mxu0 %v5072_v7  ;;  %v5124_v42 = vld [vmem:[%s7763_s0 + $0x54] ss:$8 sps:$4 sm:$0xff]   ;;  %v5126_v43 = vld [vmem:[%s7763_s0 + $0x50] ss:$8 sps:$4 sm:$0xff]   ;;  %v5127_v44 = vld [vmem:[%s7763_s0 + $0x64] ss:$8 sps:$4 sm:$0xff]  }
  0x10   :  { %614 = vmatprep.subr.bf16.mxu0 %v5073_v8  ;;  %v5129_v45 = vld [vmem:[%s7763_s0 + $0x60] ss:$8 sps:$4 sm:$0xff]   ;;  %v5130_v46 = vld [vmem:[%s7763_s0 + $0x74] ss:$8 sps:$4 sm:$0xff]   ;;  %v5132_v47 = vld [vmem:[%s7763_s0 + $0x70] ss:$8 sps:$4 sm:$0xff]  }
  0x11   :  { %v5133_v48 = vld [vmem:[%s7763_s0 + $0x84] ss:$8 sps:$4 sm:$0xff]   ;;  %v5135_v49 = vld [vmem:[%s7763_s0 + $0x80] ss:$8 sps:$4 sm:$0xff]   ;;  %v5136_v50 = vld [vmem:[%s7763_s0 + $0x94] ss:$8 sps:$4 sm:$0xff]  }
  0x12   :  { %v5184_v51 = vld [vmem:[%s7764_s3 + $0x100] ss:$8 sps:$4 sm:$0xff]   ;;  %v5186_v52 = vld [vmem:[%s7764_s3 + $0x104] ss:$8 sps:$4 sm:$0xff]   ;;  %v5138_v54 = vld [vmem:[%s7763_s0 + $0x90] ss:$8 sps:$4 sm:$0xff]  }
  0x13   :  { %615 = vmatpush1.bf16.msra.mxu0 %v5075_v9  ;;  %v5187_v53 = vld [vmem:[%s7764_s3 + $0x204] ss:$8 sps:$4 sm:$0xff]   ;;  %v5191_v55 = vld [vmem:[%s7764_s3 + $0x114] ss:$8 sps:$4 sm:$0xff]   ;;  %v5192_v56 = vld [vmem:[%s7764_s3 + $0x200] ss:$8 sps:$4 sm:$0xff]  }
  0x14   :  { %616 = vmatprep.subr.bf16.mxu0 %v5076_v10  ;;  %v5139_v57 = vld [vmem:[%s7763_s0 + $0xa4] ss:$8 sps:$4 sm:$0xff]   ;;  %2332 = vmatprep.subr.bf16.mxu1 %v5187_v53  ;;  %v5189_v58 = vld [vmem:[%s7764_s3 + $0x110] ss:$8 sps:$4 sm:$0xff]   ;;  %v5196_v59 = vld [vmem:[%s7764_s3 + $0x214] ss:$8 sps:$4 sm:$0xff]  }
  0x15   :  { %2333 = vmatpush1.bf16.msra.mxu1 %v5192_v56  ;;  %v5200_v60 = vld [vmem:[%s7764_s3 + $0x124] ss:$8 sps:$4 sm:$0xff]   ;;  %v5201_v61 = vld [vmem:[%s7764_s3 + $0x210] ss:$8 sps:$4 sm:$0xff]   ;;  %v5198_v62 = vld [vmem:[%s7764_s3 + $0x120] ss:$8 sps:$4 sm:$0xff]  }
  0x16   :  { %v5202_v63 = vld [vmem:[%s7764_s3 + $0x224] ss:$8 sps:$4 sm:$0xff]   ;;  %v5141_v0 = vld [vmem:[%s7763_s0 + $0xa0] ss:$8 sps:$4 sm:$0xff]   ;;  %2334 = vmatprep.subr.bf16.mxu1 %v5196_v59  ;;  %v5206_v1 = vld [vmem:[%s7764_s3 + $0x134] ss:$8 sps:$4 sm:$0xff]  }
  0x17   :  { %617 = vmatpush1.bf16.msra.mxu0 %v5078_v11  ;;  %v5207_v2 = vld [vmem:[%s7764_s3 + $0x220] ss:$8 sps:$4 sm:$0xff]   ;;  %v5142_v3 = vld [vmem:[%s7763_s0 + $0xb4] ss:$8 sps:$4 sm:$0xff]   ;;  %v5204_v4 = vld [vmem:[%s7764_s3 + $0x130] ss:$8 sps:$4 sm:$0xff]  }
  0x18   :  { %618 = vmatprep.subr.bf16.mxu0 %v5079_v12  ;;  %v5211_v5 = vld [vmem:[%s7764_s3 + $0x234] ss:$8 sps:$4 sm:$0xff]   ;;  %v5213_v6 = vld [vmem:[%s7764_s3 + $0x140] ss:$8 sps:$4 sm:$0xff]   ;;  %v5215_v7 = vld [vmem:[%s7764_s3 + $0x144] ss:$8 sps:$4 sm:$0xff]  }
  0x19   :  { %2335 = vmatpush1.bf16.msra.mxu1 %v5201_v61  ;;  %v5216_v8 = vld [vmem:[%s7764_s3 + $0x230] ss:$8 sps:$4 sm:$0xff]   ;;  %v5217_v9 = vld [vmem:[%s7764_s3 + $0x244] ss:$8 sps:$4 sm:$0xff]   ;;  %v5221_v11 = vld [vmem:[%s7764_s3 + $0x154] ss:$8 sps:$4 sm:$0xff]  }
  0x1a   :  { %2336 = vmatprep.subr.bf16.mxu1 %v5202_v63  ;;  %v5144_v10 = vld [vmem:[%s7763_s0 + $0xb0] ss:$8 sps:$4 sm:$0xff]   ;;  %v5222_v12 = vld [vmem:[%s7764_s3 + $0x240] ss:$8 sps:$4 sm:$0xff]   ;;  %v5145_v13 = vld [vmem:[%s7763_s0 + $0xc4] ss:$8 sps:$4 sm:$0xff]  }
  0x1b   :  { %619 = vmatpush1.bf16.msra.mxu0 %v5081_v14  ;;  %v5219_v14 = vld [vmem:[%s7764_s3 + $0x150] ss:$8 sps:$4 sm:$0xff]   ;;  %v5282_v53 = vld [vmem:[%s7764_s3 + $0x2c0] ss:$8 sps:$4 sm:$0xff]   ;;  %v5290_v56 = vld [vmem:[%s7764_s3 + $0x1e4] ss:$8 sps:$4 sm:$0xff]  }
  0x1c   :  { %620 = vmatprep.subr.bf16.mxu0 %v5082_v15  ;;  %v5226_v15 = vld [vmem:[%s7764_s3 + $0x254] ss:$8 sps:$4 sm:$0xff]   ;;  %v5288_v59 = vld [vmem:[%s7764_s3 + $0x1e0] ss:$8 sps:$4 sm:$0xff]   ;;  %v5292_v61 = vld [vmem:[%s7764_s3 + $0x2e4] ss:$8 sps:$4 sm:$0xff]  }
  0x1d   :  { %2337 = vmatpush1.bf16.msra.mxu1 %v5207_v2  ;;  %v5297_v63 = vld [vmem:[%s7764_s3 + $0x2e0] ss:$8 sps:$4 sm:$0xff]   ;;  %v5300_v2 = vld [vmem:[%s7764_s3 + $0x2f0] ss:$8 sps:$4 sm:$0xff]  }
  0x1e   :  { %2338 = vmatprep.subr.bf16.mxu1 %v5211_v5  ;;  %v5165_v5 = vld [vmem:[%s7763_s0 + $0x120] ss:$8 sps:$4 sm:$0xff]  }
  0x1f   :  { %621 = vmatpush1.bf16.msra.mxu0 %v5084_v16  ;;  %v5230_v16 = vld [vmem:[%s7764_s3 + $0x164] ss:$8 sps:$4 sm:$0xff]  }
  0x20   :  { %622 = vmatprep.subr.bf16.mxu0 %v5085_v17  ;;  %v5231_v17 = vld [vmem:[%s7764_s3 + $0x250] ss:$8 sps:$4 sm:$0xff]  }
  0x21   :  { %2339 = vmatpush1.bf16.msra.mxu1 %v5216_v8  ;;  %v5169_v8 = vld [vmem:[%s7763_s0 + $0x144] ss:$8 sps:$4 sm:$0xff]  }
  0x22   :  { %2340 = vmatprep.subr.bf16.mxu1 %v5217_v9  ;;  %v5171_v9 = vld [vmem:[%s7763_s0 + $0x140] ss:$8 sps:$4 sm:$0xff]  }
  0x23   :  { %623 = vmatpush1.bf16.msra.mxu0 %v5087_v18  ;;  %v5228_v18 = vld [vmem:[%s7764_s3 + $0x160] ss:$8 sps:$4 sm:$0xff]  }
  0x24   :  { %624 = vmatprep.subr.bf16.mxu0 %v5088_v19  ;;  %v5232_v19 = vld [vmem:[%s7764_s3 + $0x264] ss:$8 sps:$4 sm:$0xff]  }
  0x25   :  { %2341 = vmatpush1.bf16.msra.mxu1 %v5222_v12  ;;  %v5175_v12 = vld [vmem:[%s7763_s0 + $0x164] ss:$8 sps:$4 sm:$0xff]  }
  0x26   :  { %2342 = vmatprep.subr.bf16.mxu1 %v5226_v15  ;;  %v5180_v15 = vld [vmem:[%s7763_s0 + $0x170] ss:$8 sps:$4 sm:$0xff]  }
  0x27   :  { %625 = vmatpush1.bf16.msra.mxu0 %v5090_v20  ;;  %v5147_v20 = vld [vmem:[%s7763_s0 + $0xc0] ss:$8 sps:$4 sm:$0xff]  }
  0x28   :  { %626 = vmatprep.subr.bf16.mxu0 %v5091_v21  ;;  %v5236_v21 = vld [vmem:[%s7764_s3 + $0x174] ss:$8 sps:$4 sm:$0xff]  }
  0x29   :  { %2343 = vmatpush1.bf16.msra.mxu1 %v5231_v17  ;;  %v5183_v17 = vld [vmem:[%s7763_s0 + $0x180] ss:$8 sps:$4 sm:$0xff]  }
  0x2a   :  { %2344 = vmatprep.subr.bf16.mxu1 %v5232_v19  ;;  %v5195_v19 = vld [vmem:[%s7763_s0 + $0x190] ss:$8 sps:$4 sm:$0xff]  }
  0x2b   :  { %627 = vmatpush1.bf16.msra.mxu0 %v5093_v22  ;;  %v5237_v22 = vld [vmem:[%s7764_s3 + $0x260] ss:$8 sps:$4 sm:$0xff]  }
  0x2c   :  { %628 = vmatprep.subr.bf16.mxu0 %v5094_v23  ;;  %v5148_v23 = vld [vmem:[%s7763_s0 + $0xd4] ss:$8 sps:$4 sm:$0xff]  }
  0x2d   :  { %2345 = vmatpush1.bf16.msra.mxu1 %v5237_v22  ;;  %v5223_v22 = vld [vmem:[%s7763_s0 + $0x1b4] ss:$8 sps:$4 sm:$0xff]  }
  0x2f   :  { %629 = vmatpush1.bf16.msra.mxu0 %v5096_v24  ;;  %v5234_v24 = vld [vmem:[%s7764_s3 + $0x170] ss:$8 sps:$4 sm:$0xff]  }
  0x30   :  { %630 = vmatprep.subr.bf16.mxu0 %v5097_v25  ;;  %v5241_v25 = vld [vmem:[%s7764_s3 + $0x274] ss:$8 sps:$4 sm:$0xff]  }
  0x31   :  { %2346 = vmatprep.subr.bf16.mxu1 %v5241_v25 }
  0x33   :  { %631 = vmatpush1.bf16.msra.mxu0 %v5099_v26  ;;  %v5245_v26 = vld [vmem:[%s7764_s3 + $0x184] ss:$8 sps:$4 sm:$0xff]  }
  0x34   :  { %632 = vmatprep.subr.bf16.mxu0 %v5100_v27  ;;  %v5246_v27 = vld [vmem:[%s7764_s3 + $0x270] ss:$8 sps:$4 sm:$0xff]  }
  0x35   :  { %2347 = vmatpush1.bf16.msra.mxu1 %v5246_v27 }
  0x37   :  { %633 = vmatpush1.bf16.msra.mxu0 %v5102_v28  ;;  %v5243_v28 = vld [vmem:[%s7764_s3 + $0x180] ss:$8 sps:$4 sm:$0xff]  }
  0x38   :  { %634 = vmatprep.subr.bf16.mxu0 %v5103_v29  ;;  %v5247_v29 = vld [vmem:[%s7764_s3 + $0x284] ss:$8 sps:$4 sm:$0xff]  }
  0x39   :  { %2348 = vmatprep.subr.bf16.mxu1 %v5247_v29  ;;  %v6122_v29 = vld [vmem:[%s7765_s2 + $0x18] sm:$0xff] }
  0x3b   :  { %635 = vmatpush1.bf16.msra.mxu0 %v5105_v30  ;;  %v5150_v30 = vld [vmem:[%s7763_s0 + $0xd0] ss:$8 sps:$4 sm:$0xff]  }
  0x3c   :  { %636 = vmatprep.subr.bf16.mxu0 %v5106_v31  ;;  %v5251_v31 = vld [vmem:[%s7764_s3 + $0x194] ss:$8 sps:$4 sm:$0xff]  }
  0x3f   :  { %637 = vmatpush1.bf16.msra.mxu0 %v5108_v32  ;;  %v5252_v32 = vld [vmem:[%s7764_s3 + $0x280] ss:$8 sps:$4 sm:$0xff]  }
  0x40   :  { %1825 = vmatprep.subr.bf16.mxu0 %v5186_v52  ;;  %2349 = vmatpush1.bf16.msra.mxu1 %v5252_v32  ;;  %v5281_v52 = vld [vmem:[%s7764_s3 + $0x1d4] ss:$8 sps:$4 sm:$0xff]  }
  0x42   :  { %639 = vmatmul.mubr.bf16.vlgmr.msra.gmra.mrb[0].mxu0 %v5109_v33  ;;  %v5151_v33 = vld [vmem:[%s7763_s0 + $0xe4] ss:$8 sps:$4 sm:$0xff]  }
  0x43   :  { %648 = vmatprep.mubr.bf16.mxu0 %v5112_v34  ;;  %1826 = vmatpush1.bf16.msra.mxu0 %v5184_v51  ;;  %v5249_v34 = vld [vmem:[%s7764_s3 + $0x190] ss:$8 sps:$4 sm:$0xff]   ;;  %v5277_v51 = vld [vmem:[%s7764_s3 + $0x2c4] ss:$8 sps:$4 sm:$0xff]  }
  0x44   :  { %1827 = vmatprep.subr.bf16.mxu0 %v5191_v55  ;;  %v5286_v55 = vld [vmem:[%s7764_s3 + $0x2d4] ss:$8 sps:$4 sm:$0xff]  }
  0x47   :  { %1828 = vmatpush1.bf16.msra.mxu0 %v5189_v58  ;;  %v5159_v58 = vld [vmem:[%s7763_s0 + $0x100] ss:$8 sps:$4 sm:$0xff]  }
  0x48   :  { %1829 = vmatprep.subr.bf16.mxu0 %v5200_v60  ;;  %v5160_v60 = vld [vmem:[%s7763_s0 + $0x114] ss:$8 sps:$4 sm:$0xff]  }
  0x4a   :  { %649 = vmatmul.mubr.bf16.gmra.mrb[4].mxu0 %v5114_v35  ;;  %v5256_v35 = vld [vmem:[%s7764_s3 + $0x294] ss:$8 sps:$4 sm:$0xff]  }
  0x4b   :  { %658 = vmatprep.mubr.bf16.mxu0 %v5115_v36  ;;  %1830 = vmatpush1.bf16.msra.mxu0 %v5198_v62  ;;  %v5260_v36 = vld [vmem:[%s7764_s3 + $0x1a4] ss:$8 sps:$4 sm:$0xff]   ;;  %v5296_v62 = vld [vmem:[%s7764_s3 + $0x1f4] ss:$8 sps:$4 sm:$0xff]  }
  0x4c   :  { %1831 = vmatprep.subr.bf16.mxu0 %v5206_v1  ;;  %2350 = vmatprep.subr.bf16.mxu1 %v5256_v35  ;;  %v5298_v1 = vld [vmem:[%s7764_s3 + $0x2f4] ss:$8 sps:$4 sm:$0xff]  }
  0x4f   :  { %1832 = vmatpush1.bf16.msra.mxu0 %v5204_v4  ;;  %v5163_v4 = vld [vmem:[%s7763_s0 + $0x124] ss:$8 sps:$4 sm:$0xff]  }
  0x50   :  { %1833 = vmatprep.subr.bf16.mxu0 %v5215_v7  ;;  %v5168_v7 = vld [vmem:[%s7763_s0 + $0x130] ss:$8 sps:$4 sm:$0xff]  }
  0x52   :  { %659 = vmatmul.mubr.bf16.gmra.mrb[8].mxu0 %v5117_v37  ;;  %v5261_v37 = vld [vmem:[%s7764_s3 + $0x290] ss:$8 sps:$4 sm:$0xff]  }
  0x53   :  { %668 = vmatprep.mubr.bf16.mxu0 %v5118_v38  ;;  %1834 = vmatpush1.bf16.msra.mxu0 %v5213_v6  ;;  %v5258_v38 = vld [vmem:[%s7764_s3 + $0x1a0] ss:$8 sps:$4 sm:$0xff]   ;;  %v5166_v6 = vld [vmem:[%s7763_s0 + $0x134] ss:$8 sps:$4 sm:$0xff]  }
  0x54   :  { %1835 = vmatprep.subr.bf16.mxu0 %v5221_v11  ;;  %2351 = vmatpush1.bf16.msra.mxu1 %v5261_v37  ;;  %v5174_v11 = vld [vmem:[%s7763_s0 + $0x150] ss:$8 sps:$4 sm:$0xff]  }
  0x57   :  { %1836 = vmatpush1.bf16.msra.mxu0 %v5219_v14  ;;  %v5178_v14 = vld [vmem:[%s7763_s0 + $0x174] ss:$8 sps:$4 sm:$0xff]  }
  0x58   :  { %1837 = vmatprep.subr.bf16.mxu0 %v5230_v16  ;;  %v5181_v16 = vld [vmem:[%s7763_s0 + $0x184] ss:$8 sps:$4 sm:$0xff]  }
  0x5a   :  { %669 = vmatmul.mubr.bf16.gmra.mrb[12].mxu0 %v5120_v39  ;;  %v5262_v39 = vld [vmem:[%s7764_s3 + $0x2a4] ss:$8 sps:$4 sm:$0xff]  }
  0x5b   :  { %678 = vmatprep.mubr.bf16.mxu0 %v5121_v40  ;;  %1838 = vmatpush1.bf16.msra.mxu0 %v5228_v18  ;;  %v5153_v40 = vld [vmem:[%s7763_s0 + $0xe0] ss:$8 sps:$4 sm:$0xff]   ;;  %v5193_v18 = vld [vmem:[%s7763_s0 + $0x194] ss:$8 sps:$4 sm:$0xff]  }
  0x5c   :  { %1839 = vmatprep.subr.bf16.mxu0 %v5236_v21  ;;  %2352 = vmatprep.subr.bf16.mxu1 %v5262_v39  ;;  %v5210_v21 = vld [vmem:[%s7763_s0 + $0x1a0] ss:$8 sps:$4 sm:$0xff]  }
  0x5f   :  { %1840 = vmatpush1.bf16.msra.mxu0 %v5234_v24  ;;  %v6111_v24 = vld [vmem:[%s7765_s2 + $0x8] sm:$0xff] }
  0x60   :  { %1841 = vmatprep.subr.bf16.mxu0 %v5245_v26  ;;  %v6116_v26 = vld [vmem:[%s7765_s2 + $0x10] sm:$0xff] }
  0x62   :  { %679 = vmatmul.mubr.bf16.gmra.mrb[16].mxu0 %v5123_v41  ;;  %v5266_v41 = vld [vmem:[%s7764_s3 + $0x1b4] ss:$8 sps:$4 sm:$0xff]  }
  0x63   :  { %688 = vmatprep.mubr.bf16.mxu0 %v5124_v42  ;;  %1842 = vmatpush1.bf16.msra.mxu0 %v5243_v28  ;;  %v5267_v42 = vld [vmem:[%s7764_s3 + $0x2a0] ss:$8 sps:$4 sm:$0xff]  }
  0x64   :  { %1843 = vmatprep.subr.bf16.mxu0 %v5251_v31  ;;  %2353 = vmatpush1.bf16.msra.mxu1 %v5267_v42 }
  0x67   :  { %1844 = vmatpush1.bf16.msra.mxu0 %v5249_v34 }
  0x68   :  { %1845 = vmatprep.subr.bf16.mxu0 %v5260_v36 }
  0x6a   :  { %689 = vmatmul.mubr.bf16.gmra.mrb[20].mxu0 %v5126_v43  ;;  %v5154_v43 = vld [vmem:[%s7763_s0 + $0xf4] ss:$8 sps:$4 sm:$0xff]  }
  0x6b   :  { %698 = vmatprep.mubr.bf16.mxu0 %v5127_v44  ;;  %1846 = vmatpush1.bf16.msra.mxu0 %v5258_v38  ;;  %v5264_v44 = vld [vmem:[%s7764_s3 + $0x1b0] ss:$8 sps:$4 sm:$0xff]  }
  0x6c   :  { %1847 = vmatprep.subr.bf16.mxu0 %v5266_v41 }
  0x6f   :  { %1848 = vmatpush1.bf16.msra.mxu0 %v5264_v44 }
  0x72   :  { %699 = vmatmul.mubr.bf16.gmra.mrb[24].mxu0 %v5129_v45  ;;  %v5271_v45 = vld [vmem:[%s7764_s3 + $0x2b4] ss:$8 sps:$4 sm:$0xff]  }
  0x73   :  { %708 = vmatprep.mubr.bf16.mxu0 %v5130_v46  ;;  %v5275_v46 = vld [vmem:[%s7764_s3 + $0x1c4] ss:$8 sps:$4 sm:$0xff]   ;;  %2354 = vmatprep.subr.bf16.mxu1 %v5271_v45 }
  0x74   :  { %1849 = vmatprep.subr.bf16.mxu0 %v5275_v46  ;;  %v6145_v45 = vld [vmem:[%s7765_s2 + $0x28] sm:$0xff] }
  0x7a   :  { %709 = vmatmul.mubr.bf16.gmra.mrb[28].mxu0 %v5132_v47  ;;  %v5276_v47 = vld [vmem:[%s7764_s3 + $0x2b0] ss:$8 sps:$4 sm:$0xff]  }
  0x7b   :  { %718 = vmatprep.mubr.bf16.mxu0 %v5133_v48  ;;  %v5273_v48 = vld [vmem:[%s7764_s3 + $0x1c0] ss:$8 sps:$4 sm:$0xff]   ;;  %2355 = vmatpush1.bf16.msra.mxu1 %v5276_v47 }
  0x7c   :  { %1850 = vmatpush1.bf16.msra.mxu0 %v5273_v48  ;;  %2356 = vmatprep.subr.bf16.mxu1 %v5277_v51 }
  0x7d   :  { %1851 = vmatprep.subr.bf16.mxu0 %v5281_v52 }
  0x7f   :  { %2357 = vmatpush1.bf16.msra.mxu1 %v5282_v53 }
  0x80   :  { %2358 = vmatprep.subr.bf16.mxu1 %v5286_v55  ;;  %v6158_v55 = vld [vmem:[%s7765_s2 + $0x38] sm:$0xff] }
  0x82   :  { %719 = vmatmul.mubr.bf16.gmra.mrb[32].mxu0 %v5135_v49  ;;  %v5156_v49 = vld [vmem:[%s7763_s0 + $0xf0] ss:$8 sps:$4 sm:$0xff]  }
  0x83   :  { %728 = vmatprep.mubr.bf16.mxu0 %v5136_v50  ;;  %v5157_v50 = vld [vmem:[%s7763_s0 + $0x104] ss:$8 sps:$4 sm:$0xff]  }
  0x8a   :  { %729 = vmatmul.mubr.bf16.gmra.mrb[36].mxu0 %v5138_v54  ;;  %v5279_v54 = vld [vmem:[%s7764_s3 + $0x1d0] ss:$8 sps:$4 sm:$0xff]  }
  0x8b   :  { %738 = vmatprep.mubr.bf16.mxu0 %v5139_v57  ;;  %1852 = vmatpush1.bf16.msra.mxu0 %v5279_v54  ;;  %v5291_v57 = vld [vmem:[%s7764_s3 + $0x2d0] ss:$8 sps:$4 sm:$0xff]  }
  0x8c   :  { %1853 = vmatprep.subr.bf16.mxu0 %v5290_v56  ;;  %2359 = vmatpush1.bf16.msra.mxu1 %v5291_v57  ;;  %v5240_v56 = vld [vmem:[%s7763_s0 + $0x1c0] ss:$8 sps:$4 sm:$0xff]  }
  0x8d   :  { %2360 = vmatprep.subr.bf16.mxu1 %v5292_v61 }
  0x8f   :  { %1854 = vmatpush1.bf16.msra.mxu0 %v5288_v59 }
  0x90   :  { %1855 = vmatprep.subr.bf16.mxu0 %v5296_v62  ;;  %2361 = vmatpush1.bf16.msra.mxu1 %v5297_v63 }
  0x91   :  { %2362 = vmatprep.subr.bf16.mxu1 %v5298_v1 }
  0x92   :  { %739 = vmatmul.mubr.bf16.gmra.mrb[40].mxu0 %v5141_v0  ;;  %v5294_v0 = vld [vmem:[%s7764_s3 + $0x1f0] ss:$8 sps:$4 sm:$0xff]  }
  0x93   :  { %748 = vmatprep.mubr.bf16.mxu0 %v5142_v3  ;;  %1856 = vmatpush1.bf16.msra.mxu0 %v5294_v0  ;;  %v5162_v3 = vld [vmem:[%s7763_s0 + $0x110] ss:$8 sps:$4 sm:$0xff]  }
  0x94   :  { %2363 = vmatpush1.bf16.msra.mxu1 %v5300_v2 }
  0x9a   :  { %749 = vmatmul.mubr.bf16.gmra.mrb[44].mxu0 %v5144_v10  ;;  %v5172_v10 = vld [vmem:[%s7763_s0 + $0x154] ss:$8 sps:$4 sm:$0xff]  }
  0x9b   :  { %758 = vmatprep.mubr.bf16.mxu0 %v5145_v13  ;;  %v5177_v13 = vld [vmem:[%s7763_s0 + $0x160] ss:$8 sps:$4 sm:$0xff]  }
  0xa2   :  { %759 = vmatmul.mubr.bf16.gmra.mrb[48].mxu0 %v5147_v20  ;;  %v5208_v20 = vld [vmem:[%s7763_s0 + $0x1a4] ss:$8 sps:$4 sm:$0xff]  }
  0xa3   :  { %768 = vmatprep.mubr.bf16.mxu0 %v5148_v23  ;;  %v6106_v23 = vld [vmem:[%s7765_s2] sm:$0xff] }
  0xaa   :  { %769 = vmatmul.mubr.bf16.gmra.mrb[52].mxu0 %v5150_v30  ;;  %v5225_v30 = vld [vmem:[%s7763_s0 + $0x1b0] ss:$8 sps:$4 sm:$0xff]  }
  0xab   :  { %778 = vmatprep.mubr.bf16.mxu0 %v5151_v33  ;;  %v5238_v33 = vld [vmem:[%s7763_s0 + $0x1c4] ss:$8 sps:$4 sm:$0xff]  }
  0xb2   :  { %779 = vmatmul.mubr.bf16.gmra.mrb[56].mxu0 %v5153_v40 }
  0xb3   :  { %788 = vmatprep.mubr.bf16.mxu0 %v5154_v43  ;;  %v6140_v43 = vld [vmem:[%s7765_s2 + $0x20] sm:$0xff] }
  0xba   :  { %789 = vmatmul.mubr.bf16.gmra.mrb[60].mxu0 %v5156_v49 }
  0xbb   :  { %798 = vmatprep.mubr.bf16.mxu0 %v5157_v50  ;;  %v6151_v50 = vld [vmem:[%s7765_s2 + $0x30] sm:$0xff] }
  0xc2   :  { %799 = vmatmul.mubr.bf16.gmra.mrb[64].mxu0 %v5159_v58 }
  0xc3   :  { %808 = vmatprep.mubr.bf16.mxu0 %v5160_v60  ;;  %v5253_v60 = vld [vmem:[%s7763_s0 + $0x1d4] ss:$8 sps:$4 sm:$0xff]  }
  0xca   :  { %809 = vmatmul.mubr.bf16.gmra.mrb[68].mxu0 %v5162_v3 }
  0xcb   :  { %818 = vmatprep.mubr.bf16.mxu0 %v5163_v4 }
  0xd2   :  { %819 = vmatmul.mubr.bf16.gmra.mrb[72].mxu0 %v5165_v5 }
  0xd3   :  { %828 = vmatprep.mubr.bf16.mxu0 %v5166_v6  ;;  %v6180_v6 = vld [vmem:[%s7765_s2 + $0x40] sm:$0xff] }
  0xda   :  { %829 = vmatmul.mubr.bf16.gmra.mrb[76].mxu0 %v5168_v7 }
  0xdb   :  { %838 = vmatprep.mubr.bf16.mxu0 %v5169_v8 }
  0xe2   :  { %839 = vmatmul.mubr.bf16.gmra.mrb[80].mxu0 %v5171_v9  ;;  %v6187_v9 = vld [vmem:[%s7765_s2 + $0x48] sm:$0xff] }
  0xe3   :  { %848 = vmatprep.mubr.bf16.mxu0 %v5172_v10 }
  0xea   :  { %849 = vmatmul.mubr.bf16.gmra.mrb[84].mxu0 %v5174_v11 }
  0xeb   :  { %858 = vmatprep.mubr.bf16.mxu0 %v5175_v12 }
  0xf2   :  { %859 = vmatmul.mubr.bf16.gmra.mrb[88].mxu0 %v5177_v13  ;;  %v6192_v13 = vld [vmem:[%s7765_s2 + $0x50] sm:$0xff] }
  0xf3   :  { %868 = vmatprep.mubr.bf16.mxu0 %v5178_v14 }
  0xfa   :  { %869 = vmatmul.mubr.bf16.gmra.mrb[92].mxu0 %v5180_v15 }
  0xfb   :  { %878 = vmatprep.mubr.bf16.mxu0 %v5181_v16 }
 0x102   :  { %879 = vmatmul.mubr.bf16.gmra.mrb[96].mxu0 %v5183_v17 }
 0x103   :  { %888 = vmatprep.mubr.bf16.mxu0 %v5193_v18  ;;  %v6199_v18 = vld [vmem:[%s7765_s2 + $0x58] sm:$0xff] }
 0x10a   :  { %889 = vmatmul.mubr.bf16.gmra.mrb[100].mxu0 %v5195_v19  ;;  %v5255_v19 = vld [vmem:[%s7763_s0 + $0x1d0] ss:$8 sps:$4 sm:$0xff]  }
 0x10b   :  { %898 = vmatprep.mubr.bf16.mxu0 %v5208_v20 }
 0x112   :  { %899 = vmatmul.mubr.bf16.gmra.mrb[104].mxu0 %v5210_v21 }
 0x113   :  { %908 = vmatprep.mubr.bf16.mxu0 %v5223_v22 }
 0x115   :  { %v640_v25 = vpop.f32.mrb[0].mxu0 }
 0x116   :  { %v975_v27 = vadd.f32 %v6106_v23, %v640_v25  ;;  %v642_v28 = vpop.f32.mrb[1].mxu0  ;;  %v5268_v25 = vld [vmem:[%s7763_s0 + $0x1e4] ss:$8 sps:$4 sm:$0xff]  }
 0x117   :  { %v976_v31 = vadd.f32 %v6111_v24, %v642_v28  ;;  %v644_v32 = vpop.f32.mrb[2].mxu0 }
 0x118   :  { %vm1103_vm0 = vcmp.gt.f32.partialorder %v975_v27, 0.0  ;;  %v1231_v34 = vmul.f32 0.2, %v975_v27  ;;  %v977_v35 = vadd.f32 %v6116_v26, %v644_v32  ;;  %v646_v36 = vpop.f32.mrb[3].mxu0 }
 0x119   :  { %vm1104_vm1 = vcmp.gt.f32.partialorder %v976_v31, 0.0  ;;  %v1232_v37 = vmul.f32 0.2, %v976_v31  ;;  %v978_v38 = vadd.f32 %v6122_v29, %v646_v36 }
 0x11a   :  { %v6133_v39 = vsel %vm1103_vm0, %v975_v27, %v1231_v34  ;;  %vm1105_vm2 = vcmp.gt.f32.partialorder %v977_v35, 0.0  ;;  %v1233_v40 = vmul.f32 0.2, %v977_v35  ;;  %909 = vmatmul.mubr.bf16.gmra.mrb[108].mxu0 %v5225_v30 }
 0x11b   :  { %v6135_v41 = vsel %vm1104_vm1, %v976_v31, %v1232_v37  ;;  %vm1106_vm3 = vcmp.gt.f32.partialorder %v978_v38, 0.0  ;;  %v1234_v42 = vmul.f32 0.2, %v978_v38  ;;  %918 = vmatprep.mubr.bf16.mxu0 %v5238_v33  ;;  %v1560_v46 = vrot.slane %v6133_v39, 1 }
 0x11c   :  { %v1361_v44 = vsel %vm1105_vm2, %v977_v35, %v1233_v40  ;;  %v1563_v51 = vrot.slane %v6135_v41, 1 }
 0x11d   :  { %v1561_v47 = vrot.slane %v1361_v44, 1  ;;  %v1362_v48 = vsel %vm1106_vm3, %v978_v38, %v1234_v42  ;;  %v650_v49 = vpop.f32.mrb[4].mxu0  ;;  %v6222_v38 = vld [vmem:[%s7765_s2 + $0x60] sm:$0xff]  ;;  %v6229_v44 = vld [vmem:[%s7765_s2 + $0x68] sm:$0xff] }
 0x11e   :  { %v1564_v52 = vrot.slane %v1362_v48, 1  ;;  %v979_v53 = vadd.f32 %v6140_v43, %v650_v49  ;;  %v652_v54 = vpop.f32.mrb[5].mxu0 }
 0x11f   :  { %v6164_v57 = vsel %vm1559_vm4, %v1560_v46, %v1561_v47  ;;  %v980_v58 = vadd.f32 %v6145_v45, %v652_v54  ;;  %v654_v59 = vpop.f32.mrb[6].mxu0 }
 0x120   :  { %vm1107_vm5 = vcmp.gt.f32.partialorder %v979_v53, 0.0  ;;  %v1235_v61 = vmul.f32 0.2, %v979_v53  ;;  %v981_v62 = vadd.f32 %v6151_v50, %v654_v59  ;;  %v656_v63 = vpop.f32.mrb[7].mxu0  ;;  %v6172_v0 = vsel %vm1559_vm4, %v1563_v51, %v1564_v52  ;;  %v6235_v51 = vld [vmem:[%s7765_s2 + $0x70] sm:$0xff] }
 0x121   :  { %v1236_v1 = vmul.f32 0.2, %v980_v58  ;;  %v982_v2 = vadd.f32 %v6158_v55, %v656_v63  ;;  %vm1108_vm6 = vcmp.gt.f32.partialorder %v980_v58, 0.0  ;;  %v5283_v63 = vld [vmem:[%s7763_s0 + $0x1f4] ss:$8 sps:$4 sm:$0xff]  }
 0x122   :  { %vm1109_vm7 = vcmp.gt.f32.partialorder %v981_v62, 0.0  ;;  %v1237_v3 = vmul.f32 0.2, %v981_v62  ;;  %919 = vmatmul.mubr.bf16.gmra.mrb[112].mxu0 %v5240_v56  ;;  %v6175_v4 = vsel %vm1107_vm5, %v979_v53, %v1235_v61  ;;  %v6241_v56 = vld [vmem:[%s7765_s2 + $0x78] sm:$0xff] }
 0x123   :  { %vm1110_vm8 = vcmp.gt.f32.partialorder %v982_v2, 0.0  ;;  %v1238_v5 = vmul.f32 0.2, %v982_v2  ;;  %928 = vmatprep.mubr.bf16.mxu0 %v5253_v60  ;;  %v6182_v7 = vsel %vm1108_vm6, %v980_v58, %v1236_v1  ;;  %v2453_v14 = vrot.slane %v6175_v4, 1  ;;  %v5270_v58 = vld [vmem:[%s7763_s0 + $0x1e0] ss:$8 sps:$4 sm:$0xff]  }
 0x124   :  { %v1365_v8 = vsel %vm1109_vm7, %v981_v62, %v1237_v3  ;;  %v2456_v20 = vrot.slane %v6182_v7, 1 }
 0x125   :  { %v2454_v10 = vrot.slane %v1365_v8, 1  ;;  %v1366_v11 = vsel %vm1110_vm8, %v982_v2, %v1238_v5  ;;  %v660_v12 = vpop.f32.mrb[8].mxu0 }
 0x126   :  { %v2457_v15 = vrot.slane %v1366_v11, 1  ;;  %v983_v16 = vadd.f32 %v6180_v6, %v660_v12  ;;  %v662_v17 = vpop.f32.mrb[9].mxu0 }
 0x127   :  { %v984_v21 = vadd.f32 %v6187_v9, %v662_v17  ;;  %v664_v22 = vpop.f32.mrb[10].mxu0  ;;  %v6210_v27 = vsel %vm1559_vm4, %v2453_v14, %v2454_v10 }
 0x128   :  { %vm1111_vm9 = vcmp.gt.f32.partialorder %v983_v16, 0.0  ;;  %v1239_v28 = vmul.f32 0.2, %v983_v16  ;;  %v985_v30 = vadd.f32 %v6192_v13, %v664_v22  ;;  %v666_v31 = vpop.f32.mrb[11].mxu0  ;;  %v6214_v32 = vsel %vm1559_vm4, %v2456_v20, %v2457_v15 }
 0x129   :  { %vm1112_vm10 = vcmp.gt.f32.partialorder %v984_v21, 0.0  ;;  %v1240_v33 = vmul.f32 0.2, %v984_v21  ;;  %v986_v34 = vadd.f32 %v6199_v18, %v666_v31 }
 0x12a   :  { %v6217_v35 = vsel %vm1111_vm9, %v983_v16, %v1239_v28  ;;  %vm1113_vm11 = vcmp.gt.f32.partialorder %v985_v30, 0.0  ;;  %v1241_v36 = vmul.f32 0.2, %v985_v30  ;;  %929 = vmatmul.mubr.bf16.gmra.mrb[116].mxu0 %v5255_v19 }
 0x12b   :  { %7827 = vst [vmem:[#allocation3_spill] sm:$0xff] %v6217_v35  ;;  %vm1114_vm12 = vcmp.gt.f32.partialorder %v986_v34, 0.0  ;;  %v1242_v37 = vmul.f32 0.2, %v986_v34  ;;  %938 = vmatprep.mubr.bf16.mxu0 %v5268_v25  ;;  %v6224_v40 = vsel %vm1112_vm10, %v984_v21, %v1240_v33  ;;  %v3129_v46 = vrot.slane %v6217_v35, 1 }
 0x12c   :  { %7828 = vst [vmem:[#allocation4_spill] sm:$0xff] %v6224_v40  ;;  %v1369_v42 = vsel %vm1113_vm11, %v985_v30, %v1241_v36  ;;  %v3132_v59 = vrot.slane %v6224_v40, 1  ;;  %v5285_v30 = vld [vmem:[%s7763_s0 + $0x1f0] ss:$8 sps:$4 sm:$0xff]  }
 0x12d   :  { %v3130_v47 = vrot.slane %v1369_v42, 1  ;;  %v1370_v48 = vsel %vm1114_vm12, %v986_v34, %v1242_v37  ;;  %v670_v49 = vpop.f32.mrb[12].mxu0 }
 0x12e   :  { %v3133_v52 = vrot.slane %v1370_v48, 1  ;;  %v987_v53 = vadd.f32 %v6222_v38, %v670_v49  ;;  %v672_v54 = vpop.f32.mrb[13].mxu0 }
 0x12f   :  { %v6248_v60 = vsel %vm1559_vm4, %v3129_v46, %v3130_v47  ;;  %v988_v61 = vadd.f32 %v6229_v44, %v672_v54  ;;  %v674_v62 = vpop.f32.mrb[14].mxu0 }
 0x130   :  { %7829 = vst [vmem:[#allocation5_spill] sm:$0xff] %v6248_v60  ;;  %vm1115_vm13 = vcmp.gt.f32.partialorder %v987_v53, 0.0  ;;  %v1243_v1 = vmul.f32 0.2, %v987_v53  ;;  %v989_v2 = vadd.f32 %v6235_v51, %v674_v62  ;;  %v676_v3 = vpop.f32.mrb[15].mxu0  ;;  %v6256_v5 = vsel %vm1559_vm4, %v3132_v59, %v3133_v52 }
 0x131   :  { %7830 = vst [vmem:[#allocation6_spill] sm:$0xff] %v6256_v5  ;;  %vm1116_vm14 = vcmp.gt.f32.partialorder %v988_v61, 0.0  ;;  %v1244_v8 = vmul.f32 0.2, %v988_v61  ;;  %v990_v10 = vadd.f32 %v6241_v56, %v676_v3 }
 0x132   :  { %v6259_v11 = vsel %vm1115_vm13, %v987_v53, %v1243_v1  ;;  %vm1117_vm15 = vcmp.gt.f32.partialorder %v989_v2, 0.0  ;;  %v1245_v12 = vmul.f32 0.2, %v989_v2  ;;  %939 = vmatmul.mubr.bf16.gmra.mrb[120].mxu0 %v5270_v58 }
 0x133   :  { %7831 = vst [vmem:[#allocation7_spill] sm:$0xff] %v6259_v11  ;;  %vm1118_vm0 = vcmp.gt.f32.partialorder %v990_v10, 0.0  ;;  %v1246_v14 = vmul.f32 0.2, %v990_v10  ;;  %948 = vmatprep.mubr.bf16.mxu0 %v5283_v63  ;;  %v6261_v15 = vsel %vm1116_vm14, %v988_v61, %v1244_v8  ;;  %v3805_v17 = vrot.slane %v6259_v11, 1 }
 0x134   :  { %7832 = vst [vmem:[#allocation8_spill] sm:$0xff] %v6261_v15  ;;  %v1373_v16 = vsel %vm1117_vm15, %v989_v2, %v1245_v12  ;;  %v3808_v31 = vrot.slane %v6261_v15, 1 }
 0x135   :  { %v3806_v19 = vrot.slane %v1373_v16, 1  ;;  %v1374_v20 = vsel %vm1118_vm0, %v990_v10, %v1246_v14  ;;  %v680_v21 = vpop.f32.mrb[16].mxu0 }
 0x136   :  { %v3809_v22 = vrot.slane %v1374_v20, 1  ;;  %v991_v25 = vadd.f32 %v6106_v23, %v680_v21  ;;  %v682_v28 = vpop.f32.mrb[17].mxu0 }
 0x137   :  { %v6270_v33 = vsel %vm1559_vm4, %v3805_v17, %v3806_v19  ;;  %v992_v34 = vadd.f32 %v6111_v24, %v682_v28  ;;  %v684_v36 = vpop.f32.mrb[18].mxu0 }
 0x138   :  { %7833 = vst [vmem:[#allocation9_spill] sm:$0xff] %v6270_v33  ;;  %vm1119_vm1 = vcmp.gt.f32.partialorder %v991_v25, 0.0  ;;  %v1247_v37 = vmul.f32 0.2, %v991_v25  ;;  %v993_v42 = vadd.f32 %v6116_v26, %v684_v36  ;;  %v686_v46 = vpop.f32.mrb[19].mxu0  ;;  %v6275_v47 = vsel %vm1559_vm4, %v3808_v31, %v3809_v22 }
 0x139   :  { %7834 = vst [vmem:[#allocation10_spill] sm:$0xff] %v6275_v47  ;;  %vm1120_vm2 = vcmp.gt.f32.partialorder %v992_v34, 0.0  ;;  %v1248_v48 = vmul.f32 0.2, %v992_v34  ;;  %v994_v49 = vadd.f32 %v6122_v29, %v686_v46 }
 0x13a   :  { %v6278_v52 = vsel %vm1119_vm1, %v991_v25, %v1247_v37  ;;  %vm1121_vm3 = vcmp.gt.f32.partialorder %v993_v42, 0.0  ;;  %v1249_v53 = vmul.f32 0.2, %v993_v42  ;;  %949 = vmatmul.mubr.bf16.gmra.mrb[124].mxu0 %v5285_v30 }
 0x13b   :  { %v6282_v58 = vsel %vm1120_vm2, %v992_v34, %v1248_v48  ;;  %vm1122_vm5 = vcmp.gt.f32.partialorder %v994_v49, 0.0  ;;  %v1250_v61 = vmul.f32 0.2, %v994_v49  ;;  %v1566_v63 = vrot.slane %v6278_v52, 1 }
 0x13c   :  { %v1377_v59 = vsel %vm1121_vm3, %v993_v42, %v1249_v53  ;;  %v1569_v12 = vrot.slane %v6282_v58, 1 }
 0x13d   :  { %v1567_v1 = vrot.slane %v1377_v59, 1  ;;  %v690_v2 = vpop.f32.mrb[20].mxu0  ;;  %v1378_v3 = vsel %vm1122_vm5, %v994_v49, %v1250_v61 }
 0x13e   :  { %v995_v8 = vadd.f32 %v6140_v43, %v690_v2  ;;  %v692_v10 = vpop.f32.mrb[21].mxu0  ;;  %v1570_v16 = vrot.slane %v1378_v3, 1 }
 0x13f   :  { %v1568_v14 = vsel %vm1559_vm4, %v1566_v63, %v1567_v1  ;;  %v996_v17 = vadd.f32 %v6145_v45, %v692_v10  ;;  %v694_v19 = vpop.f32.mrb[22].mxu0 }
 0x140   :  { %v1624_v20 = vpack.c.bf16 %v1568_v14, %v6164_v57  ;;  %vm1123_vm6 = vcmp.gt.f32.partialorder %v995_v8, 0.0  ;;  %v1251_v21 = vmul.f32 0.2, %v995_v8  ;;  %v997_v22 = vadd.f32 %v6151_v50, %v694_v19  ;;  %v696_v25 = vpop.f32.mrb[23].mxu0 }
 0x141   :  { %v1252_v28 = vmul.f32 0.2, %v996_v17  ;;  %v998_v30 = vadd.f32 %v6158_v55, %v696_v25  ;;  %v1571_v31 = vsel %vm1559_vm4, %v1569_v12, %v1570_v16  ;;  %vm1124_vm7 = vcmp.gt.f32.partialorder %v996_v17, 0.0 }
 0x142   :  { %vm1125_vm8 = vcmp.gt.f32.partialorder %v997_v22, 0.0  ;;  %v1253_v34 = vmul.f32 0.2, %v997_v22  ;;  %v1625_v36 = vpack.c.bf16 %v1571_v31, %v6172_v0  ;;  %v1379_v37 = vsel %vm1123_vm6, %v995_v8, %v1251_v21 }
 0x143   :  { %vm1126_vm9 = vcmp.gt.f32.partialorder %v998_v30, 0.0  ;;  %v1254_v42 = vmul.f32 0.2, %v998_v30  ;;  %v1380_v46 = vsel %vm1124_vm7, %v996_v17, %v1252_v28  ;;  %v2131_v57 = vpack.c.bf16 %v1379_v37, %v6175_v4 }
 0x144   :  { %v1381_v48 = vsel %vm1125_vm8, %v997_v22, %v1253_v34  ;;  %1857 = vmatprep.mubr.bf16.mxu0 %v1625_v36  ;;  %v2132_v49 = vpack.c.bf16 %v1380_v46, %v6182_v7  ;;  %v2459_v63 = vrot.slane %v1379_v37, 1  ;;  %v2462_v8 = vrot.slane %v1380_v46, 1  ;;  %v5303_v34 = vld [vmem:[%s7764_s3 + $0x4] ss:$8 sps:$4 sm:$0xff]  }
 0x145   :  { %v2460_v53 = vrot.slane %v1381_v48, 1  ;;  %v1382_v59 = vsel %vm1126_vm9, %v998_v30, %v1254_v42  ;;  %1858 = vmatmul.mubr.bf16.vlgmr.msra.gmra.mrb[128].mxu0 %v1624_v20  ;;  %v700_v61 = vpop.f32.mrb[24].mxu0  ;;  %v5301_v48 = vld [vmem:[%s7764_s3] ss:$8 sps:$4 sm:$0xff]   ;;  %2058 = vmatprep.subr.bf16.mxu0 %v5303_v34 }
 0x146   :  { %v2463_v1 = vrot.slane %v1382_v59, 1  ;;  %v999_v2 = vadd.f32 %v6180_v6, %v700_v61  ;;  %v702_v3 = vpop.f32.mrb[25].mxu0  ;;  %2364 = vmatprep.mubr.bf16.mxu1 %v2132_v49  ;;  %2059 = vmatpush1.bf16.msra.mxu0 %v5301_v48 }
 0x147   :  { %v1000_v0 = vadd.f32 %v6187_v9, %v702_v3  ;;  %v704_v10 = vpop.f32.mrb[26].mxu0  ;;  %2365 = vmatmul.mubr.bf16.vlgmr.msra.gmra.mrb[0].mxu1 %v2131_v57  ;;  %v6301_v4 = vsel %vm1559_vm4, %v2459_v63, %v2460_v53  ;;  %v5306_v63 = vld [vmem:[%s7764_s3 + $0x304] ss:$8 sps:$4 sm:$0xff]  }
 0x148   :  { %vm1127_vm10 = vcmp.gt.f32.partialorder %v999_v2, 0.0  ;;  %v1255_v7 = vmul.f32 0.2, %v999_v2  ;;  %v1001_v12 = vadd.f32 %v6192_v13, %v704_v10  ;;  %v706_v16 = vpop.f32.mrb[27].mxu0  ;;  %v6308_v20 = vsel %vm1559_vm4, %v2462_v8, %v2463_v1  ;;  %2718 = vmatprep.subr.bf16.mxu1 %v5306_v63 }
 0x149   :  { %vm1128_vm11 = vcmp.gt.f32.partialorder %v1000_v0, 0.0  ;;  %v1256_v17 = vmul.f32 0.2, %v1000_v0  ;;  %v1002_v19 = vadd.f32 %v6199_v18, %v706_v16 }
 0x14a   :  { %v6310_v21 = vsel %vm1127_vm10, %v999_v2, %v1255_v7  ;;  %vm1129_vm12 = vcmp.gt.f32.partialorder %v1001_v12, 0.0  ;;  %v1257_v22 = vmul.f32 0.2, %v1001_v12 }
 0x14b   :  { %7835 = vst [vmem:[#allocation11_spill] sm:$0xff] %v6310_v21  ;;  %vm1130_vm13 = vcmp.gt.f32.partialorder %v1002_v19, 0.0  ;;  %v1258_v30 = vmul.f32 0.2, %v1002_v19  ;;  %v6319_v36 = vsel %vm1128_vm11, %v1000_v0, %v1256_v17  ;;  %v3135_v37 = vrot.slane %v6310_v21, 1 }
 0x14c   :  { %v1385_v31 = vsel %vm1129_vm12, %v1001_v12, %v1257_v22  ;;  %7836 = vst [vmem:[#allocation12_spill] sm:$0xff] %v6319_v36  ;;  %v5304_v0 = vld [vmem:[%s7764_s3 + $0x300] ss:$8 sps:$4 sm:$0xff]   ;;  %v3138_v8 = vrot.slane %v6319_v36, 1  ;;  %v5309_v17 = vld [vmem:[%s7764_s3 + $0x14] ss:$8 sps:$4 sm:$0xff]  }
 0x14d   :  { %v3136_v42 = vrot.slane %v1385_v31, 1  ;;  %v1386_v46 = vsel %vm1130_vm13, %v1002_v19, %v1258_v30  ;;  %v710_v57 = vpop.f32.mrb[28].mxu0  ;;  %2719 = vmatpush1.bf16.msra.mxu1 %v5304_v0  ;;  %v5307_v30 = vld [vmem:[%s7764_s3 + $0x10] ss:$8 sps:$4 sm:$0xff]   ;;  %2060 = vmatprep.subr.bf16.mxu0 %v5309_v17 }
 0x14e   :  { %v3139_v53 = vrot.slane %v1386_v46, 1  ;;  %v1003_v59 = vadd.f32 %v6222_v38, %v710_v57  ;;  %v712_v61 = vpop.f32.mrb[29].mxu0  ;;  %2061 = vmatpush1.bf16.msra.mxu0 %v5307_v30 }
 0x14f   :  { %v6332_v1 = vsel %vm1559_vm4, %v3135_v37, %v3136_v42  ;;  %v1004_v2 = vadd.f32 %v6229_v44, %v712_v61  ;;  %v714_v3 = vpop.f32.mrb[30].mxu0  ;;  %v5312_v42 = vld [vmem:[%s7764_s3 + $0x314] ss:$8 sps:$4 sm:$0xff]   ;;  %v5315_v61 = vld [vmem:[%s7764_s3 + $0x24] ss:$8 sps:$4 sm:$0xff]  }
 0x150   :  { %7837 = vst [vmem:[#allocation13_spill] sm:$0xff] %v6332_v1  ;;  %vm1131_vm14 = vcmp.gt.f32.partialorder %v1003_v59, 0.0  ;;  %v1259_v7 = vmul.f32 0.2, %v1003_v59  ;;  %v1005_v12 = vadd.f32 %v6235_v51, %v714_v3  ;;  %v716_v16 = vpop.f32.mrb[31].mxu0  ;;  %v6350_v31 = vsel %vm1559_vm4, %v3138_v8, %v3139_v53  ;;  %2720 = vmatprep.subr.bf16.mxu1 %v5312_v42  ;;  %2062 = vmatprep.subr.bf16.mxu0 %v5315_v61  ;;  %v6807_v1 = vld [vmem:[%s7765_s2 + $0x60] sm:$0xff] }
 0x151   :  { %vm1132_vm15 = vcmp.gt.f32.partialorder %v1004_v2, 0.0  ;;  %v1260_v19 = vmul.f32 0.2, %v1004_v2  ;;  %v1006_v22 = vadd.f32 %v6241_v56, %v716_v16  ;;  %7838 = vst [vmem:[#allocation14_spill] sm:$0xff] %v6350_v31  ;;  %v5310_v53 = vld [vmem:[%s7764_s3 + $0x310] ss:$8 sps:$4 sm:$0xff]  }
 0x152   :  { %v6352_v34 = vsel %vm1131_vm14, %v1003_v59, %v1259_v7  ;;  %vm1133_vm0 = vcmp.gt.f32.partialorder %v1005_v12, 0.0  ;;  %v1261_v37 = vmul.f32 0.2, %v1005_v12  ;;  %2721 = vmatpush1.bf16.msra.mxu1 %v5310_v53  ;;  %v5313_v16 = vld [vmem:[%s7764_s3 + $0x20] ss:$8 sps:$4 sm:$0xff]  }
 0x153   :  { %7839 = vst [vmem:[#allocation15_spill] sm:$0xff] %v6352_v34  ;;  %vm1134_vm1 = vcmp.gt.f32.partialorder %v1006_v22, 0.0  ;;  %v1262_v48 = vmul.f32 0.2, %v1006_v22  ;;  %v6368_v63 = vsel %vm1132_vm15, %v1004_v2, %v1260_v19  ;;  %v3811_v3 = vrot.slane %v6352_v34, 1  ;;  %2063 = vmatpush1.bf16.msra.mxu0 %v5313_v16 }
 0x154   :  { %v1389_v59 = vsel %vm1133_vm0, %v1005_v12, %v1261_v37  ;;  %7840 = vst [vmem:[#allocation16_spill] sm:$0xff] %v6368_v63  ;;  %v5318_v2 = vld [vmem:[%s7764_s3 + $0x324] ss:$8 sps:$4 sm:$0xff]   ;;  %v3814_v53 = vrot.slane %v6368_v63, 1 }
 0x155   :  { %v3812_v0 = vrot.slane %v1389_v59, 1  ;;  %v1390_v8 = vsel %vm1134_vm1, %v1006_v22, %v1262_v48  ;;  %v720_v7 = vpop.f32.mrb[32].mxu0  ;;  %v5316_v48 = vld [vmem:[%s7764_s3 + $0x320] ss:$8 sps:$4 sm:$0xff]   ;;  %2722 = vmatprep.subr.bf16.mxu1 %v5318_v2 }
 0x156   :  { %v3815_v17 = vrot.slane %v1390_v8, 1  ;;  %v1007_v30 = vadd.f32 %v6106_v23, %v720_v7  ;;  %v722_v37 = vpop.f32.mrb[33].mxu0  ;;  %2723 = vmatpush1.bf16.msra.mxu1 %v5316_v48 }
 0x157   :  { %v6381_v19 = vsel %vm1559_vm4, %v3811_v3, %v3812_v0  ;;  %v1008_v22 = vadd.f32 %v6111_v24, %v722_v37  ;;  %v724_v42 = vpop.f32.mrb[34].mxu0  ;;  %v5321_v3 = vld [vmem:[%s7764_s3 + $0x34] ss:$8 sps:$4 sm:$0xff]   ;;  %v5319_v37 = vld [vmem:[%s7764_s3 + $0x30] ss:$8 sps:$4 sm:$0xff]  }
 0x158   :  { %7841 = vst [vmem:[#allocation17_spill] sm:$0xff] %v6381_v19  ;;  %vm1135_vm2 = vcmp.gt.f32.partialorder %v1007_v30, 0.0  ;;  %v1263_v61 = vmul.f32 0.2, %v1007_v30  ;;  %v1009_v8 = vadd.f32 %v6116_v26, %v724_v42  ;;  %v726_v7 = vpop.f32.mrb[35].mxu0  ;;  %v6399_v59 = vsel %vm1559_vm4, %v3814_v53, %v3815_v17  ;;  %2064 = vmatprep.subr.bf16.mxu0 %v5321_v3 }
 0x159   :  { %vm1136_vm3 = vcmp.gt.f32.partialorder %v1008_v22, 0.0  ;;  %v1264_v0 = vmul.f32 0.2, %v1008_v22  ;;  %v1010_v16 = vadd.f32 %v6122_v29, %v726_v7  ;;  %7842 = vst [vmem:[#allocation18_spill] sm:$0xff] %v6399_v59  ;;  %v5324_v42 = vld [vmem:[%s7764_s3 + $0x334] ss:$8 sps:$4 sm:$0xff]   ;;  %2065 = vmatpush1.bf16.msra.mxu0 %v5319_v37 }
 0x15a   :  { %v6401_v57 = vsel %vm1135_vm2, %v1007_v30, %v1263_v61  ;;  %vm1137_vm5 = vcmp.gt.f32.partialorder %v1009_v8, 0.0  ;;  %v1265_v2 = vmul.f32 0.2, %v1009_v8  ;;  %v5322_v17 = vld [vmem:[%s7764_s3 + $0x330] ss:$8 sps:$4 sm:$0xff]   ;;  %2724 = vmatprep.subr.bf16.mxu1 %v5324_v42 }
 0x15b   :  { %7843 = vst [vmem:[#allocation19_spill] sm:$0xff] %v6401_v57  ;;  %v6408_v48 = vsel %vm1136_vm3, %v1008_v22, %v1264_v0  ;;  %vm1138_vm6 = vcmp.gt.f32.partialorder %v1010_v16, 0.0  ;;  %v1266_v12 = vmul.f32 0.2, %v1010_v16  ;;  %v5327_v53 = vld [vmem:[%s7764_s3 + $0x44] ss:$8 sps:$4 sm:$0xff]   ;;  %2725 = vmatpush1.bf16.msra.mxu1 %v5322_v17 }
 0x15c   :  { %v1393_v30 = vsel %vm1137_vm5, %v1009_v8, %v1265_v2  ;;  %v1572_v61 = vrot.slane %v6401_v57, 1  ;;  %v5325_v22 = vld [vmem:[%s7764_s3 + $0x40] ss:$8 sps:$4 sm:$0xff]   ;;  %v1575_v0 = vrot.slane %v6408_v48, 1  ;;  %2066 = vmatprep.subr.bf16.mxu0 %v5327_v53  ;;  %v5330_v42 = vld [vmem:[%s7764_s3 + $0x344] ss:$8 sps:$4 sm:$0xff]  }
 0x15d   :  { %v1573_v3 = vrot.slane %v1393_v30, 1  ;;  %v1394_v10 = vsel %vm1138_vm6, %v1010_v16, %v1266_v12  ;;  %v730_v7 = vpop.f32.mrb[36].mxu0  ;;  %2067 = vmatpush1.bf16.msra.mxu0 %v5325_v22  ;;  %v5328_v17 = vld [vmem:[%s7764_s3 + $0x340] ss:$8 sps:$4 sm:$0xff]   ;;  %2726 = vmatprep.subr.bf16.mxu1 %v5330_v42  ;;  %v5331_v22 = vld [vmem:[%s7764_s3 + $0x50] ss:$8 sps:$4 sm:$0xff]  }
 0x15e   :  { %v1576_v37 = vrot.slane %v1394_v10, 1  ;;  %v1011_v8 = vadd.f32 %v6140_v43, %v730_v7  ;;  %v732_v2 = vpop.f32.mrb[37].mxu0 }
 0x15f   :  { %v1012_v30 = vadd.f32 %v6145_v45, %v732_v2  ;;  %v734_v12 = vpop.f32.mrb[38].mxu0  ;;  %v6427_v16 = vsel %vm1559_vm4, %v1572_v61, %v1573_v3  ;;  %v5333_v2 = vld [vmem:[%s7764_s3 + $0x54] ss:$8 sps:$4 sm:$0xff]   ;;  %2727 = vmatpush1.bf16.msra.mxu1 %v5328_v17  ;;  %v5334_v17 = vld [vmem:[%s7764_s3 + $0x350] ss:$8 sps:$4 sm:$0xff]  }
 0x160   :  { %vm1139_vm7 = vcmp.gt.f32.partialorder %v1011_v8, 0.0  ;;  %v1267_v10 = vmul.f32 0.2, %v1011_v8  ;;  %v1013_v7 = vadd.f32 %v6151_v50, %v734_v12  ;;  %v736_v53 = vpop.f32.mrb[39].mxu0  ;;  %v6434_v46 = vsel %vm1559_vm4, %v1575_v0, %v1576_v37  ;;  %2068 = vmatprep.subr.bf16.mxu0 %v5333_v2  ;;  %v5336_v0 = vld [vmem:[%s7764_s3 + $0x354] ss:$8 sps:$4 sm:$0xff]  }
 0x161   :  { %vm1140_vm8 = vcmp.gt.f32.partialorder %v1012_v30, 0.0  ;;  %v1268_v61 = vmul.f32 0.2, %v1012_v30  ;;  %v1014_v3 = vadd.f32 %v6158_v55, %v736_v53  ;;  %2069 = vmatpush1.bf16.msra.mxu0 %v5331_v22  ;;  %2728 = vmatprep.subr.bf16.mxu1 %v5336_v0 }
 0x162   :  { %vm1141_vm9 = vcmp.gt.f32.partialorder %v1013_v7, 0.0  ;;  %v1269_v12 = vmul.f32 0.2, %v1013_v7  ;;  %v6443_v28 = vsel %vm1139_vm7, %v1011_v8, %v1267_v10  ;;  %v5339_v8 = vld [vmem:[%s7764_s3 + $0x64] ss:$8 sps:$4 sm:$0xff]  }
 0x163   :  { %vm1142_vm10 = vcmp.gt.f32.partialorder %v1014_v3, 0.0  ;;  %v1270_v37 = vmul.f32 0.2, %v1014_v3  ;;  %v6448_v42 = vsel %vm1140_vm8, %v1012_v30, %v1268_v61  ;;  %v2465_v14 = vrot.slane %v6443_v28, 1  ;;  %2729 = vmatpush1.bf16.msra.mxu1 %v5334_v17  ;;  %v5337_v30 = vld [vmem:[%s7764_s3 + $0x60] ss:$8 sps:$4 sm:$0xff]   ;;  %2070 = vmatprep.subr.bf16.mxu0 %v5339_v8 }
 0x164   :  { %v1397_v53 = vsel %vm1141_vm9, %v1013_v7, %v1269_v12  ;;  %v2468_v7 = vrot.slane %v6448_v42, 1  ;;  %v5342_v12 = vld [vmem:[%s7764_s3 + $0x364] ss:$8 sps:$4 sm:$0xff]  }
 0x165   :  { %v2466_v10 = vrot.slane %v1397_v53, 1  ;;  %v1398_v2 = vsel %vm1142_vm10, %v1014_v3, %v1270_v37  ;;  %v740_v49 = vpop.f32.mrb[40].mxu0  ;;  %2071 = vmatpush1.bf16.msra.mxu0 %v5337_v30  ;;  %v5340_v37 = vld [vmem:[%s7764_s3 + $0x360] ss:$8 sps:$4 sm:$0xff]   ;;  %2730 = vmatprep.subr.bf16.mxu1 %v5342_v12  ;;  %v5348_v12 = vld [vmem:[%s7764_s3 + $0x374] ss:$8 sps:$4 sm:$0xff]  }
 0x166   :  { %v2469_v61 = vrot.slane %v1398_v2, 1  ;;  %v1015_v22 = vadd.f32 %v6180_v6, %v740_v49  ;;  %v742_v54 = vpop.f32.mrb[41].mxu0  ;;  %v5345_v2 = vld [vmem:[%s7764_s3 + $0x74] ss:$8 sps:$4 sm:$0xff]  }
 0x167   :  { %v1016_v3 = vadd.f32 %v6187_v9, %v742_v54  ;;  %v744_v0 = vpop.f32.mrb[42].mxu0  ;;  %v6470_v17 = vsel %vm1559_vm4, %v2465_v14, %v2466_v10  ;;  %2731 = vmatpush1.bf16.msra.mxu1 %v5340_v37  ;;  %v5343_v14 = vld [vmem:[%s7764_s3 + $0x70] ss:$8 sps:$4 sm:$0xff]   ;;  %2072 = vmatprep.subr.bf16.mxu0 %v5345_v2  ;;  %v5351_v2 = vld [vmem:[%s7764_s3 + $0x84] ss:$8 sps:$4 sm:$0xff]  }
 0x168   :  { %7844 = vst [vmem:[#allocation20_spill] sm:$0xff] %v6470_v17  ;;  %vm1143_vm11 = vcmp.gt.f32.partialorder %v1015_v22, 0.0  ;;  %v1271_v49 = vmul.f32 0.2, %v1015_v22  ;;  %v1017_v53 = vadd.f32 %v6192_v13, %v744_v0  ;;  %v746_v8 = vpop.f32.mrb[43].mxu0  ;;  %v6477_v54 = vsel %vm1559_vm4, %v2468_v7, %v2469_v61  ;;  %2732 = vmatprep.subr.bf16.mxu1 %v5348_v12 }
 0x169   :  { %vm1144_vm12 = vcmp.gt.f32.partialorder %v1016_v3, 0.0  ;;  %v1272_v30 = vmul.f32 0.2, %v1016_v3  ;;  %v1018_v25 = vadd.f32 %v6199_v18, %v746_v8  ;;  %2073 = vmatpush1.bf16.msra.mxu0 %v5343_v14  ;;  %v5346_v7 = vld [vmem:[%s7764_s3 + $0x370] ss:$8 sps:$4 sm:$0xff]  }
 0x16a   :  { %vm1145_vm13 = vcmp.gt.f32.partialorder %v1017_v53, 0.0  ;;  %v1273_v10 = vmul.f32 0.2, %v1017_v53  ;;  %v6487_v0 = vsel %vm1143_vm11, %v1015_v22, %v1271_v49  ;;  %v5349_v22 = vld [vmem:[%s7764_s3 + $0x80] ss:$8 sps:$4 sm:$0xff]   ;;  %2074 = vmatprep.subr.bf16.mxu0 %v5351_v2 }
 0x16b   :  { %7845 = vst [vmem:[#allocation21_spill] sm:$0xff] %v6487_v0  ;;  %vm1146_vm14 = vcmp.gt.f32.partialorder %v1018_v25, 0.0  ;;  %v1274_v61 = vmul.f32 0.2, %v1018_v25  ;;  %v6492_v37 = vsel %vm1144_vm12, %v1016_v3, %v1272_v30  ;;  %2733 = vmatpush1.bf16.msra.mxu1 %v5346_v7  ;;  %v3141_v49 = vrot.slane %v6487_v0, 1 }
 0x16c   :  { %7846 = vst [vmem:[#allocation22_spill] sm:$0xff] %v6492_v37  ;;  %v1401_v8 = vsel %vm1145_vm13, %v1017_v53, %v1273_v10  ;;  %v5354_v53 = vld [vmem:[%s7764_s3 + $0x384] ss:$8 sps:$4 sm:$0xff]   ;;  %v3144_v10 = vrot.slane %v6492_v37, 1  ;;  %v5357_v2 = vld [vmem:[%s7764_s3 + $0x94] ss:$8 sps:$4 sm:$0xff]  }
 0x16d   :  { %v3142_v62 = vrot.slane %v1401_v8, 1  ;;  %v1402_v33 = vsel %vm1146_vm14, %v1018_v25, %v1274_v61  ;;  %v750_v19 = vpop.f32.mrb[44].mxu0  ;;  %2075 = vmatpush1.bf16.msra.mxu0 %v5349_v22  ;;  %v5352_v61 = vld [vmem:[%s7764_s3 + $0x380] ss:$8 sps:$4 sm:$0xff]   ;;  %2734 = vmatprep.subr.bf16.mxu1 %v5354_v53  ;;  %v5360_v53 = vld [vmem:[%s7764_s3 + $0x394] ss:$8 sps:$4 sm:$0xff]  }
 0x16e   :  { %v3145_v14 = vrot.slane %v1402_v33, 1  ;;  %v1019_v3 = vadd.f32 %v6222_v38, %v750_v19  ;;  %v752_v30 = vpop.f32.mrb[45].mxu0  ;;  %2076 = vmatprep.subr.bf16.mxu0 %v5357_v2  ;;  %v5363_v2 = vld [vmem:[%s7764_s3 + $0xa4] ss:$8 sps:$4 sm:$0xff]  }
 0x16f   :  { %v1020_v25 = vadd.f32 %v6229_v44, %v752_v30  ;;  %v754_v12 = vpop.f32.mrb[46].mxu0  ;;  %v6511_v33 = vsel %vm1559_vm4, %v3141_v49, %v3142_v62  ;;  %2735 = vmatpush1.bf16.msra.mxu1 %v5352_v61  ;;  %v5355_v62 = vld [vmem:[%s7764_s3 + $0x90] ss:$8 sps:$4 sm:$0xff]  }
 0x170   :  { %7847 = vst [vmem:[#allocation23_spill] sm:$0xff] %v6511_v33  ;;  %vm1147_vm15 = vcmp.gt.f32.partialorder %v1019_v3, 0.0  ;;  %v1275_v19 = vmul.f32 0.2, %v1019_v3  ;;  %v1021_v7 = vadd.f32 %v6235_v51, %v754_v12  ;;  %v756_v8 = vpop.f32.mrb[47].mxu0  ;;  %v6518_v30 = vsel %vm1559_vm4, %v3144_v10, %v3145_v14  ;;  %2736 = vmatprep.subr.bf16.mxu1 %v5360_v53 }
 0x171   :  { %7848 = vst [vmem:[#allocation24_spill] sm:$0xff] %v6518_v30  ;;  %vm1148_vm0 = vcmp.gt.f32.partialorder %v1020_v25, 0.0  ;;  %v1276_v22 = vmul.f32 0.2, %v1020_v25  ;;  %v1022_v47 = vadd.f32 %v6241_v56, %v756_v8  ;;  %2077 = vmatpush1.bf16.msra.mxu0 %v5355_v62  ;;  %v5358_v10 = vld [vmem:[%s7764_s3 + $0x390] ss:$8 sps:$4 sm:$0xff]  }
 0x172   :  { %vm1149_vm1 = vcmp.gt.f32.partialorder %v1021_v7, 0.0  ;;  %v1277_v49 = vmul.f32 0.2, %v1021_v7  ;;  %v6528_v12 = vsel %vm1147_vm15, %v1019_v3, %v1275_v19  ;;  %v5361_v3 = vld [vmem:[%s7764_s3 + $0xa0] ss:$8 sps:$4 sm:$0xff]   ;;  %2078 = vmatprep.subr.bf16.mxu0 %v5363_v2 }
 0x173   :  { %7849 = vst [vmem:[#allocation25_spill] sm:$0xff] %v6528_v12  ;;  %vm1150_vm2 = vcmp.gt.f32.partialorder %v1022_v47, 0.0  ;;  %v1278_v14 = vmul.f32 0.2, %v1022_v47  ;;  %v6533_v61 = vsel %vm1148_vm0, %v1020_v25, %v1276_v22  ;;  %2737 = vmatpush1.bf16.msra.mxu1 %v5358_v10  ;;  %v3817_v19 = vrot.slane %v6528_v12, 1 }
 0x174   :  { %7850 = vst [vmem:[#allocation26_spill] sm:$0xff] %v6533_v61  ;;  %v1405_v8 = vsel %vm1149_vm1, %v1021_v7, %v1277_v49  ;;  %v5366_v7 = vld [vmem:[%s7764_s3 + $0x3a4] ss:$8 sps:$4 sm:$0xff]   ;;  %v3820_v49 = vrot.slane %v6533_v61, 1 }
 0x175   :  { %v3818_v59 = vrot.slane %v1405_v8, 1  ;;  %v1406_v11 = vsel %vm1150_vm2, %v1022_v47, %v1278_v14  ;;  %v760_v34 = vpop.f32.mrb[48].mxu0  ;;  %2079 = vmatpush1.bf16.msra.mxu0 %v5361_v3  ;;  %v5364_v14 = vld [vmem:[%s7764_s3 + $0x3a0] ss:$8 sps:$4 sm:$0xff]   ;;  %2738 = vmatprep.subr.bf16.mxu1 %v5366_v7  ;;  %v5369_v8 = vld [vmem:[%s7764_s3 + $0xb4] ss:$8 sps:$4 sm:$0xff]  }
 0x176   :  { %v3821_v62 = vrot.slane %v1406_v11, 1  ;;  %v1023_v25 = vadd.f32 %v6106_v23, %v760_v34  ;;  %v762_v22 = vpop.f32.mrb[49].mxu0  ;;  %2080 = vmatprep.subr.bf16.mxu0 %v5369_v8 }
 0x177   :  { %v1024_v47 = vadd.f32 %v6111_v24, %v762_v22  ;;  %v764_v53 = vpop.f32.mrb[50].mxu0  ;;  %v6552_v11 = vsel %vm1559_vm4, %v3817_v19, %v3818_v59  ;;  %2739 = vmatpush1.bf16.msra.mxu1 %v5364_v14  ;;  %v5367_v59 = vld [vmem:[%s7764_s3 + $0xb0] ss:$8 sps:$4 sm:$0xff]   ;;  %v5372_v22 = vld [vmem:[%s7764_s3 + $0x3b4] ss:$8 sps:$4 sm:$0xff]  }
 0x178   :  { %7851 = vst [vmem:[#allocation27_spill] sm:$0xff] %v6552_v11  ;;  %vm1151_vm3 = vcmp.gt.f32.partialorder %v1023_v25, 0.0  ;;  %v1279_v23 = vmul.f32 0.2, %v1023_v25  ;;  %v1025_v34 = vadd.f32 %v6116_v26, %v764_v53  ;;  %v766_v10 = vpop.f32.mrb[51].mxu0  ;;  %v6559_v24 = vsel %vm1559_vm4, %v3820_v49, %v3821_v62  ;;  %2740 = vmatprep.subr.bf16.mxu1 %v5372_v22 }
 0x179   :  { %7852 = vst [vmem:[#allocation28_spill] sm:$0xff] %v6559_v24  ;;  %vm1152_vm5 = vcmp.gt.f32.partialorder %v1024_v47, 0.0  ;;  %v1280_v2 = vmul.f32 0.2, %v1024_v47  ;;  %v1026_v3 = vadd.f32 %v6122_v29, %v766_v10  ;;  %2081 = vmatpush1.bf16.msra.mxu0 %v5367_v59  ;;  %v5370_v29 = vld [vmem:[%s7764_s3 + $0x3b0] ss:$8 sps:$4 sm:$0xff]  }
 0x17a   :  { %v6565_v19 = vsel %vm1151_vm3, %v1023_v25, %v1279_v23  ;;  %vm1153_vm6 = vcmp.gt.f32.partialorder %v1025_v34, 0.0  ;;  %v1281_v26 = vmul.f32 0.2, %v1025_v34  ;;  %v5375_v25 = vld [vmem:[%s7764_s3 + $0xc4] ss:$8 sps:$4 sm:$0xff]  }
 0x17b   :  { %7853 = vst [vmem:[#allocation29_spill] sm:$0xff] %v6565_v19  ;;  %v6570_v62 = vsel %vm1152_vm5, %v1024_v47, %v1280_v2  ;;  %vm1154_vm7 = vcmp.gt.f32.partialorder %v1026_v3, 0.0  ;;  %v1282_v7 = vmul.f32 0.2, %v1026_v3  ;;  %v1578_v14 = vrot.slane %v6565_v19, 1  ;;  %2741 = vmatpush1.bf16.msra.mxu1 %v5370_v29  ;;  %2082 = vmatprep.subr.bf16.mxu0 %v5375_v25 }
 0x17c   :  { %v1409_v49 = vsel %vm1153_vm6, %v1025_v34, %v1281_v26  ;;  %v5373_v34 = vld [vmem:[%s7764_s3 + $0xc0] ss:$8 sps:$4 sm:$0xff]   ;;  %v1581_v2 = vrot.slane %v6570_v62, 1  ;;  %v5378_v47 = vld [vmem:[%s7764_s3 + $0x3c4] ss:$8 sps:$4 sm:$0xff]  }
 0x17d   :  { %v1579_v23 = vrot.slane %v1409_v49, 1  ;;  %v1410_v10 = vsel %vm1154_vm7, %v1026_v3, %v1282_v7  ;;  %v770_v8 = vpop.f32.mrb[52].mxu0  ;;  %2083 = vmatpush1.bf16.msra.mxu0 %v5373_v34  ;;  %v5376_v29 = vld [vmem:[%s7764_s3 + $0x3c0] ss:$8 sps:$4 sm:$0xff]   ;;  %2742 = vmatprep.subr.bf16.mxu1 %v5378_v47  ;;  %v5379_v34 = vld [vmem:[%s7764_s3 + $0xd0] ss:$8 sps:$4 sm:$0xff]  }
 0x17e   :  { %v1582_v59 = vrot.slane %v1410_v10, 1  ;;  %v1027_v26 = vadd.f32 %v6140_v43, %v770_v8  ;;  %v772_v22 = vpop.f32.mrb[53].mxu0 }
 0x17f   :  { %v1028_v49 = vadd.f32 %v6145_v45, %v772_v22  ;;  %v774_v3 = vpop.f32.mrb[54].mxu0  ;;  %v1580_v7 = vsel %vm1559_vm4, %v1578_v14, %v1579_v23  ;;  %v5381_v45 = vld [vmem:[%s7764_s3 + $0xd4] ss:$8 sps:$4 sm:$0xff]   ;;  %2743 = vmatpush1.bf16.msra.mxu1 %v5376_v29  ;;  %v5382_v29 = vld [vmem:[%s7764_s3 + $0x3d0] ss:$8 sps:$4 sm:$0xff]  }
 0x180   :  { %vm1155_vm8 = vcmp.gt.f32.partialorder %v1027_v26, 0.0  ;;  %v1283_v10 = vmul.f32 0.2, %v1027_v26  ;;  %v1029_v43 = vadd.f32 %v6151_v50, %v774_v3  ;;  %v776_v8 = vpop.f32.mrb[55].mxu0  ;;  %v1583_v25 = vsel %vm1559_vm4, %v1581_v2, %v1582_v59  ;;  %2084 = vmatprep.subr.bf16.mxu0 %v5381_v45  ;;  %v5384_v59 = vld [vmem:[%s7764_s3 + $0x3d4] ss:$8 sps:$4 sm:$0xff]  }
 0x181   :  { %vm1156_vm9 = vcmp.gt.f32.partialorder %v1028_v49, 0.0  ;;  %v1284_v22 = vmul.f32 0.2, %v1028_v49  ;;  %v1030_v14 = vadd.f32 %v6158_v55, %v776_v8  ;;  %v1627_v23 = vpack.c.bf16 %v1583_v25, %v6434_v46  ;;  %2085 = vmatpush1.bf16.msra.mxu0 %v5379_v34  ;;  %2744 = vmatprep.subr.bf16.mxu1 %v5384_v59 }
 0x182   :  { %vm1157_vm10 = vcmp.gt.f32.partialorder %v1029_v43, 0.0  ;;  %v1285_v50 = vmul.f32 0.2, %v1029_v43  ;;  %v1626_v2 = vpack.c.bf16 %v1580_v7, %v6427_v16  ;;  %v1411_v47 = vsel %vm1155_vm8, %v1027_v26, %v1283_v10  ;;  %v5387_v26 = vld [vmem:[%s7764_s3 + $0xe4] ss:$8 sps:$4 sm:$0xff]  }
 0x183   :  { %vm1158_vm11 = vcmp.gt.f32.partialorder %v1030_v14, 0.0  ;;  %v1286_v55 = vmul.f32 0.2, %v1030_v14  ;;  %1867 = vmatprep.mubr.bf16.mxu0 %v1627_v23  ;;  %v1412_v46 = vsel %vm1156_vm9, %v1028_v49, %v1284_v22  ;;  %v2133_v3 = vpack.c.bf16 %v1411_v47, %v6443_v28  ;;  %2745 = vmatpush1.bf16.msra.mxu1 %v5382_v29  ;;  %v5385_v28 = vld [vmem:[%s7764_s3 + $0xe0] ss:$8 sps:$4 sm:$0xff]  }
 0x184   :  { %v1413_v8 = vsel %vm1157_vm10, %v1029_v43, %v1285_v50  ;;  %1868 = vmatmul.mubr.bf16.gmra.mrb[132].mxu0 %v1626_v2  ;;  %v2134_v16 = vpack.c.bf16 %v1412_v46, %v6448_v42  ;;  %v2471_v49 = vrot.slane %v1411_v47, 1  ;;  %v2474_v42 = vrot.slane %v1412_v46, 1  ;;  %2086 = vmatprep.subr.bf16.mxu0 %v5387_v26  ;;  %v5390_v23 = vld [vmem:[%s7764_s3 + $0x3e4] ss:$8 sps:$4 sm:$0xff]   ;;  %v5388_v50 = vld [vmem:[%s7764_s3 + $0x3e0] ss:$8 sps:$4 sm:$0xff]  }
 0x185   :  { %v2472_v7 = vrot.slane %v1413_v8, 1  ;;  %v1414_v10 = vsel %vm1158_vm11, %v1030_v14, %v1286_v55  ;;  %v780_v25 = vpop.f32.mrb[56].mxu0  ;;  %2087 = vmatpush1.bf16.msra.mxu0 %v5385_v28  ;;  %2746 = vmatprep.subr.bf16.mxu1 %v5390_v23  ;;  %v5391_v29 = vld [vmem:[%s7764_s3 + $0xf0] ss:$8 sps:$4 sm:$0xff]  }
 0x186   :  { %v2475_v45 = vrot.slane %v1414_v10, 1  ;;  %v1031_v43 = vadd.f32 %v6180_v6, %v780_v25  ;;  %v782_v22 = vpop.f32.mrb[57].mxu0  ;;  %2374 = vmatprep.mubr.bf16.mxu1 %v2134_v16  ;;  %v5396_v16 = vld [vmem:[%s7764_s3 + $0x3f4] ss:$8 sps:$4 sm:$0xff]   ;;  %v5394_v10 = vld [vmem:[%s7764_s3 + $0x3f0] ss:$8 sps:$4 sm:$0xff]  }
 0x187   :  { %v1032_v14 = vadd.f32 %v6187_v9, %v782_v22  ;;  %v784_v34 = vpop.f32.mrb[58].mxu0  ;;  %2375 = vmatmul.mubr.bf16.gmra.mrb[4].mxu1 %v2133_v3  ;;  %v6631_v2 = vsel %vm1559_vm4, %v2471_v49, %v2472_v7  ;;  %v5393_v9 = vld [vmem:[%s7764_s3 + $0xf4] ss:$8 sps:$4 sm:$0xff]  }
 0x188   :  { %7854 = vst [vmem:[#allocation30_spill] sm:$0xff] %v6631_v2  ;;  %vm1159_vm12 = vcmp.gt.f32.partialorder %v1031_v43, 0.0  ;;  %v1287_v6 = vmul.f32 0.2, %v1031_v43  ;;  %v1033_v47 = vadd.f32 %v6192_v13, %v784_v34  ;;  %v786_v59 = vpop.f32.mrb[59].mxu0  ;;  %v6638_v55 = vsel %vm1559_vm4, %v2474_v42, %v2475_v45  ;;  %2747 = vmatpush1.bf16.msra.mxu1 %v5388_v50  ;;  %2088 = vmatprep.subr.bf16.mxu0 %v5393_v9 }
 0x189   :  { %vm1160_vm13 = vcmp.gt.f32.partialorder %v1032_v14, 0.0  ;;  %v1288_v46 = vmul.f32 0.2, %v1032_v14  ;;  %v1034_v3 = vadd.f32 %v6199_v18, %v786_v59  ;;  %2089 = vmatpush1.bf16.msra.mxu0 %v5391_v29  ;;  %2748 = vmatprep.subr.bf16.mxu1 %v5396_v16 }
 0x18a   :  { %vm1161_vm14 = vcmp.gt.f32.partialorder %v1033_v47, 0.0  ;;  %v1289_v8 = vmul.f32 0.2, %v1033_v47  ;;  %v6652_v18 = vsel %vm1159_vm12, %v1031_v43, %v1287_v6 }
 0x18b   :  { %7855 = vst [vmem:[#allocation31_spill] sm:$0xff] %v6652_v18  ;;  %vm1162_vm15 = vcmp.gt.f32.partialorder %v1034_v3, 0.0  ;;  %v1290_v7 = vmul.f32 0.2, %v1034_v3  ;;  %v6658_v25 = vsel %vm1160_vm13, %v1032_v14, %v1288_v46  ;;  %v3147_v23 = vrot.slane %v6652_v18, 1 }
 0x18c   :  { %7856 = vst [vmem:[#allocation32_spill] sm:$0xff] %v6658_v25  ;;  %v1417_v28 = vsel %vm1161_vm14, %v1033_v47, %v1289_v8  ;;  %2749 = vmatpush1.bf16.msra.mxu1 %v5394_v10  ;;  %v5399_v14 = vld [vmem:[%s7764_s3 + $0x404] ss:$8 sps:$4 sm:$0xff]   ;;  %v3150_v47 = vrot.slane %v6658_v25, 1 }
 0x18d   :  { %v3148_v43 = vrot.slane %v1417_v28, 1  ;;  %v1418_v22 = vsel %vm1162_vm15, %v1034_v3, %v1290_v7  ;;  %v790_v42 = vpop.f32.mrb[60].mxu0  ;;  %3008 = vmatprep.subr.bf16.mxu1 %v5399_v14 }
 0x18e   :  { %v3151_v34 = vrot.slane %v1418_v22, 1  ;;  %v1035_v50 = vadd.f32 %v6222_v38, %v790_v42  ;;  %v792_v6 = vpop.f32.mrb[61].mxu0 }
 0x18f   :  { %v1036_v59 = vadd.f32 %v6229_v44, %v792_v6  ;;  %v794_v9 = vpop.f32.mrb[62].mxu0  ;;  %v6672_v46 = vsel %vm1559_vm4, %v3147_v23, %v3148_v43 }
 0x190   :  { %7857 = vst [vmem:[#allocation33_spill] sm:$0xff] %v6672_v46  ;;  %vm1163_vm0 = vcmp.gt.f32.partialorder %v1035_v50, 0.0  ;;  %v1291_v3 = vmul.f32 0.2, %v1035_v50  ;;  %v1037_v29 = vadd.f32 %v6235_v51, %v794_v9  ;;  %v796_v8 = vpop.f32.mrb[63].mxu0  ;;  %v6676_v38 = vsel %vm1559_vm4, %v3150_v47, %v3151_v34 }
 0x191   :  { %7858 = vst [vmem:[#allocation34_spill] sm:$0xff] %v6676_v38  ;;  %vm1164_vm1 = vcmp.gt.f32.partialorder %v1036_v59, 0.0  ;;  %v1292_v16 = vmul.f32 0.2, %v1036_v59  ;;  %v1038_v7 = vadd.f32 %v6241_v56, %v796_v8 }
 0x192   :  { %vm1165_vm2 = vcmp.gt.f32.partialorder %v1037_v29, 0.0  ;;  %v1293_v10 = vmul.f32 0.2, %v1037_v29  ;;  %v6683_v43 = vsel %vm1163_vm0, %v1035_v50, %v1291_v3  ;;  %v6695_v50 = vld [vmem:[%s7765_s2] sm:$0xff] }
 0x193   :  { %7859 = vst [vmem:[#allocation35_spill] sm:$0xff] %v6683_v43  ;;  %vm1166_vm3 = vcmp.gt.f32.partialorder %v1038_v7, 0.0  ;;  %v1294_v51 = vmul.f32 0.2, %v1038_v7  ;;  %v6685_v22 = vsel %vm1164_vm1, %v1036_v59, %v1292_v16  ;;  %v3823_v47 = vrot.slane %v6683_v43, 1 }
 0x194   :  { %7860 = vst [vmem:[#allocation36_spill] sm:$0xff] %v6685_v22  ;;  %v1421_v23 = vsel %vm1165_vm2, %v1037_v29, %v1293_v10  ;;  %v3826_v8 = vrot.slane %v6685_v22, 1  ;;  %v6702_v29 = vld [vmem:[%s7765_s2 + $0x8] sm:$0xff]  ;;  %v6771_v22 = vld [vmem:[%s7765_s2 + $0x40] sm:$0xff] }
 0x195   :  { %v3824_v34 = vrot.slane %v1421_v23, 1  ;;  %v1422_v6 = vsel %vm1166_vm3, %v1038_v7, %v1294_v51  ;;  %v800_v14 = vpop.f32.mrb[64].mxu0  ;;  %v6711_v23 = vld [vmem:[%s7765_s2 + $0x10] sm:$0xff] }
 0x196   :  { %v3827_v9 = vrot.slane %v1422_v6, 1  ;;  %v1039_v59 = vadd.f32 %v6695_v50, %v800_v14  ;;  %v802_v3 = vpop.f32.mrb[65].mxu0 }
 0x197   :  { %v1040_v16 = vadd.f32 %v6702_v29, %v802_v3  ;;  %v804_v7 = vpop.f32.mrb[66].mxu0  ;;  %v6706_v10 = vsel %vm1559_vm4, %v3823_v47, %v3824_v34  ;;  %v6720_v34 = vld [vmem:[%s7765_s2 + $0x18] sm:$0xff] }
 0x198   :  { %7861 = vst [vmem:[#allocation37_spill] sm:$0xff] %v6706_v10  ;;  %vm1167_vm5 = vcmp.gt.f32.partialorder %v1039_v59, 0.0  ;;  %v1295_v51 = vmul.f32 0.2, %v1039_v59  ;;  %v1041_v6 = vadd.f32 %v6711_v23, %v804_v7  ;;  %v806_v14 = vpop.f32.mrb[67].mxu0  ;;  %v6715_v42 = vsel %vm1559_vm4, %v3826_v8, %v3827_v9 }
 0x199   :  { %7862 = vst [vmem:[#allocation38_spill] sm:$0xff] %v6715_v42  ;;  %vm1168_vm6 = vcmp.gt.f32.partialorder %v1040_v16, 0.0  ;;  %v1296_v56 = vmul.f32 0.2, %v1040_v16  ;;  %v1042_v47 = vadd.f32 %v6720_v34, %v806_v14 }
 0x19a   :  { %v6725_v28 = vsel %vm1167_vm5, %v1039_v59, %v1295_v51  ;;  %vm1169_vm7 = vcmp.gt.f32.partialorder %v1041_v6, 0.0  ;;  %v1297_v7 = vmul.f32 0.2, %v1041_v6  ;;  %v6736_v59 = vld [vmem:[%s7765_s2 + $0x20] sm:$0xff] }
 0x19b   :  { %7863 = vst [vmem:[#allocation39_spill] sm:$0xff] %v6725_v28  ;;  %v6729_v8 = vsel %vm1168_vm6, %v1040_v16, %v1296_v56  ;;  %vm1170_vm8 = vcmp.gt.f32.partialorder %v1042_v47, 0.0  ;;  %v1298_v44 = vmul.f32 0.2, %v1042_v47  ;;  %v1584_v45 = vrot.slane %v6725_v28, 1  ;;  %v6742_v16 = vld [vmem:[%s7765_s2 + $0x28] sm:$0xff] }
 0x19c   :  { %7864 = vst [vmem:[#allocation40_spill] sm:$0xff] %v6729_v8  ;;  %v1425_v49 = vsel %vm1169_vm7, %v1041_v6, %v1297_v7  ;;  %v1587_v53 = vrot.slane %v6729_v8, 1 }
 0x19d   :  { %v1585_v26 = vrot.slane %v1425_v49, 1  ;;  %v1426_v13 = vsel %vm1170_vm8, %v1042_v47, %v1298_v44  ;;  %v810_v14 = vpop.f32.mrb[68].mxu0  ;;  %v6751_v47 = vld [vmem:[%s7765_s2 + $0x30] sm:$0xff] }
 0x19e   :  { %v1588_v3 = vrot.slane %v1426_v13, 1  ;;  %v1043_v51 = vadd.f32 %v6736_v59, %v810_v14  ;;  %v812_v56 = vpop.f32.mrb[69].mxu0 }
 0x19f   :  { %v1044_v49 = vadd.f32 %v6742_v16, %v812_v56  ;;  %v814_v44 = vpop.f32.mrb[70].mxu0  ;;  %v6746_v6 = vsel %vm1559_vm4, %v1584_v45, %v1585_v26  ;;  %v6760_v26 = vld [vmem:[%s7765_s2 + $0x38] sm:$0xff] }
 0x1a0   :  { %vm1171_vm9 = vcmp.gt.f32.partialorder %v1043_v51, 0.0  ;;  %v1299_v13 = vmul.f32 0.2, %v1043_v51  ;;  %v1045_v7 = vadd.f32 %v6751_v47, %v814_v44  ;;  %v816_v14 = vpop.f32.mrb[71].mxu0  ;;  %v6755_v9 = vsel %vm1559_vm4, %v1587_v53, %v1588_v3 }
 0x1a1   :  { %vm1172_vm10 = vcmp.gt.f32.partialorder %v1044_v49, 0.0  ;;  %v1300_v11 = vmul.f32 0.2, %v1044_v49  ;;  %v1046_v45 = vadd.f32 %v6760_v26, %v816_v14 }
 0x1a2   :  { %vm1173_vm11 = vcmp.gt.f32.partialorder %v1045_v7, 0.0  ;;  %v1301_v56 = vmul.f32 0.2, %v1045_v7  ;;  %v6763_v10 = vsel %vm1171_vm9, %v1043_v51, %v1299_v13 }
 0x1a3   :  { %vm1174_vm12 = vcmp.gt.f32.partialorder %v1046_v45, 0.0  ;;  %v1302_v24 = vmul.f32 0.2, %v1046_v45  ;;  %v6765_v44 = vsel %vm1172_vm10, %v1044_v49, %v1300_v11  ;;  %v2477_v43 = vrot.slane %v6763_v10, 1  ;;  %v6778_v11 = vld [vmem:[%s7765_s2 + $0x48] sm:$0xff] }
 0x1a4   :  { %v1429_v42 = vsel %vm1173_vm11, %v1045_v7, %v1301_v56  ;;  %v2480_v13 = vrot.slane %v6765_v44, 1 }
 0x1a5   :  { %v2478_v53 = vrot.slane %v1429_v42, 1  ;;  %v1430_v3 = vsel %vm1174_vm12, %v1046_v45, %v1302_v24  ;;  %v820_v12 = vpop.f32.mrb[72].mxu0 }
 0x1a6   :  { %v2481_v61 = vrot.slane %v1430_v3, 1  ;;  %v1047_v14 = vadd.f32 %v6771_v22, %v820_v12  ;;  %v822_v51 = vpop.f32.mrb[73].mxu0  ;;  %v6787_v12 = vld [vmem:[%s7765_s2 + $0x50] sm:$0xff] }
 0x1a7   :  { %v1048_v24 = vadd.f32 %v6778_v11, %v822_v51  ;;  %v824_v42 = vpop.f32.mrb[74].mxu0  ;;  %v6782_v49 = vsel %vm1559_vm4, %v2477_v43, %v2478_v53  ;;  %v6796_v43 = vld [vmem:[%s7765_s2 + $0x58] sm:$0xff] }
 0x1a8   :  { %vm1175_vm13 = vcmp.gt.f32.partialorder %v1047_v14, 0.0  ;;  %v1303_v7 = vmul.f32 0.2, %v1047_v14  ;;  %v1049_v45 = vadd.f32 %v6787_v12, %v824_v42  ;;  %v826_v56 = vpop.f32.mrb[75].mxu0  ;;  %v6791_v3 = vsel %vm1559_vm4, %v2480_v13, %v2481_v61 }
 0x1a9   :  { %vm1176_vm14 = vcmp.gt.f32.partialorder %v1048_v24, 0.0  ;;  %v1304_v15 = vmul.f32 0.2, %v1048_v24  ;;  %v1050_v53 = vadd.f32 %v6796_v43, %v826_v56 }
 0x1aa   :  { %vm1177_vm15 = vcmp.gt.f32.partialorder %v1049_v45, 0.0  ;;  %v1305_v51 = vmul.f32 0.2, %v1049_v45  ;;  %v6799_v63 = vsel %vm1175_vm13, %v1047_v14, %v1303_v7 }
 0x1ab   :  { %7865 = vst [vmem:[#allocation41_spill] sm:$0xff] %v6799_v63  ;;  %vm1178_vm0 = vcmp.gt.f32.partialorder %v1050_v53, 0.0  ;;  %v1306_v33 = vmul.f32 0.2, %v1050_v53  ;;  %v6801_v42 = vsel %vm1176_vm14, %v1048_v24, %v1304_v15  ;;  %v3153_v38 = vrot.slane %v6799_v63, 1  ;;  %v6814_v15 = vld [vmem:[%s7765_s2 + $0x68] sm:$0xff] }
 0x1ac   :  { %7866 = vst [vmem:[#allocation42_spill] sm:$0xff] %v6801_v42  ;;  %v1433_v46 = vsel %vm1177_vm15, %v1049_v45, %v1305_v51  ;;  %v3156_v7 = vrot.slane %v6801_v42, 1 }
 0x1ad   :  { %v3154_v61 = vrot.slane %v1433_v46, 1  ;;  %v1434_v13 = vsel %vm1178_vm0, %v1050_v53, %v1306_v33  ;;  %v830_v30 = vpop.f32.mrb[76].mxu0 }
 0x1ae   :  { %v3157_v60 = vrot.slane %v1434_v13, 1  ;;  %v1051_v56 = vadd.f32 %v6807_v1, %v830_v30  ;;  %v832_v14 = vpop.f32.mrb[77].mxu0  ;;  %v6823_v30 = vld [vmem:[%s7765_s2 + $0x70] sm:$0xff] }
 0x1af   :  { %v1052_v33 = vadd.f32 %v6814_v15, %v832_v14  ;;  %v834_v46 = vpop.f32.mrb[78].mxu0  ;;  %v6818_v24 = vsel %vm1559_vm4, %v3153_v38, %v3154_v61  ;;  %v6832_v38 = vld [vmem:[%s7765_s2 + $0x78] sm:$0xff] }
 0x1b0   :  { %7867 = vst [vmem:[#allocation43_spill] sm:$0xff] %v6818_v24  ;;  %vm1179_vm1 = vcmp.gt.f32.partialorder %v1051_v56, 0.0  ;;  %v1307_v45 = vmul.f32 0.2, %v1051_v56  ;;  %v1053_v53 = vadd.f32 %v6823_v30, %v834_v46  ;;  %v836_v51 = vpop.f32.mrb[79].mxu0  ;;  %v6827_v13 = vsel %vm1559_vm4, %v3156_v7, %v3157_v60 }
 0x1b1   :  { %7868 = vst [vmem:[#allocation44_spill] sm:$0xff] %v6827_v13  ;;  %vm1180_vm2 = vcmp.gt.f32.partialorder %v1052_v33, 0.0  ;;  %v1308_v5 = vmul.f32 0.2, %v1052_v33  ;;  %v1054_v61 = vadd.f32 %v6832_v38, %v836_v51 }
 0x1b2   :  { %vm1181_vm3 = vcmp.gt.f32.partialorder %v1053_v53, 0.0  ;;  %v1309_v14 = vmul.f32 0.2, %v1053_v53  ;;  %v6835_v31 = vsel %vm1179_vm1, %v1051_v56, %v1307_v45 }
 0x1b3   :  { %7869 = vst [vmem:[#allocation45_spill] sm:$0xff] %v6835_v31  ;;  %vm1182_vm5 = vcmp.gt.f32.partialorder %v1054_v61, 0.0  ;;  %v1310_v0 = vmul.f32 0.2, %v1054_v61  ;;  %v6837_v46 = vsel %vm1180_vm2, %v1052_v33, %v1308_v5  ;;  %v3829_v25 = vrot.slane %v6835_v31, 1 }
 0x1b4   :  { %7870 = vst [vmem:[#allocation46_spill] sm:$0xff] %v6837_v46  ;;  %v1437_v18 = vsel %vm1181_vm3, %v1053_v53, %v1309_v14  ;;  %v3832_v51 = vrot.slane %v6837_v46, 1 }
 0x1b5   :  { %v3830_v60 = vrot.slane %v1437_v18, 1  ;;  %v1438_v7 = vsel %vm1182_vm5, %v1054_v61, %v1310_v0  ;;  %v840_v37 = vpop.f32.mrb[80].mxu0 }
 0x1b6   :  { %v3833_v35 = vrot.slane %v1438_v7, 1  ;;  %v1055_v21 = vadd.f32 %v6695_v50, %v840_v37  ;;  %v842_v40 = vpop.f32.mrb[81].mxu0 }
 0x1b7   :  { %v1056_v36 = vadd.f32 %v6702_v29, %v842_v40  ;;  %v844_v56 = vpop.f32.mrb[82].mxu0  ;;  %v6844_v45 = vsel %vm1559_vm4, %v3829_v25, %v3830_v60 }
 0x1b8   :  { %7871 = vst [vmem:[#allocation47_spill] sm:$0xff] %v6844_v45  ;;  %vm1183_vm6 = vcmp.gt.f32.partialorder %v1055_v21, 0.0  ;;  %v1311_v5 = vmul.f32 0.2, %v1055_v21  ;;  %v1057_v18 = vadd.f32 %v6711_v23, %v844_v56  ;;  %v846_v0 = vpop.f32.mrb[83].mxu0  ;;  %v6848_v33 = vsel %vm1559_vm4, %v3832_v51, %v3833_v35 }
 0x1b9   :  { %7872 = vst [vmem:[#allocation48_spill] sm:$0xff] %v6848_v33  ;;  %vm1184_vm7 = vcmp.gt.f32.partialorder %v1056_v36, 0.0  ;;  %v1312_v53 = vmul.f32 0.2, %v1056_v36  ;;  %v1058_v37 = vadd.f32 %v6720_v34, %v846_v0 }
 0x1ba   :  { %v6851_v61 = vsel %vm1183_vm6, %v1055_v21, %v1311_v5  ;;  %vm1185_vm8 = vcmp.gt.f32.partialorder %v1057_v18, 0.0  ;;  %v1313_v40 = vmul.f32 0.2, %v1057_v18 }
 0x1bb   :  { %7873 = vst [vmem:[#allocation49_spill] sm:$0xff] %v6851_v61  ;;  %v6853_v14 = vsel %vm1184_vm7, %v1056_v36, %v1312_v53  ;;  %vm1186_vm9 = vcmp.gt.f32.partialorder %v1058_v37, 0.0  ;;  %v1314_v25 = vmul.f32 0.2, %v1058_v37  ;;  %v1590_v51 = vrot.slane %v6851_v61, 1 }
 0x1bc   :  { %7874 = vst [vmem:[#allocation50_spill] sm:$0xff] %v6853_v14  ;;  %v1441_v60 = vsel %vm1185_vm8, %v1057_v18, %v1313_v40  ;;  %v1593_v21 = vrot.slane %v6853_v14, 1 }
 0x1bd   :  { %v1591_v56 = vrot.slane %v1441_v60, 1  ;;  %v1442_v17 = vsel %vm1186_vm9, %v1058_v37, %v1314_v25  ;;  %v850_v0 = vpop.f32.mrb[84].mxu0 }
 0x1be   :  { %v1594_v5 = vrot.slane %v1442_v17, 1  ;;  %v1059_v36 = vadd.f32 %v6736_v59, %v850_v0  ;;  %v852_v53 = vpop.f32.mrb[85].mxu0 }
 0x1bf   :  { %v1060_v2 = vadd.f32 %v6742_v16, %v852_v53  ;;  %v854_v18 = vpop.f32.mrb[86].mxu0  ;;  %v1592_v40 = vsel %vm1559_vm4, %v1590_v51, %v1591_v56 }
 0x1c0   :  { %vm1187_vm10 = vcmp.gt.f32.partialorder %v1059_v36, 0.0  ;;  %v1315_v7 = vmul.f32 0.2, %v1059_v36  ;;  %v1061_v35 = vadd.f32 %v6751_v47, %v854_v18  ;;  %v856_v28 = vpop.f32.mrb[87].mxu0  ;;  %v1595_v60 = vsel %vm1559_vm4, %v1593_v21, %v1594_v5 }
 0x1c1   :  { %vm1188_vm11 = vcmp.gt.f32.partialorder %v1060_v2, 0.0  ;;  %v1316_v37 = vmul.f32 0.2, %v1060_v2  ;;  %v1062_v25 = vadd.f32 %v6760_v26, %v856_v28  ;;  %v1629_v17 = vpack.c.bf16 %v1595_v60, %v6755_v9 }
 0x1c2   :  { %vm1189_vm12 = vcmp.gt.f32.partialorder %v1061_v35, 0.0  ;;  %v1317_v0 = vmul.f32 0.2, %v1061_v35  ;;  %v1628_v53 = vpack.c.bf16 %v1592_v40, %v6746_v6  ;;  %v1443_v61 = vsel %vm1187_vm10, %v1059_v36, %v1315_v7 }
 0x1c3   :  { %vm1190_vm13 = vcmp.gt.f32.partialorder %v1062_v25, 0.0  ;;  %v1318_v51 = vmul.f32 0.2, %v1062_v25  ;;  %1877 = vmatprep.mubr.bf16.mxu0 %v1629_v17  ;;  %v1444_v56 = vsel %vm1188_vm11, %v1060_v2, %v1316_v37  ;;  %v2135_v18 = vpack.c.bf16 %v1443_v61, %v6763_v10 }
 0x1c4   :  { %v1445_v8 = vsel %vm1189_vm12, %v1061_v35, %v1317_v0  ;;  %1878 = vmatmul.mubr.bf16.gmra.mrb[136].mxu0 %v1628_v53  ;;  %v2136_v21 = vpack.c.bf16 %v1444_v56, %v6765_v44  ;;  %v2483_v57 = vrot.slane %v1443_v61, 1  ;;  %v2486_v6 = vrot.slane %v1444_v56, 1 }
 0x1c5   :  { %v2484_v5 = vrot.slane %v1445_v8, 1  ;;  %v1446_v14 = vsel %vm1190_vm13, %v1062_v25, %v1318_v51  ;;  %v860_v28 = vpop.f32.mrb[88].mxu0 }
 0x1c6   :  { %v2487_v9 = vrot.slane %v1446_v14, 1  ;;  %v1063_v60 = vadd.f32 %v6771_v22, %v860_v28  ;;  %v862_v19 = vpop.f32.mrb[89].mxu0  ;;  %2384 = vmatprep.mubr.bf16.mxu1 %v2136_v21 }
 0x1c7   :  { %v1064_v7 = vadd.f32 %v6778_v11, %v862_v19  ;;  %v864_v36 = vpop.f32.mrb[90].mxu0  ;;  %2385 = vmatmul.mubr.bf16.gmra.mrb[8].mxu1 %v2135_v18  ;;  %v6874_v2 = vsel %vm1559_vm4, %v2483_v57, %v2484_v5 }
 0x1c8   :  { %vm1191_vm14 = vcmp.gt.f32.partialorder %v1063_v60, 0.0  ;;  %v1319_v10 = vmul.f32 0.2, %v1063_v60  ;;  %v1065_v8 = vadd.f32 %v6787_v12, %v864_v36  ;;  %v866_v44 = vpop.f32.mrb[91].mxu0  ;;  %v6878_v61 = vsel %vm1559_vm4, %v2486_v6, %v2487_v9 }
 0x1c9   :  { %vm1192_vm15 = vcmp.gt.f32.partialorder %v1064_v7, 0.0  ;;  %v1320_v14 = vmul.f32 0.2, %v1064_v7  ;;  %v1066_v35 = vadd.f32 %v6796_v43, %v866_v44 }
 0x1ca   :  { %vm1193_vm0 = vcmp.gt.f32.partialorder %v1065_v8, 0.0  ;;  %v1321_v40 = vmul.f32 0.2, %v1065_v8  ;;  %v6885_v37 = vsel %vm1191_vm14, %v1063_v60, %v1319_v10 }
 0x1cb   :  { %7875 = vst [vmem:[#allocation51_spill] sm:$0xff] %v6885_v37  ;;  %vm1194_vm1 = vcmp.gt.f32.partialorder %v1066_v35, 0.0  ;;  %v1322_v25 = vmul.f32 0.2, %v1066_v35  ;;  %v6887_v17 = vsel %vm1192_vm15, %v1064_v7, %v1320_v14  ;;  %v3159_v5 = vrot.slane %v6885_v37, 1 }
 0x1cc   :  { %7876 = vst [vmem:[#allocation52_spill] sm:$0xff] %v6887_v17  ;;  %v1449_v53 = vsel %vm1193_vm0, %v1065_v8, %v1321_v40  ;;  %v3162_v6 = vrot.slane %v6887_v17, 1 }
 0x1cd   :  { %v3160_v56 = vrot.slane %v1449_v53, 1  ;;  %v1450_v18 = vsel %vm1194_vm1, %v1066_v35, %v1322_v25  ;;  %v870_v21 = vpop.f32.mrb[92].mxu0 }
 0x1ce   :  { %v3163_v28 = vrot.slane %v1450_v18, 1  ;;  %v1067_v9 = vadd.f32 %v6807_v1, %v870_v21  ;;  %v872_v60 = vpop.f32.mrb[93].mxu0 }
 0x1cf   :  { %v1068_v7 = vadd.f32 %v6814_v15, %v872_v60  ;;  %v874_v36 = vpop.f32.mrb[94].mxu0  ;;  %v6898_v10 = vsel %vm1559_vm4, %v3159_v5, %v3160_v56 }
 0x1d0   :  { %7877 = vst [vmem:[#allocation53_spill] sm:$0xff] %v6898_v10  ;;  %vm1195_vm2 = vcmp.gt.f32.partialorder %v1067_v9, 0.0  ;;  %v1323_v8 = vmul.f32 0.2, %v1067_v9  ;;  %v1069_v44 = vadd.f32 %v6823_v30, %v874_v36  ;;  %v876_v14 = vpop.f32.mrb[95].mxu0  ;;  %v6902_v35 = vsel %vm1559_vm4, %v3162_v6, %v3163_v28 }
 0x1d1   :  { %7878 = vst [vmem:[#allocation54_spill] sm:$0xff] %v6902_v35  ;;  %vm1196_vm3 = vcmp.gt.f32.partialorder %v1068_v7, 0.0  ;;  %v1324_v40 = vmul.f32 0.2, %v1068_v7  ;;  %v1070_v25 = vadd.f32 %v6832_v38, %v876_v14 }
 0x1d2   :  { %vm1197_vm5 = vcmp.gt.f32.partialorder %v1069_v44, 0.0  ;;  %v1325_v18 = vmul.f32 0.2, %v1069_v44  ;;  %v6909_v21 = vsel %vm1195_vm2, %v1067_v9, %v1323_v8 }
 0x1d3   :  { %7879 = vst [vmem:[#allocation55_spill] sm:$0xff] %v6909_v21  ;;  %vm1198_vm6 = vcmp.gt.f32.partialorder %v1070_v25, 0.0  ;;  %v1326_v5 = vmul.f32 0.2, %v1070_v25  ;;  %v6911_v60 = vsel %vm1196_vm3, %v1068_v7, %v1324_v40  ;;  %v3835_v51 = vrot.slane %v6909_v21, 1 }
 0x1d4   :  { %7880 = vst [vmem:[#allocation56_spill] sm:$0xff] %v6911_v60  ;;  %v1453_v6 = vsel %vm1197_vm5, %v1069_v44, %v1325_v18  ;;  %v3838_v56 = vrot.slane %v6911_v60, 1 }
 0x1d5   :  { %v3836_v14 = vrot.slane %v1453_v6, 1  ;;  %v1454_v53 = vsel %vm1198_vm6, %v1070_v25, %v1326_v5  ;;  %v880_v0 = vpop.f32.mrb[96].mxu0 }
 0x1d6   :  { %v3839_v57 = vrot.slane %v1454_v53, 1  ;;  %v1071_v9 = vadd.f32 %v6695_v50, %v880_v0  ;;  %v882_v8 = vpop.f32.mrb[97].mxu0 }
 0x1d7   :  { %v1072_v7 = vadd.f32 %v6702_v29, %v882_v8  ;;  %v884_v40 = vpop.f32.mrb[98].mxu0  ;;  %v6922_v28 = vsel %vm1559_vm4, %v3835_v51, %v3836_v14 }
 0x1d8   :  { %7881 = vst [vmem:[#allocation57_spill] sm:$0xff] %v6922_v28  ;;  %vm1199_vm7 = vcmp.gt.f32.partialorder %v1071_v9, 0.0  ;;  %v1327_v44 = vmul.f32 0.2, %v1071_v9  ;;  %v1073_v18 = vadd.f32 %v6711_v23, %v884_v40  ;;  %v886_v25 = vpop.f32.mrb[99].mxu0  ;;  %v6926_v5 = vsel %vm1559_vm4, %v3838_v56, %v3839_v57 }
 0x1d9   :  { %7882 = vst [vmem:[#allocation58_spill] sm:$0xff] %v6926_v5  ;;  %vm1200_vm8 = vcmp.gt.f32.partialorder %v1072_v7, 0.0  ;;  %v1328_v53 = vmul.f32 0.2, %v1072_v7  ;;  %v1074_v0 = vadd.f32 %v6720_v34, %v886_v25 }
 0x1da   :  { %v6931_v8 = vsel %vm1199_vm7, %v1071_v9, %v1327_v44  ;;  %vm1201_vm9 = vcmp.gt.f32.partialorder %v1073_v18, 0.0  ;;  %v1329_v51 = vmul.f32 0.2, %v1073_v18 }
 0x1db   :  { %v6935_v36 = vsel %vm1200_vm8, %v1072_v7, %v1328_v53  ;;  %vm1202_vm10 = vcmp.gt.f32.partialorder %v1074_v0, 0.0  ;;  %v1330_v40 = vmul.f32 0.2, %v1074_v0  ;;  %v1596_v56 = vrot.slane %v6931_v8, 1 }
 0x1dc   :  { %v1457_v57 = vsel %vm1201_vm9, %v1073_v18, %v1329_v51  ;;  %v1599_v21 = vrot.slane %v6935_v36, 1 }
 0x1dd   :  { %v1597_v19 = vrot.slane %v1457_v57, 1  ;;  %v1458_v31 = vsel %vm1202_vm10, %v1074_v0, %v1330_v40  ;;  %v890_v25 = vpop.f32.mrb[100].mxu0 }
 0x1de   :  { %v1600_v6 = vrot.slane %v1458_v31, 1  ;;  %v1075_v9 = vadd.f32 %v6736_v59, %v890_v25  ;;  %v892_v44 = vpop.f32.mrb[101].mxu0 }
 0x1df   :  { %v1076_v33 = vadd.f32 %v6742_v16, %v892_v44  ;;  %v894_v5 = vpop.f32.mrb[102].mxu0  ;;  %v6942_v7 = vsel %vm1559_vm4, %v1596_v56, %v1597_v19 }
 0x1e0   :  { %vm1203_vm11 = vcmp.gt.f32.partialorder %v1075_v9, 0.0  ;;  %v1331_v53 = vmul.f32 0.2, %v1075_v9  ;;  %v1077_v18 = vadd.f32 %v6751_v47, %v894_v5  ;;  %v896_v51 = vpop.f32.mrb[103].mxu0  ;;  %v6946_v0 = vsel %vm1559_vm4, %v1599_v21, %v1600_v6 }
 0x1e1   :  { %vm1204_vm12 = vcmp.gt.f32.partialorder %v1076_v33, 0.0  ;;  %v1332_v40 = vmul.f32 0.2, %v1076_v33  ;;  %v1078_v31 = vadd.f32 %v6760_v26, %v896_v51 }
 0x1e2   :  { %vm1205_vm13 = vcmp.gt.f32.partialorder %v1077_v18, 0.0  ;;  %v1333_v57 = vmul.f32 0.2, %v1077_v18  ;;  %v6949_v25 = vsel %vm1203_vm11, %v1075_v9, %v1331_v53 }
 0x1e3   :  { %vm1206_vm14 = vcmp.gt.f32.partialorder %v1078_v31, 0.0  ;;  %v1334_v44 = vmul.f32 0.2, %v1078_v31  ;;  %v6951_v19 = vsel %vm1204_vm12, %v1076_v33, %v1332_v40  ;;  %v2489_v28 = vrot.slane %v6949_v25, 1 }
 0x1e4   :  { %v1461_v56 = vsel %vm1205_vm13, %v1077_v18, %v1333_v57  ;;  %v2492_v51 = vrot.slane %v6951_v19, 1 }
 0x1e5   :  { %v2490_v14 = vrot.slane %v1461_v56, 1  ;;  %v1462_v45 = vsel %vm1206_vm14, %v1078_v31, %v1334_v44  ;;  %v900_v5 = vpop.f32.mrb[104].mxu0 }
 0x1e6   :  { %v2493_v21 = vrot.slane %v1462_v45, 1  ;;  %v1079_v6 = vadd.f32 %v6771_v22, %v900_v5  ;;  %v902_v46 = vpop.f32.mrb[105].mxu0 }
 0x1e7   :  { %v1080_v60 = vadd.f32 %v6778_v11, %v902_v46  ;;  %v904_v9 = vpop.f32.mrb[106].mxu0  ;;  %v6958_v53 = vsel %vm1559_vm4, %v2489_v28, %v2490_v14 }
 0x1e8   :  { %vm1207_vm15 = vcmp.gt.f32.partialorder %v1079_v6, 0.0  ;;  %v1335_v33 = vmul.f32 0.2, %v1079_v6  ;;  %v1081_v18 = vadd.f32 %v6787_v12, %v904_v9  ;;  %v906_v40 = vpop.f32.mrb[107].mxu0  ;;  %v6962_v31 = vsel %vm1559_vm4, %v2492_v51, %v2493_v21 }
 0x1e9   :  { %vm1208_vm0 = vcmp.gt.f32.partialorder %v1080_v60, 0.0  ;;  %v1336_v45 = vmul.f32 0.2, %v1080_v60  ;;  %v1082_v57 = vadd.f32 %v6796_v43, %v906_v40 }
 0x1ea   :  { %vm1209_vm1 = vcmp.gt.f32.partialorder %v1081_v18, 0.0  ;;  %v1337_v44 = vmul.f32 0.2, %v1081_v18  ;;  %v6965_v56 = vsel %vm1207_vm15, %v1079_v6, %v1335_v33 }
 0x1eb   :  { %vm1210_vm2 = vcmp.gt.f32.partialorder %v1082_v57, 0.0  ;;  %v1338_v46 = vmul.f32 0.2, %v1082_v57  ;;  %v6967_v28 = vsel %vm1208_vm0, %v1080_v60, %v1336_v45  ;;  %v3165_v10 = vrot.slane %v6965_v56, 1 }
 0x1ec   :  { %v1465_v14 = vsel %vm1209_vm1, %v1081_v18, %v1337_v44  ;;  %v3168_v40 = vrot.slane %v6967_v28, 1 }
 0x1ed   :  { %v3166_v5 = vrot.slane %v1465_v14, 1  ;;  %v1466_v24 = vsel %vm1210_vm2, %v1082_v57, %v1338_v46  ;;  %v910_v9 = vpop.f32.mrb[108].mxu0 }
 0x1ee   :  { %v3169_v21 = vrot.slane %v1466_v24, 1  ;;  %v1083_v51 = vadd.f32 %v6807_v1, %v910_v9  ;;  %v912_v13 = vpop.f32.mrb[109].mxu0 }
 0x1ef   :  { %v1084_v35 = vadd.f32 %v6814_v15, %v912_v13  ;;  %v914_v6 = vpop.f32.mrb[110].mxu0  ;;  %v6974_v33 = vsel %vm1559_vm4, %v3165_v10, %v3166_v5 }
 0x1f0   :  { %vm1211_vm3 = vcmp.gt.f32.partialorder %v1083_v51, 0.0  ;;  %v1339_v60 = vmul.f32 0.2, %v1083_v51  ;;  %v1085_v18 = vadd.f32 %v6823_v30, %v914_v6  ;;  %v916_v45 = vpop.f32.mrb[111].mxu0  ;;  %v6978_v57 = vsel %vm1559_vm4, %v3168_v40, %v3169_v21 }
 0x1f1   :  { %vm1212_vm5 = vcmp.gt.f32.partialorder %v1084_v35, 0.0  ;;  %v1340_v24 = vmul.f32 0.2, %v1084_v35  ;;  %v1086_v44 = vadd.f32 %v6832_v38, %v916_v45 }
 0x1f2   :  { %vm1213_vm6 = vcmp.gt.f32.partialorder %v1085_v18, 0.0  ;;  %v1341_v46 = vmul.f32 0.2, %v1085_v18  ;;  %v6981_v14 = vsel %vm1211_vm3, %v1083_v51, %v1339_v60 }
 0x1f3   :  { %vm1214_vm7 = vcmp.gt.f32.partialorder %v1086_v44, 0.0  ;;  %v1342_v13 = vmul.f32 0.2, %v1086_v44  ;;  %v6983_v10 = vsel %vm1212_vm5, %v1084_v35, %v1340_v24  ;;  %v3841_v37 = vrot.slane %v6981_v14, 1 }
 0x1f4   :  { %v1469_v5 = vsel %vm1213_vm6, %v1085_v18, %v1341_v46  ;;  %v3844_v45 = vrot.slane %v6983_v10, 1 }
 0x1f5   :  { %v3842_v9 = vrot.slane %v1469_v5, 1  ;;  %v1470_v63 = vsel %vm1214_vm7, %v1086_v44, %v1342_v13  ;;  %v920_v6 = vpop.f32.mrb[112].mxu0 }
 0x1f6   :  { %v3845_v21 = vrot.slane %v1470_v63, 1  ;;  %v1087_v40 = vadd.f32 %v6695_v50, %v920_v6  ;;  %v922_v42 = vpop.f32.mrb[113].mxu0 }
 0x1f7   :  { %v1088_v17 = vadd.f32 %v6702_v29, %v922_v42  ;;  %v924_v51 = vpop.f32.mrb[114].mxu0  ;;  %v6990_v60 = vsel %vm1559_vm4, %v3841_v37, %v3842_v9 }
 0x1f8   :  { %vm1215_vm8 = vcmp.gt.f32.partialorder %v1087_v40, 0.0  ;;  %v1343_v35 = vmul.f32 0.2, %v1087_v40  ;;  %v1089_v18 = vadd.f32 %v6711_v23, %v924_v51  ;;  %v926_v24 = vpop.f32.mrb[115].mxu0  ;;  %v6994_v44 = vsel %vm1559_vm4, %v3844_v45, %v3845_v21 }
 0x1f9   :  { %vm1216_vm9 = vcmp.gt.f32.partialorder %v1088_v17, 0.0  ;;  %v1344_v63 = vmul.f32 0.2, %v1088_v17  ;;  %v1090_v50 = vadd.f32 %v6720_v34, %v926_v24 }
 0x1fa   :  { %v6997_v46 = vsel %vm1215_vm8, %v1087_v40, %v1343_v35  ;;  %vm1217_vm10 = vcmp.gt.f32.partialorder %v1089_v18, 0.0  ;;  %v1345_v29 = vmul.f32 0.2, %v1089_v18 }
 0x1fb   :  { %v6999_v42 = vsel %vm1216_vm9, %v1088_v17, %v1344_v63  ;;  %vm1218_vm11 = vcmp.gt.f32.partialorder %v1090_v50, 0.0  ;;  %v1346_v37 = vmul.f32 0.2, %v1090_v50  ;;  %v1602_v9 = vrot.slane %v6997_v46, 1 }
 0x1fc   :  { %v1473_v13 = vsel %vm1217_vm10, %v1089_v18, %v1345_v29  ;;  %v1494_v23 = vpack.c.bf16 %v6999_v42, %v6935_v36  ;;  %v1605_v40 = vrot.slane %v6999_v42, 1  ;;  %v5417_v36 = vld [vmem:[%s7764_s3 + $0x464] ss:$8 sps:$4 sm:$0xff]   ;;  %v7903_v42 = vpack.c.bf16 %v6997_v46, %v6931_v8  ;;  %v5418_v8 = vld [vmem:[%s7764_s3 + $0x470] ss:$8 sps:$4 sm:$0xff]  }
 0x1fd   :  { %v1603_v6 = vrot.slane %v1473_v13, 1  ;;  %v1474_v21 = vsel %vm1218_vm11, %v1090_v50, %v1346_v37  ;;  %v930_v34 = vpop.f32.mrb[116].mxu0  ;;  %v5423_v46 = vld [vmem:[%s7764_s3 + $0x484] ss:$8 sps:$4 sm:$0xff]  }
 0x1fe   :  { %v1606_v45 = vrot.slane %v1474_v21, 1  ;;  %v1091_v17 = vadd.f32 %v6736_v59, %v930_v34  ;;  %v932_v51 = vpop.f32.mrb[117].mxu0 }
 0x1ff   :  { %v1092_v35 = vadd.f32 %v6742_v16, %v932_v51  ;;  %v934_v18 = vpop.f32.mrb[118].mxu0  ;;  %v1604_v24 = vsel %vm1559_vm4, %v1602_v9, %v1603_v6 }
 0x200   :  { %vm1219_vm12 = vcmp.gt.f32.partialorder %v1091_v17, 0.0  ;;  %v1347_v63 = vmul.f32 0.2, %v1091_v17  ;;  %v1093_v29 = vadd.f32 %v6751_v47, %v934_v18  ;;  %v936_v5 = vpop.f32.mrb[119].mxu0  ;;  %v1607_v13 = vsel %vm1559_vm4, %v1605_v40, %v1606_v45 }
 0x201   :  { %vm1220_vm13 = vcmp.gt.f32.partialorder %v1092_v35, 0.0  ;;  %v1348_v50 = vmul.f32 0.2, %v1092_v35  ;;  %v1094_v37 = vadd.f32 %v6760_v26, %v936_v5  ;;  %v1631_v21 = vpack.c.bf16 %v1607_v13, %v6946_v0 }
 0x202   :  { %vm1221_vm14 = vcmp.gt.f32.partialorder %v1093_v29, 0.0  ;;  %v1349_v59 = vmul.f32 0.2, %v1093_v29  ;;  %v1630_v16 = vpack.c.bf16 %v1604_v24, %v6942_v7  ;;  %v1475_v34 = vsel %vm1219_vm12, %v1091_v17, %v1347_v63 }
 0x203   :  { %vm1222_vm15 = vcmp.gt.f32.partialorder %v1094_v37, 0.0  ;;  %v1350_v9 = vmul.f32 0.2, %v1094_v37  ;;  %1887 = vmatprep.mubr.bf16.mxu0 %v1631_v21  ;;  %v1476_v6 = vsel %vm1220_vm13, %v1092_v35, %v1348_v50  ;;  %v2137_v47 = vpack.c.bf16 %v1475_v34, %v6949_v25 }
 0x204   :  { %v1477_v51 = vsel %vm1221_vm14, %v1093_v29, %v1349_v59  ;;  %1888 = vmatmul.mubr.bf16.gmra.mrb[140].mxu0 %v1630_v16  ;;  %v2138_v40 = vpack.c.bf16 %v1476_v6, %v6951_v19  ;;  %v7883_v0 = vpack.c.bf16 %v6282_v58, %v6135_v41  ;;  %v2495_v5 = vrot.slane %v1475_v34, 1 }
 0x205   :  { %v2496_v45 = vrot.slane %v1477_v51, 1  ;;  %v1478_v18 = vsel %vm1222_vm15, %v1094_v37, %v1350_v9  ;;  %v940_v26 = vpop.f32.mrb[120].mxu0  ;;  %v2498_v35 = vrot.slane %v1476_v6, 1  ;;  %v7884_v58 = vpack.c.bf16 %v6308_v20, %v6214_v32  ;;  %v5397_v9 = vld [vmem:[%s7764_s3 + $0x400] ss:$8 sps:$4 sm:$0xff]  }
 0x206   :  { %2090 = vmatprep.mubr.bf16.mxu0 %v7883_v0  ;;  %v2499_v7 = vrot.slane %v1478_v18, 1  ;;  %v1095_v17 = vadd.f32 %v6771_v22, %v940_v26  ;;  %v942_v24 = vpop.f32.mrb[121].mxu0  ;;  %2394 = vmatprep.mubr.bf16.mxu1 %v2138_v40  ;;  %v7886_v26 = vpack.c.bf16 %v6570_v62, %v6408_v48 }
 0x207   :  { %v1096_v25 = vadd.f32 %v6778_v11, %v942_v24  ;;  %v944_v63 = vpop.f32.mrb[122].mxu0  ;;  %2395 = vmatmul.mubr.bf16.gmra.mrb[12].mxu1 %v2137_v47  ;;  %v7023_v19 = vsel %vm1559_vm4, %v2495_v5, %v2496_v45  ;;  %v7887_v24 = vpack.c.bf16 %v6301_v4, %v6210_v27 }
 0x208   :  { %vm1223_vm0 = vcmp.gt.f32.partialorder %v1095_v17, 0.0  ;;  %v1351_v29 = vmul.f32 0.2, %v1095_v17  ;;  %v1097_v13 = vadd.f32 %v6787_v12, %v944_v63  ;;  %v946_v41 = vpop.f32.mrb[123].mxu0  ;;  %2750 = vmatprep.mubr.bf16.mxu1 %v7884_v58  ;;  %v7030_v22 = vsel %vm1559_vm4, %v2498_v35, %v2499_v7 }
 0x209   :  { %vm1224_vm1 = vcmp.gt.f32.partialorder %v1096_v25, 0.0  ;;  %v1352_v50 = vmul.f32 0.2, %v1096_v25  ;;  %v1098_v11 = vadd.f32 %v6796_v43, %v946_v41  ;;  %v2524_v37 = vpack.c.bf16 %v7030_v22, %v6962_v31  ;;  %v7904_v31 = vld [vmem:[#allocation12_spill] sm:$0xff] }
 0x20a   :  { %vm1225_vm2 = vcmp.gt.f32.partialorder %v1097_v13, 0.0  ;;  %v1353_v21 = vmul.f32 0.2, %v1097_v13  ;;  %v2523_v12 = vpack.c.bf16 %v7023_v19, %v6958_v53  ;;  %v7037_v59 = vsel %vm1223_vm0, %v1095_v17, %v1351_v29  ;;  %v5421_v53 = vld [vmem:[%s7764_s3 + $0x480] ss:$8 sps:$4 sm:$0xff]  }
 0x20b   :  { %vm1226_vm3 = vcmp.gt.f32.partialorder %v1098_v11, 0.0  ;;  %v1354_v32 = vmul.f32 0.2, %v1098_v11  ;;  %v7039_v20 = vsel %vm1224_vm1, %v1096_v25, %v1352_v50  ;;  %v2813_v16 = vpack.c.bf16 %v7037_v59, %v6965_v56  ;;  %v5426_v19 = vld [vmem:[%s7764_s3 + $0x494] ss:$8 sps:$4 sm:$0xff]  }
 0x20c   :  { %v1481_v34 = vsel %vm1225_vm2, %v1097_v13, %v1353_v21  ;;  %v7885_v43 = vpack.c.bf16 %v6278_v52, %v6133_v39  ;;  %v2814_v6 = vpack.c.bf16 %v7039_v20, %v6967_v28  ;;  %v3174_v47 = vrot.slane %v7039_v20, 1  ;;  %v5402_v39 = vld [vmem:[%s7764_s3 + $0x414] ss:$8 sps:$4 sm:$0xff]   ;;  %v7890_v21 = vld [vmem:[#allocation19_spill] sm:$0xff] }
 0x20d   :  { %v3171_v51 = vrot.slane %v7037_v59, 1  ;;  %v3172_v40 = vrot.slane %v1481_v34, 1  ;;  %v1482_v45 = vsel %vm1226_vm3, %v1098_v11, %v1354_v32  ;;  %v950_v18 = vpop.f32.mrb[124].mxu0  ;;  %v7889_v11 = vld [vmem:[#allocation29_spill] sm:$0xff]  ;;  %v5403_v34 = vld [vmem:[%s7764_s3 + $0x420] ss:$8 sps:$4 sm:$0xff]  }
 0x20e   :  { %2091 = vmatmul.mubr.bf16.vlgmr.msra.gmra.mrb[128].mxu0 %v7885_v43  ;;  %v3175_v52 = vrot.slane %v1482_v45, 1  ;;  %v1099_v0 = vadd.f32 %v6807_v1, %v950_v18  ;;  %v952_v5 = vpop.f32.mrb[125].mxu0  ;;  %v7888_v1 = vpack.c.bf16 %v6638_v55, %v6477_v54  ;;  %v7891_v32 = vpack.c.bf16 %v7889_v11, %v7890_v21  ;;  %v7892_v45 = vld [vmem:[#allocation50_spill] sm:$0xff]  ;;  %v7893_v18 = vld [vmem:[#allocation40_spill] sm:$0xff] }
 0x20f   :  { %2100 = vmatprep.mubr.bf16.mxu0 %v7886_v26  ;;  %v1100_v7 = vadd.f32 %v6814_v15, %v952_v5  ;;  %v954_v17 = vpop.f32.mrb[126].mxu0  ;;  %2751 = vmatmul.mubr.bf16.vlgmr.msra.gmra.mrb[0].mxu1 %v7887_v24  ;;  %v7065_v35 = vsel %vm1559_vm4, %v3171_v51, %v3172_v40  ;;  %v5400_v15 = vld [vmem:[%s7764_s3 + $0x410] ss:$8 sps:$4 sm:$0xff]   ;;  %v7894_v26 = vpack.c.bf16 %v7892_v45, %v7893_v18  ;;  %v5432_v11 = vld [vmem:[%s7764_s3 + $0x4b4] ss:$8 sps:$4 sm:$0xff]  }
 0x210   :  { %vm1227_vm5 = vcmp.gt.f32.partialorder %v1099_v0, 0.0  ;;  %v1355_v48 = vmul.f32 0.2, %v1099_v0  ;;  %v1101_v62 = vadd.f32 %v6823_v30, %v954_v17  ;;  %3009 = vmatpush1.bf16.msra.mxu1 %v5397_v9  ;;  %v956_v25 = vpop.f32.mrb[127].mxu0  ;;  %2760 = vmatprep.mubr.bf16.mxu1 %v7888_v1  ;;  %v7075_v27 = vsel %vm1559_vm4, %v3174_v47, %v3175_v52  ;;  %v5405_v30 = vld [vmem:[%s7764_s3 + $0x424] ss:$8 sps:$4 sm:$0xff]  }
 0x211   :  { %vm1228_vm6 = vcmp.gt.f32.partialorder %v1100_v7, 0.0  ;;  %v1356_v4 = vmul.f32 0.2, %v1100_v7  ;;  %v1102_v63 = vadd.f32 %v6832_v38, %v956_v25  ;;  %3010 = vmatprep.subr.bf16.mxu1 %v5402_v39  ;;  %v3200_v54 = vpack.c.bf16 %v7075_v27, %v6978_v57  ;;  %v5408_v39 = vld [vmem:[%s7764_s3 + $0x434] ss:$8 sps:$4 sm:$0xff]   ;;  %v7896_v5 = vld [vmem:[#allocation20_spill] sm:$0xff] }
 0x212   :  { %vm1229_vm7 = vcmp.gt.f32.partialorder %v1101_v62, 0.0  ;;  %v1357_v55 = vmul.f32 0.2, %v1101_v62  ;;  %v3199_v29 = vpack.c.bf16 %v7065_v35, %v6974_v33  ;;  %v7086_v13 = vsel %vm1227_vm5, %v1099_v0, %v1355_v48  ;;  %v7895_v0 = vld [vmem:[#allocation30_spill] sm:$0xff]  ;;  %v5411_v1 = vld [vmem:[%s7764_s3 + $0x444] ss:$8 sps:$4 sm:$0xff]  }
 0x213   :  { %vm1230_vm8 = vcmp.gt.f32.partialorder %v1102_v63, 0.0  ;;  %v1358_v41 = vmul.f32 0.2, %v1102_v63  ;;  %v7088_v58 = vsel %vm1228_vm6, %v1100_v7, %v1356_v4  ;;  %v3489_v38 = vpack.c.bf16 %v7086_v13, %v6981_v14  ;;  %v5406_v48 = vld [vmem:[%s7764_s3 + $0x430] ss:$8 sps:$4 sm:$0xff]  }
 0x214   :  { %v1485_v50 = vsel %vm1229_vm7, %v1101_v62, %v1357_v55  ;;  %3011 = vmatpush1.bf16.msra.mxu1 %v5400_v15  ;;  %v3490_v43 = vpack.c.bf16 %v7088_v58, %v6983_v10  ;;  %v3850_v9 = vrot.slane %v7088_v58, 1  ;;  %v3847_v47 = vrot.slane %v7086_v13, 1  ;;  %v5430_v21 = vld [vmem:[%s7764_s3 + $0x4b0] ss:$8 sps:$4 sm:$0xff]   ;;  %v5444_v45 = vld [vmem:[%s7764_s3 + $0x4f4] ss:$8 sps:$4 sm:$0xff]  }
 0x215   :  { %v3848_v51 = vrot.slane %v1485_v50, 1  ;;  %v1486_v40 = vsel %vm1230_vm8, %v1102_v63, %v1358_v41  ;;  %3012 = vmatprep.subr.bf16.mxu1 %v5405_v30  ;;  %v7897_v7 = vpack.c.bf16 %v7895_v0, %v7896_v5  ;;  %v7898_v24 = vpack.c.bf16 %v6878_v61, %v6791_v3  ;;  %v7899_v3 = vld [vmem:[#allocation49_spill] sm:$0xff]  ;;  %v7900_v61 = vld [vmem:[#allocation39_spill] sm:$0xff]  ;;  %v7922_v20 = vld [vmem:[#allocation14_spill] sm:$0xff] }
 0x216   :  { %2101 = vmatmul.mubr.bf16.gmra.mrb[132].mxu0 %v7891_v32  ;;  %v3851_v52 = vrot.slane %v1486_v40, 1  ;;  %v7901_v4 = vpack.c.bf16 %v7899_v3, %v7900_v61  ;;  %v5409_v63 = vld [vmem:[%s7764_s3 + $0x440] ss:$8 sps:$4 sm:$0xff]   ;;  %v5414_v30 = vld [vmem:[%s7764_s3 + $0x454] ss:$8 sps:$4 sm:$0xff]   ;;  %v7902_v55 = vpack.c.bf16 %v6874_v2, %v6782_v49 }
 0x217   :  { %2110 = vmatprep.mubr.bf16.mxu0 %v7894_v26  ;;  %2761 = vmatmul.mubr.bf16.gmra.mrb[4].mxu1 %v7897_v7  ;;  %v7112_v17 = vsel %vm1559_vm4, %v3847_v47, %v3848_v51  ;;  %v5412_v41 = vld [vmem:[%s7764_s3 + $0x450] ss:$8 sps:$4 sm:$0xff]   ;;  %v5415_v49 = vld [vmem:[%s7764_s3 + $0x460] ss:$8 sps:$4 sm:$0xff]   ;;  %v5420_v2 = vld [vmem:[%s7764_s3 + $0x474] ss:$8 sps:$4 sm:$0xff]  }
 0x218   :  { %3013 = vmatpush1.bf16.msra.mxu1 %v5403_v34  ;;  %2770 = vmatprep.mubr.bf16.mxu1 %v7898_v24  ;;  %v7121_v62 = vsel %vm1559_vm4, %v3850_v9, %v3851_v52  ;;  %v3875_v25 = vpack.c.bf16 %v7112_v17, %v6990_v60  ;;  %v5427_v50 = vld [vmem:[%s7764_s3 + $0x4a0] ss:$8 sps:$4 sm:$0xff]   ;;  %v5435_v32 = vld [vmem:[%s7764_s3 + $0x4c4] ss:$8 sps:$4 sm:$0xff]   ;;  %v5438_v9 = vld [vmem:[%s7764_s3 + $0x4d4] ss:$8 sps:$4 sm:$0xff]  }
 0x219   :  { %3014 = vmatprep.subr.bf16.mxu1 %v5408_v39  ;;  %v3876_v15 = vpack.c.bf16 %v7121_v62, %v6994_v44  ;;  %v5433_v34 = vld [vmem:[%s7764_s3 + $0x4c0] ss:$8 sps:$4 sm:$0xff]   ;;  %v5436_v47 = vld [vmem:[%s7764_s3 + $0x4d0] ss:$8 sps:$4 sm:$0xff]   ;;  %v5441_v51 = vld [vmem:[%s7764_s3 + $0x4e4] ss:$8 sps:$4 sm:$0xff]  }
 0x21a   :  { %v5439_v40 = vld [vmem:[%s7764_s3 + $0x4e0] ss:$8 sps:$4 sm:$0xff]   ;;  %v5442_v18 = vld [vmem:[%s7764_s3 + $0x4f0] ss:$8 sps:$4 sm:$0xff]   ;;  %v5447_v26 = vld [vmem:[%s7764_s3 + $0x504] ss:$8 sps:$4 sm:$0xff]  }
 0x21b   :  { %v5445_v39 = vld [vmem:[%s7764_s3 + $0x500] ss:$8 sps:$4 sm:$0xff]   ;;  %v5450_v52 = vld [vmem:[%s7764_s3 + $0x514] ss:$8 sps:$4 sm:$0xff]   ;;  %v5448_v3 = vld [vmem:[%s7764_s3 + $0x510] ss:$8 sps:$4 sm:$0xff]  }
 0x21c   :  { %3015 = vmatpush1.bf16.msra.mxu1 %v5406_v48  ;;  %v7907_v0 = vld [vmem:[#allocation11_spill] sm:$0xff]  ;;  %v7910_v24 = vld [vmem:[#allocation32_spill] sm:$0xff]  ;;  %v7911_v48 = vld [vmem:[#allocation22_spill] sm:$0xff] }
 0x21d   :  { %3016 = vmatprep.subr.bf16.mxu1 %v5411_v1  ;;  %v7908_v5 = vld [vmem:[#allocation3_spill] sm:$0xff]  ;;  %v7912_v1 = vpack.c.bf16 %v7910_v24, %v7911_v48  ;;  %v5468_v28 = vld [vmem:[%s7764_s3 + $0x574] ss:$8 sps:$4 sm:$0xff]   ;;  %v7940_v27 = vld [vmem:[#allocation16_spill] sm:$0xff] }
 0x21e   :  { %2111 = vmatmul.mubr.bf16.gmra.mrb[136].mxu0 %v7901_v4  ;;  %v7909_v7 = vpack.c.bf16 %v7907_v0, %v7908_v5  ;;  %v5453_v61 = vld [vmem:[%s7764_s3 + $0x524] ss:$8 sps:$4 sm:$0xff]   ;;  %v5451_v4 = vld [vmem:[%s7764_s3 + $0x520] ss:$8 sps:$4 sm:$0xff]   ;;  %v5474_v59 = vld [vmem:[%s7764_s3 + $0x594] ss:$8 sps:$4 sm:$0xff]  }
 0x21f   :  { %2120 = vmatprep.mubr.bf16.mxu0 %v1494_v23  ;;  %2771 = vmatmul.mubr.bf16.gmra.mrb[8].mxu1 %v7902_v55  ;;  %v7905_v23 = vld [vmem:[#allocation4_spill] sm:$0xff]  ;;  %v7914_v55 = vld [vmem:[#allocation21_spill] sm:$0xff] }
 0x220   :  { %3017 = vmatpush1.bf16.msra.mxu1 %v5409_v63  ;;  %2780 = vmatprep.mubr.bf16.mxu1 %v2524_v37  ;;  %v7906_v22 = vpack.c.bf16 %v7904_v31, %v7905_v23  ;;  %v5424_v37 = vld [vmem:[%s7764_s3 + $0x490] ss:$8 sps:$4 sm:$0xff]   ;;  %v5456_v63 = vld [vmem:[%s7764_s3 + $0x534] ss:$8 sps:$4 sm:$0xff]   ;;  %v5459_v31 = vld [vmem:[%s7764_s3 + $0x544] ss:$8 sps:$4 sm:$0xff]  }
 0x221   :  { %3018 = vmatprep.subr.bf16.mxu1 %v5414_v30  ;;  %v7913_v30 = vld [vmem:[#allocation31_spill] sm:$0xff]  ;;  %v5490_v0 = vld [vmem:[%s7764_s3 + $0x5f0] ss:$8 sps:$4 sm:$0xff]   ;;  %v5498_v24 = vld [vmem:[%s7764_s3 + $0x614] ss:$8 sps:$4 sm:$0xff]  }
 0x222   :  { %v5457_v23 = vld [vmem:[%s7764_s3 + $0x540] ss:$8 sps:$4 sm:$0xff]   ;;  %v5495_v5 = vld [vmem:[%s7764_s3 + $0x604] ss:$8 sps:$4 sm:$0xff]   ;;  %v7925_v48 = vld [vmem:[#allocation13_spill] sm:$0xff] }
 0x223   :  { %v5469_v56 = vld [vmem:[%s7764_s3 + $0x580] ss:$8 sps:$4 sm:$0xff]   ;;  %v5516_v57 = vld [vmem:[%s7764_s3 + $0x674] ss:$8 sps:$4 sm:$0xff]   ;;  %v5567_v14 = vld [vmem:[%s7764_s3 + $0x784] ss:$8 sps:$4 sm:$0xff]  }
 0x224   :  { %3019 = vmatpush1.bf16.msra.mxu1 %v5412_v41  ;;  %v7915_v41 = vpack.c.bf16 %v7913_v30, %v7914_v55  ;;  %v5496_v30 = vld [vmem:[%s7764_s3 + $0x610] ss:$8 sps:$4 sm:$0xff]   ;;  %v5501_v55 = vld [vmem:[%s7764_s3 + $0x624] ss:$8 sps:$4 sm:$0xff]   ;;  %v5517_v33 = vld [vmem:[%s7764_s3 + $0x680] ss:$8 sps:$4 sm:$0xff]  }
 0x225   :  { %3020 = vmatprep.subr.bf16.mxu1 %v5417_v36  ;;  %v7916_v36 = vld [vmem:[#allocation52_spill] sm:$0xff]  ;;  %v5522_v35 = vld [vmem:[%s7764_s3 + $0x694] ss:$8 sps:$4 sm:$0xff]  }
 0x226   :  { %2121 = vmatmul.mubr.bf16.gmra.mrb[140].mxu0 %v7903_v42  ;;  %v7917_v42 = vld [vmem:[#allocation42_spill] sm:$0xff] }
 0x227   :  { %2781 = vmatmul.mubr.bf16.gmra.mrb[12].mxu1 %v2523_v12  ;;  %v5429_v12 = vld [vmem:[%s7764_s3 + $0x4a4] ss:$8 sps:$4 sm:$0xff]   ;;  %v5559_v10 = vld [vmem:[%s7764_s3 + $0x760] ss:$8 sps:$4 sm:$0xff]   ;;  %v5564_v58 = vld [vmem:[%s7764_s3 + $0x774] ss:$8 sps:$4 sm:$0xff]  }
 0x228   :  { %3021 = vmatpush1.bf16.msra.mxu1 %v5415_v49  ;;  %3040 = vmatprep.mubr.bf16.mxu1 %v7906_v22  ;;  %v7918_v49 = vpack.c.bf16 %v7916_v36, %v7917_v42  ;;  %v5462_v22 = vld [vmem:[%s7764_s3 + $0x554] ss:$8 sps:$4 sm:$0xff]  }
 0x229   :  { %3022 = vmatprep.subr.bf16.mxu1 %v5420_v2  ;;  %v5454_v2 = vld [vmem:[%s7764_s3 + $0x530] ss:$8 sps:$4 sm:$0xff]   ;;  %v5504_v36 = vld [vmem:[%s7764_s3 + $0x634] ss:$8 sps:$4 sm:$0xff]  }
 0x22a   :  { %v7931_v42 = vld [vmem:[#allocation33_spill] sm:$0xff] }
 0x22c   :  { %3023 = vmatpush1.bf16.msra.mxu1 %v5418_v8  ;;  %v7919_v8 = vld [vmem:[#allocation51_spill] sm:$0xff] }
 0x22d   :  { %3024 = vmatprep.subr.bf16.mxu1 %v5423_v46  ;;  %v7920_v46 = vld [vmem:[#allocation41_spill] sm:$0xff] }
 0x230   :  { %3025 = vmatpush1.bf16.msra.mxu1 %v5421_v53  ;;  %v7921_v53 = vpack.c.bf16 %v7919_v8, %v7920_v46  ;;  %v5502_v8 = vld [vmem:[%s7764_s3 + $0x630] ss:$8 sps:$4 sm:$0xff]   ;;  %v5507_v46 = vld [vmem:[%s7764_s3 + $0x644] ss:$8 sps:$4 sm:$0xff]  }
 0x231   :  { %3026 = vmatprep.subr.bf16.mxu1 %v5426_v19  ;;  %v5460_v19 = vld [vmem:[%s7764_s3 + $0x550] ss:$8 sps:$4 sm:$0xff]  }
 0x234   :  { %3027 = vmatpush1.bf16.msra.mxu1 %v5424_v37  ;;  %v5465_v37 = vld [vmem:[%s7764_s3 + $0x564] ss:$8 sps:$4 sm:$0xff]  }
 0x235   :  { %3028 = vmatprep.subr.bf16.mxu1 %v5429_v12  ;;  %v5463_v12 = vld [vmem:[%s7764_s3 + $0x560] ss:$8 sps:$4 sm:$0xff]  }
 0x238   :  { %3029 = vmatpush1.bf16.msra.mxu1 %v5427_v50 }
 0x239   :  { %3030 = vmatprep.subr.bf16.mxu1 %v5432_v11  ;;  %v5466_v11 = vld [vmem:[%s7764_s3 + $0x570] ss:$8 sps:$4 sm:$0xff]  }
 0x23c   :  { %3031 = vmatpush1.bf16.msra.mxu1 %v5430_v21  ;;  %v5471_v21 = vld [vmem:[%s7764_s3 + $0x584] ss:$8 sps:$4 sm:$0xff]  }
 0x23d   :  { %3032 = vmatprep.subr.bf16.mxu1 %v5435_v32  ;;  %v5477_v32 = vld [vmem:[%s7764_s3 + $0x5a4] ss:$8 sps:$4 sm:$0xff]  }
 0x240   :  { %3033 = vmatpush1.bf16.msra.mxu1 %v5433_v34  ;;  %v5475_v34 = vld [vmem:[%s7764_s3 + $0x5a0] ss:$8 sps:$4 sm:$0xff]  }
 0x241   :  { %3034 = vmatprep.subr.bf16.mxu1 %v5438_v9  ;;  %v5480_v9 = vld [vmem:[%s7764_s3 + $0x5b4] ss:$8 sps:$4 sm:$0xff]  }
 0x244   :  { %3035 = vmatpush1.bf16.msra.mxu1 %v5436_v47  ;;  %v5478_v47 = vld [vmem:[%s7764_s3 + $0x5b0] ss:$8 sps:$4 sm:$0xff]  }
 0x245   :  { %3036 = vmatprep.subr.bf16.mxu1 %v5441_v51  ;;  %v5483_v51 = vld [vmem:[%s7764_s3 + $0x5c4] ss:$8 sps:$4 sm:$0xff]  }
 0x248   :  { %3037 = vmatpush1.bf16.msra.mxu1 %v5439_v40  ;;  %v5481_v40 = vld [vmem:[%s7764_s3 + $0x5c0] ss:$8 sps:$4 sm:$0xff]  }
 0x249   :  { %3038 = vmatprep.subr.bf16.mxu1 %v5444_v45  ;;  %v5486_v45 = vld [vmem:[%s7764_s3 + $0x5d4] ss:$8 sps:$4 sm:$0xff]  }
 0x24c   :  { %3039 = vmatpush1.bf16.msra.mxu1 %v5442_v18  ;;  %v5484_v18 = vld [vmem:[%s7764_s3 + $0x5d0] ss:$8 sps:$4 sm:$0xff]  }
 0x24d   :  { %3394 = vmatprep.subr.bf16.mxu1 %v5447_v26  ;;  %v5489_v26 = vld [vmem:[%s7764_s3 + $0x5e4] ss:$8 sps:$4 sm:$0xff]  }
 0x24f   :  { %3041 = vmatmul.mubr.bf16.vlgmr.msra.gmra.mrb[0].mxu1 %v7909_v7  ;;  %v5493_v7 = vld [vmem:[%s7764_s3 + $0x600] ss:$8 sps:$4 sm:$0xff]  }
 0x250   :  { %3050 = vmatprep.mubr.bf16.mxu1 %v7912_v1  ;;  %3395 = vmatpush1.bf16.msra.mxu1 %v5445_v39  ;;  %v5487_v39 = vld [vmem:[%s7764_s3 + $0x5e0] ss:$8 sps:$4 sm:$0xff]   ;;  %v7926_v1 = vld [vmem:[#allocation5_spill] sm:$0xff] }
 0x251   :  { %3396 = vmatprep.subr.bf16.mxu1 %v5450_v52  ;;  %v5492_v52 = vld [vmem:[%s7764_s3 + $0x5f4] ss:$8 sps:$4 sm:$0xff]  }
 0x254   :  { %3397 = vmatpush1.bf16.msra.mxu1 %v5448_v3  ;;  %v7927_v3 = vpack.c.bf16 %v7925_v48, %v7926_v1  ;;  %v7946_v1 = vld [vmem:[#allocation36_spill] sm:$0xff] }
 0x255   :  { %3398 = vmatprep.subr.bf16.mxu1 %v5453_v61  ;;  %v7928_v61 = vld [vmem:[#allocation34_spill] sm:$0xff] }
 0x257   :  { %3051 = vmatmul.mubr.bf16.gmra.mrb[4].mxu1 %v7915_v41  ;;  %v5499_v41 = vld [vmem:[%s7764_s3 + $0x620] ss:$8 sps:$4 sm:$0xff]  }
 0x258   :  { %3060 = vmatprep.mubr.bf16.mxu1 %v7918_v49  ;;  %3399 = vmatpush1.bf16.msra.mxu1 %v5451_v4  ;;  %v7929_v4 = vld [vmem:[#allocation24_spill] sm:$0xff]  ;;  %v7932_v49 = vld [vmem:[#allocation23_spill] sm:$0xff] }
 0x259   :  { %3400 = vmatprep.subr.bf16.mxu1 %v5456_v63  ;;  %v7930_v63 = vpack.c.bf16 %v7928_v61, %v7929_v4  ;;  %v5544_v4 = vld [vmem:[%s7764_s3 + $0x710] ss:$8 sps:$4 sm:$0xff]  }
 0x25c   :  { %3401 = vmatpush1.bf16.msra.mxu1 %v5454_v2  ;;  %v7933_v2 = vpack.c.bf16 %v7931_v42, %v7932_v49  ;;  %v7952_v49 = vld [vmem:[#allocation56_spill] sm:$0xff] }
 0x25d   :  { %3402 = vmatprep.subr.bf16.mxu1 %v5459_v31  ;;  %v7934_v31 = vld [vmem:[#allocation54_spill] sm:$0xff] }
 0x25f   :  { %3061 = vmatmul.mubr.bf16.gmra.mrb[8].mxu1 %v7921_v53  ;;  %v5505_v53 = vld [vmem:[%s7764_s3 + $0x640] ss:$8 sps:$4 sm:$0xff]  }
 0x260   :  { %3070 = vmatprep.mubr.bf16.mxu1 %v2814_v6  ;;  %3403 = vmatpush1.bf16.msra.mxu1 %v5457_v23  ;;  %v7923_v6 = vld [vmem:[#allocation6_spill] sm:$0xff]  ;;  %v7935_v23 = vld [vmem:[#allocation44_spill] sm:$0xff] }
 0x261   :  { %3404 = vmatprep.subr.bf16.mxu1 %v5462_v22  ;;  %v7924_v50 = vpack.c.bf16 %v7922_v20, %v7923_v6  ;;  %v7936_v22 = vpack.c.bf16 %v7934_v31, %v7935_v23  ;;  %v5508_v20 = vld [vmem:[%s7764_s3 + $0x650] ss:$8 sps:$4 sm:$0xff]   ;;  %v5513_v6 = vld [vmem:[%s7764_s3 + $0x664] ss:$8 sps:$4 sm:$0xff]  }
 0x262   :  { %v5550_v23 = vld [vmem:[%s7764_s3 + $0x730] ss:$8 sps:$4 sm:$0xff]  }
 0x264   :  { %3405 = vmatpush1.bf16.msra.mxu1 %v5460_v19  ;;  %v5510_v19 = vld [vmem:[%s7764_s3 + $0x654] ss:$8 sps:$4 sm:$0xff]  }
 0x265   :  { %3406 = vmatprep.subr.bf16.mxu1 %v5465_v37  ;;  %v7937_v37 = vld [vmem:[#allocation53_spill] sm:$0xff] }
 0x267   :  { %3071 = vmatmul.mubr.bf16.gmra.mrb[12].mxu1 %v2813_v16  ;;  %v5472_v16 = vld [vmem:[%s7764_s3 + $0x590] ss:$8 sps:$4 sm:$0xff]  }
 0x268   :  { %3407 = vmatpush1.bf16.msra.mxu1 %v5463_v12  ;;  %3426 = vmatprep.mubr.bf16.mxu1 %v7924_v50  ;;  %v7938_v12 = vld [vmem:[#allocation43_spill] sm:$0xff] }
 0x269   :  { %3408 = vmatprep.subr.bf16.mxu1 %v5468_v28  ;;  %v7939_v28 = vpack.c.bf16 %v7937_v37, %v7938_v12  ;;  %v5511_v50 = vld [vmem:[%s7764_s3 + $0x660] ss:$8 sps:$4 sm:$0xff]  }
 0x26c   :  { %3409 = vmatpush1.bf16.msra.mxu1 %v5466_v11 }
 0x26d   :  { %3410 = vmatprep.subr.bf16.mxu1 %v5471_v21  ;;  %v5514_v21 = vld [vmem:[%s7764_s3 + $0x670] ss:$8 sps:$4 sm:$0xff]  }
 0x270   :  { %3411 = vmatpush1.bf16.msra.mxu1 %v5469_v56  ;;  %v5519_v56 = vld [vmem:[%s7764_s3 + $0x684] ss:$8 sps:$4 sm:$0xff]  }
 0x271   :  { %3412 = vmatprep.subr.bf16.mxu1 %v5474_v59  ;;  %v5525_v59 = vld [vmem:[%s7764_s3 + $0x6a4] ss:$8 sps:$4 sm:$0xff]  }
 0x274   :  { %3413 = vmatpush1.bf16.msra.mxu1 %v5472_v16  ;;  %v5523_v16 = vld [vmem:[%s7764_s3 + $0x6a0] ss:$8 sps:$4 sm:$0xff]  }
 0x275   :  { %3414 = vmatprep.subr.bf16.mxu1 %v5477_v32  ;;  %v5528_v32 = vld [vmem:[%s7764_s3 + $0x6b4] ss:$8 sps:$4 sm:$0xff]  }
 0x278   :  { %3415 = vmatpush1.bf16.msra.mxu1 %v5475_v34  ;;  %v5526_v34 = vld [vmem:[%s7764_s3 + $0x6b0] ss:$8 sps:$4 sm:$0xff]  }
 0x279   :  { %3416 = vmatprep.subr.bf16.mxu1 %v5480_v9  ;;  %v5531_v9 = vld [vmem:[%s7764_s3 + $0x6c4] ss:$8 sps:$4 sm:$0xff]  }
 0x27c   :  { %3417 = vmatpush1.bf16.msra.mxu1 %v5478_v47  ;;  %v5529_v47 = vld [vmem:[%s7764_s3 + $0x6c0] ss:$8 sps:$4 sm:$0xff]  }
 0x27d   :  { %3418 = vmatprep.subr.bf16.mxu1 %v5483_v51  ;;  %v5534_v51 = vld [vmem:[%s7764_s3 + $0x6d4] ss:$8 sps:$4 sm:$0xff]  }
 0x280   :  { %3419 = vmatpush1.bf16.msra.mxu1 %v5481_v40  ;;  %v5532_v40 = vld [vmem:[%s7764_s3 + $0x6d0] ss:$8 sps:$4 sm:$0xff]  }
 0x281   :  { %3420 = vmatprep.subr.bf16.mxu1 %v5486_v45  ;;  %v5537_v45 = vld [vmem:[%s7764_s3 + $0x6e4] ss:$8 sps:$4 sm:$0xff]  }
 0x284   :  { %3421 = vmatpush1.bf16.msra.mxu1 %v5484_v18  ;;  %v5535_v18 = vld [vmem:[%s7764_s3 + $0x6e0] ss:$8 sps:$4 sm:$0xff]  }
 0x285   :  { %3422 = vmatprep.subr.bf16.mxu1 %v5489_v26  ;;  %v5540_v26 = vld [vmem:[%s7764_s3 + $0x6f4] ss:$8 sps:$4 sm:$0xff]  }
 0x288   :  { %3423 = vmatpush1.bf16.msra.mxu1 %v5487_v39  ;;  %v5538_v39 = vld [vmem:[%s7764_s3 + $0x6f0] ss:$8 sps:$4 sm:$0xff]  }
 0x289   :  { %3424 = vmatprep.subr.bf16.mxu1 %v5492_v52  ;;  %v5543_v52 = vld [vmem:[%s7764_s3 + $0x704] ss:$8 sps:$4 sm:$0xff]  }
 0x28c   :  { %3425 = vmatpush1.bf16.msra.mxu1 %v5490_v0  ;;  %v5541_v0 = vld [vmem:[%s7764_s3 + $0x700] ss:$8 sps:$4 sm:$0xff]  }
 0x28d   :  { %3684 = vmatprep.subr.bf16.mxu1 %v5495_v5  ;;  %v5546_v5 = vld [vmem:[%s7764_s3 + $0x714] ss:$8 sps:$4 sm:$0xff]  }
 0x28f   :  { %3427 = vmatmul.mubr.bf16.vlgmr.msra.gmra.mrb[0].mxu1 %v7927_v3  ;;  %v7947_v3 = vld [vmem:[#allocation26_spill] sm:$0xff] }
 0x290   :  { %3436 = vmatprep.mubr.bf16.mxu1 %v7930_v63  ;;  %3685 = vmatpush1.bf16.msra.mxu1 %v5493_v7  ;;  %v7943_v7 = vld [vmem:[#allocation15_spill] sm:$0xff]  ;;  %v7948_v61 = vpack.c.bf16 %v7946_v1, %v7947_v3  ;;  %v5588_v1 = vld [vmem:[%s7764_s3 + $0x7f4] ss:$8 sps:$4 sm:$0xff]   ;;  %v5586_v3 = vld [vmem:[%s7764_s3 + $0x7f0] ss:$8 sps:$4 sm:$0xff]  }
 0x291   :  { %3686 = vmatprep.subr.bf16.mxu1 %v5498_v24  ;;  %v7944_v24 = vld [vmem:[#allocation7_spill] sm:$0xff] }
 0x292   :  { %v7945_v48 = vpack.c.bf16 %v7943_v7, %v7944_v24  ;;  %v5549_v63 = vld [vmem:[%s7764_s3 + $0x724] ss:$8 sps:$4 sm:$0xff]   ;;  %v5580_v7 = vld [vmem:[%s7764_s3 + $0x7d0] ss:$8 sps:$4 sm:$0xff]  }
 0x293   :  { %v5585_v24 = vld [vmem:[%s7764_s3 + $0x7e4] ss:$8 sps:$4 sm:$0xff]  }
 0x294   :  { %3687 = vmatpush1.bf16.msra.mxu1 %v5496_v30  ;;  %v5547_v30 = vld [vmem:[%s7764_s3 + $0x720] ss:$8 sps:$4 sm:$0xff]  }
 0x295   :  { %3688 = vmatprep.subr.bf16.mxu1 %v5501_v55  ;;  %v5552_v55 = vld [vmem:[%s7764_s3 + $0x734] ss:$8 sps:$4 sm:$0xff]  }
 0x297   :  { %3437 = vmatmul.mubr.bf16.gmra.mrb[4].mxu1 %v7933_v2  ;;  %v7953_v2 = vld [vmem:[#allocation46_spill] sm:$0xff] }
 0x298   :  { %3446 = vmatprep.mubr.bf16.mxu1 %v7936_v22  ;;  %3689 = vmatpush1.bf16.msra.mxu1 %v5499_v41  ;;  %v7949_v41 = vld [vmem:[#allocation35_spill] sm:$0xff]  ;;  %v7954_v31 = vpack.c.bf16 %v7952_v49, %v7953_v2  ;;  %v7970_v2 = vld [vmem:[#allocation58_spill] sm:$0xff] }
 0x299   :  { %3690 = vmatprep.subr.bf16.mxu1 %v5504_v36  ;;  %v7950_v36 = vld [vmem:[#allocation25_spill] sm:$0xff]  ;;  %v5555_v22 = vld [vmem:[%s7764_s3 + $0x744] ss:$8 sps:$4 sm:$0xff]  }
 0x29a   :  { %v7951_v42 = vpack.c.bf16 %v7949_v41, %v7950_v36  ;;  %v7967_v36 = vld [vmem:[#allocation37_spill] sm:$0xff] }
 0x29c   :  { %3691 = vmatpush1.bf16.msra.mxu1 %v5502_v8  ;;  %v5553_v8 = vld [vmem:[%s7764_s3 + $0x740] ss:$8 sps:$4 sm:$0xff]  }
 0x29d   :  { %3692 = vmatprep.subr.bf16.mxu1 %v5507_v46  ;;  %v5558_v46 = vld [vmem:[%s7764_s3 + $0x754] ss:$8 sps:$4 sm:$0xff]  }
 0x29f   :  { %3447 = vmatmul.mubr.bf16.gmra.mrb[8].mxu1 %v7939_v28 }
 0x2a0   :  { %3456 = vmatprep.mubr.bf16.mxu1 %v3200_v54  ;;  %3693 = vmatpush1.bf16.msra.mxu1 %v5505_v53  ;;  %v7941_v54 = vld [vmem:[#allocation8_spill] sm:$0xff]  ;;  %v7955_v53 = vld [vmem:[#allocation55_spill] sm:$0xff] }
 0x2a1   :  { %3694 = vmatprep.subr.bf16.mxu1 %v5510_v19  ;;  %v7942_v11 = vpack.c.bf16 %v7940_v27, %v7941_v54  ;;  %v7956_v19 = vld [vmem:[#allocation45_spill] sm:$0xff]  ;;  %v7958_v27 = vld [vmem:[#allocation18_spill] sm:$0xff] }
 0x2a2   :  { %v7957_v37 = vpack.c.bf16 %v7955_v53, %v7956_v19  ;;  %v7959_v54 = vld [vmem:[#allocation10_spill] sm:$0xff]  ;;  %v4161_v53 = vlaneseq }
 0x2a4   :  { %3695 = vmatpush1.bf16.msra.mxu1 %v5508_v20  ;;  %v5556_v20 = vld [vmem:[%s7764_s3 + $0x750] ss:$8 sps:$4 sm:$0xff]   ;;  %v4162_v19 = vshrl.u32 %v4161_v53, 7 }
 0x2a5   :  { %3696 = vmatprep.subr.bf16.mxu1 %v5513_v6 }
 0x2a7   :  { %3457 = vmatmul.mubr.bf16.gmra.mrb[12].mxu1 %v3199_v29  ;;  %v5520_v29 = vld [vmem:[%s7764_s3 + $0x690] ss:$8 sps:$4 sm:$0xff]  }
 0x2a8   :  { %3697 = vmatpush1.bf16.msra.mxu1 %v5511_v50  ;;  %3716 = vmatprep.mubr.bf16.mxu1 %v7942_v11  ;;  %v5561_v50 = vld [vmem:[%s7764_s3 + $0x764] ss:$8 sps:$4 sm:$0xff]   ;;  %v7960_v11 = vpack.c.bf16 %v7958_v27, %v7959_v54 }
 0x2a9   :  { %3698 = vmatprep.subr.bf16.mxu1 %v5516_v57 }
 0x2ac   :  { %3699 = vmatpush1.bf16.msra.mxu1 %v5514_v21 }
 0x2ad   :  { %3700 = vmatprep.subr.bf16.mxu1 %v5519_v56  ;;  %v5562_v56 = vld [vmem:[%s7764_s3 + $0x770] ss:$8 sps:$4 sm:$0xff]  }
 0x2b0   :  { %3701 = vmatpush1.bf16.msra.mxu1 %v5517_v33 }
 0x2b1   :  { %3702 = vmatprep.subr.bf16.mxu1 %v5522_v35  ;;  %v5570_v35 = vld [vmem:[%s7764_s3 + $0x794] ss:$8 sps:$4 sm:$0xff]  }
 0x2b4   :  { %3703 = vmatpush1.bf16.msra.mxu1 %v5520_v29 }
 0x2b5   :  { %3704 = vmatprep.subr.bf16.mxu1 %v5525_v59 }
 0x2b8   :  { %3705 = vmatpush1.bf16.msra.mxu1 %v5523_v16  ;;  %v5568_v16 = vld [vmem:[%s7764_s3 + $0x790] ss:$8 sps:$4 sm:$0xff]  }
 0x2b9   :  { %3706 = vmatprep.subr.bf16.mxu1 %v5528_v32 }
 0x2bc   :  { %3707 = vmatpush1.bf16.msra.mxu1 %v5526_v34  ;;  %v5573_v34 = vld [vmem:[%s7764_s3 + $0x7a4] ss:$8 sps:$4 sm:$0xff]  }
 0x2bd   :  { %3708 = vmatprep.subr.bf16.mxu1 %v5531_v9 }
 0x2c0   :  { %3709 = vmatpush1.bf16.msra.mxu1 %v5529_v47  ;;  %v5571_v47 = vld [vmem:[%s7764_s3 + $0x7a0] ss:$8 sps:$4 sm:$0xff]  }
 0x2c1   :  { %3710 = vmatprep.subr.bf16.mxu1 %v5534_v51  ;;  %v5576_v51 = vld [vmem:[%s7764_s3 + $0x7b4] ss:$8 sps:$4 sm:$0xff]  }
 0x2c4   :  { %3711 = vmatpush1.bf16.msra.mxu1 %v5532_v40 }
 0x2c5   :  { %3712 = vmatprep.subr.bf16.mxu1 %v5537_v45 }
 0x2c8   :  { %3713 = vmatpush1.bf16.msra.mxu1 %v5535_v18  ;;  %v5574_v18 = vld [vmem:[%s7764_s3 + $0x7b0] ss:$8 sps:$4 sm:$0xff]  }
 0x2c9   :  { %3714 = vmatprep.subr.bf16.mxu1 %v5540_v26 }
 0x2cc   :  { %3715 = vmatpush1.bf16.msra.mxu1 %v5538_v39  ;;  %v5579_v39 = vld [vmem:[%s7764_s3 + $0x7c4] ss:$8 sps:$4 sm:$0xff]  }
 0x2cd   :  { %4070 = vmatprep.subr.bf16.mxu1 %v5543_v52 }
 0x2cf   :  { %3717 = vmatmul.mubr.bf16.vlgmr.msra.gmra.mrb[0].mxu1 %v7945_v48  ;;  %v5583_v48 = vld [vmem:[%s7764_s3 + $0x7e0] ss:$8 sps:$4 sm:$0xff]  }
 0x2d0   :  { %3726 = vmatprep.mubr.bf16.mxu1 %v7948_v61  ;;  %4071 = vmatpush1.bf16.msra.mxu1 %v5541_v0  ;;  %v5577_v0 = vld [vmem:[%s7764_s3 + $0x7c0] ss:$8 sps:$4 sm:$0xff]   ;;  %v7961_v61 = vld [vmem:[#allocation17_spill] sm:$0xff] }
 0x2d1   :  { %4072 = vmatprep.subr.bf16.mxu1 %v5546_v5  ;;  %v5582_v5 = vld [vmem:[%s7764_s3 + $0x7d4] ss:$8 sps:$4 sm:$0xff]  }
 0x2d4   :  { %4073 = vmatpush1.bf16.msra.mxu1 %v5544_v4  ;;  %v7962_v4 = vld [vmem:[#allocation9_spill] sm:$0xff] }
 0x2d5   :  { %4074 = vmatprep.subr.bf16.mxu1 %v5549_v63  ;;  %v7963_v63 = vpack.c.bf16 %v7961_v61, %v7962_v4 }
 0x2d7   :  { %3727 = vmatmul.mubr.bf16.gmra.mrb[4].mxu1 %v7951_v42  ;;  %v7968_v42 = vld [vmem:[#allocation27_spill] sm:$0xff] }
 0x2d8   :  { %3736 = vmatprep.mubr.bf16.mxu1 %v7954_v31  ;;  %4075 = vmatpush1.bf16.msra.mxu1 %v5547_v30  ;;  %v7964_v30 = vld [vmem:[#allocation38_spill] sm:$0xff]  ;;  %v7969_v49 = vpack.c.bf16 %v7967_v36, %v7968_v42  ;;  %v7971_v31 = vld [vmem:[#allocation48_spill] sm:$0xff] }
 0x2d9   :  { %4076 = vmatprep.subr.bf16.mxu1 %v5552_v55  ;;  %v7965_v55 = vld [vmem:[#allocation28_spill] sm:$0xff] }
 0x2da   :  { %v7966_v41 = vpack.c.bf16 %v7964_v30, %v7965_v55 }
 0x2dc   :  { %4077 = vmatpush1.bf16.msra.mxu1 %v5550_v23  ;;  %v7972_v23 = vpack.c.bf16 %v7970_v2, %v7971_v31 }
 0x2dd   :  { %4078 = vmatprep.subr.bf16.mxu1 %v5555_v22  ;;  %v7973_v22 = vld [vmem:[#allocation57_spill] sm:$0xff] }
 0x2df   :  { %3737 = vmatmul.mubr.bf16.gmra.mrb[8].mxu1 %v7957_v37  ;;  %v4302_v37 = vand.u32 127, %v4161_v53 }
 0x2e0   :  { %3746 = vmatprep.mubr.bf16.mxu1 %v3490_v43  ;;  %4079 = vmatpush1.bf16.msra.mxu1 %v5553_v8  ;;  %v7974_v8 = vld [vmem:[#allocation47_spill] sm:$0xff] }
 0x2e1   :  { %v7508_v12 = vpop.f32.mrb[128].mxu0  ;;  %4080 = vmatprep.subr.bf16.mxu1 %v5558_v46  ;;  %v7975_v46 = vpack.c.bf16 %v7973_v22, %v7974_v8 }
 0x2e2   :  { %v7513_v28 = vpop.f32.mrb[129].mxu0 }
 0x2e3   :  { %v7518_v6 = vpop.f32.mrb[130].mxu0 }
 0x2e4   :  { %v7523_v57 = vpop.f32.mrb[131].mxu0  ;;  %4081 = vmatpush1.bf16.msra.mxu1 %v5556_v20  ;;  %v7633_v20 = vsub.s32 %v4302_v37, %v4162_v19 }
 0x2e5   :  { %4082 = vmatprep.subr.bf16.mxu1 %v5561_v50  ;;  %v4163_v50 = vsub.s32 0, %v4162_v19 }
 0x2e7   :  { %3747 = vmatmul.mubr.bf16.gmra.mrb[12].mxu1 %v3489_v38  ;;  %v5565_v38 = vld [vmem:[%s7764_s3 + $0x780] ss:$8 sps:$4 sm:$0xff]  }
 0x2e8   :  { %4083 = vmatpush1.bf16.msra.mxu1 %v5559_v10  ;;  %4102 = vmatprep.mubr.bf16.mxu1 %v7960_v11  ;;  %v4159_v10 = vld [vmem:[%s7766_s4] sm:$0x3] }
 0x2e9   :  { %v7534_v43 = vpop.f32.mrb[132].mxu0  ;;  %4084 = vmatprep.subr.bf16.mxu1 %v5564_v58  ;;  %v4167_v58 = vsub.s32 1, %v4162_v19  ;;  %v7638_v27 = vrot.slane %v4159_v10, %v4163_v50 }
 0x2ea   :  { %v7539_v21 = vpop.f32.mrb[133].mxu0 }
 0x2eb   :  { %v7544_v33 = vpop.f32.mrb[134].mxu0  ;;  %v7640_v44 = vrot.slane %v4159_v10, %v4167_v58 }
 0x2ec   :  { %v7549_v13 = vpop.f32.mrb[135].mxu0  ;;  %4085 = vmatpush1.bf16.msra.mxu1 %v5562_v56 }
 0x2ed   :  { %4086 = vmatprep.subr.bf16.mxu1 %v5567_v14 }
 0x2f0   :  { %4087 = vmatpush1.bf16.msra.mxu1 %v5565_v38 }
 0x2f1   :  { %v7557_v29 = vpop.f32.mrb[136].mxu0  ;;  %4088 = vmatprep.subr.bf16.mxu1 %v5570_v35 }
 0x2f2   :  { %v7559_v59 = vpop.f32.mrb[137].mxu0 }
 0x2f3   :  { %v7564_v32 = vpop.f32.mrb[138].mxu0 }
 0x2f4   :  { %v7569_v9 = vpop.f32.mrb[139].mxu0  ;;  %4089 = vmatpush1.bf16.msra.mxu1 %v5568_v16 }
 0x2f5   :  { %4090 = vmatprep.subr.bf16.mxu1 %v5573_v34 }
 0x2f8   :  { %4091 = vmatpush1.bf16.msra.mxu1 %v5571_v47 }
 0x2f9   :  { %v7577_v40 = vpop.f32.mrb[140].mxu0  ;;  %4092 = vmatprep.subr.bf16.mxu1 %v5576_v51 }
 0x2fa   :  { %v7579_v45 = vpop.f32.mrb[141].mxu0 }
 0x2fb   :  { %v7584_v26 = vpop.f32.mrb[142].mxu0 }
 0x2fc   :  { %v7589_v52 = vpop.f32.mrb[143].mxu0  ;;  %4093 = vmatpush1.bf16.msra.mxu1 %v5574_v18 }
 0x2fd   :  { %4094 = vmatprep.subr.bf16.mxu1 %v5579_v39 }
 0x300   :  { %4095 = vmatpush1.bf16.msra.mxu1 %v5577_v0 }
 0x301   :  { %4096 = vmatprep.subr.bf16.mxu1 %v5582_v5 }
 0x304   :  { %4097 = vmatpush1.bf16.msra.mxu1 %v5580_v7 }
 0x305   :  { %4098 = vmatprep.subr.bf16.mxu1 %v5585_v24 }
 0x308   :  { %4099 = vmatpush1.bf16.msra.mxu1 %v5583_v48 }
 0x309   :  { %4100 = vmatprep.subr.bf16.mxu1 %v5588_v1 }
 0x30c   :  { %4101 = vmatpush1.bf16.msra.mxu1 %v5586_v3 }
 0x30f   :  { %4103 = vmatmul.mubr.bf16.vlgmr.msra.gmra.mrb[0].mxu1 %v7963_v63 }
 0x310   :  { %4112 = vmatprep.mubr.bf16.mxu1 %v7966_v41 }
 0x317   :  { %4113 = vmatmul.mubr.bf16.gmra.mrb[4].mxu1 %v7969_v49 }
 0x318   :  { %4122 = vmatprep.mubr.bf16.mxu1 %v7972_v23 }
 0x31f   :  { %4123 = vmatmul.mubr.bf16.gmra.mrb[8].mxu1 %v7975_v46 }
 0x320   :  { %4132 = vmatprep.mubr.bf16.mxu1 %v3876_v15 }
 0x327   :  { %4133 = vmatmul.mubr.bf16.gmra.mrb[12].mxu1 %v3875_v25 }
 0x3e2   :  { %v4104_v54 = vpop.f32.mrb[0].mxu1 }
 0x3e3   :  { %v4949_v62 = vadd.f32 %v4104_v54, %v7508_v12  ;;  %v4106_v60 = vpop.f32.mrb[1].mxu1  ;;  %v7652_v12 = vld [vmem:[%s7767_s5] sm:$0xff] }
 0x3e4   :  { %v4950_v17 = vadd.f32 %v4106_v60, %v7513_v28  ;;  %v4108_v25 = vpop.f32.mrb[2].mxu1 }
 0x3e5   :  { %v4171_v15 = vadd.f32 %v4949_v62, %v7638_v27  ;;  %v4951_v11 = vadd.f32 %v4108_v25, %v7518_v6  ;;  %v4110_v56 = vpop.f32.mrb[3].mxu1  ;;  %v7658_v6 = vld [vmem:[%s7767_s5 + $0x8] sm:$0xff] }
 0x3e6   :  { %v4172_v14 = vadd.f32 %v4950_v17, %v7640_v44  ;;  %v4952_v38 = vadd.f32 %v4110_v56, %v7523_v57 }
 0x3e7   :  { %v4203_v35 = vmul.f32 0.2, %v4171_v15  ;;  %v4173_v16 = vadd.f32 %v4951_v11, %v7638_v27  ;;  %vm4187_vm4 = vcmp.gt.f32.partialorder %v4171_v15, 0.0 }
 0x3e8   :  { %v4204_v28 = vmul.f32 0.2, %v4172_v14  ;;  %v4174_v34 = vadd.f32 %v4952_v38, %v7640_v44  ;;  %vm4188_vm9 = vcmp.gt.f32.partialorder %v4172_v14, 0.0 }
 0x3e9   :  { %v4205_v47 = vmul.f32 0.2, %v4173_v16  ;;  %v4219_v57 = vsel %vm4187_vm4, %v4171_v15, %v4203_v35  ;;  %vm4189_vm10 = vcmp.gt.f32.partialorder %v4173_v16, 0.0  ;;  %vm4335_vm4 = vcmask 1041409  }
 0x3ea   :  { %v4206_v51 = vmul.f32 0.2, %v4174_v34  ;;  %v4114_v18 = vpop.f32.mrb[4].mxu1  ;;  %v4220_v39 = vsel %vm4188_vm9, %v4172_v14, %v4204_v28  ;;  %4235 = vst [vmem:[%s7768_s7] sm:$0xff] %v4219_v57  ;;  %v4253_v0 = vmul.f32 %v7652_v12, %v4219_v57  ;;  %vm4190_vm11 = vcmp.gt.f32.partialorder %v4174_v34, 0.0 }
 0x3eb   :  { %v4953_v5 = vadd.f32 %v4114_v18, %v7534_v43  ;;  %v4116_v7 = vpop.f32.mrb[5].mxu1  ;;  %v4254_v24 = vmul.f32 %v7658_v6, %v4220_v39  ;;  %4236 = vst [vmem:[%s7768_s7 + $0x8] sm:$0xff] %v4220_v39  ;;  %v4221_v48 = vsel %vm4189_vm10, %v4173_v16, %v4205_v47  ;;  %vm4337_vm9 = vcmask 1042434  }
 0x3ec   :  { %v4954_v1 = vadd.f32 %v4116_v7, %v7539_v21  ;;  %v4118_v3 = vpop.f32.mrb[6].mxu1  ;;  %v4222_v61 = vsel %vm4190_vm11, %v4174_v34, %v4206_v51  ;;  %4237 = vst [vmem:[%s7768_s7 + $0x10] sm:$0xff] %v4221_v48  ;;  %v4255_v4 = vmul.f32 %v7652_v12, %v4221_v48  ;;  %vm4339_vm10 = vcmask 1043459  }
 0x3ed   :  { %v4175_v43 = vadd.f32 %v4953_v5, %v7638_v27  ;;  %v4955_v63 = vadd.f32 %v4118_v3, %v7544_v33  ;;  %v4120_v30 = vpop.f32.mrb[7].mxu1  ;;  %v4269_v55 = vadd.f32 %v4254_v24, %v4253_v0  ;;  %v4256_v41 = vmul.f32 %v7658_v6, %v4222_v61  ;;  %4238 = vst [vmem:[%s7768_s7 + $0x18] sm:$0xff] %v4222_v61 }
 0x3ee   :  { %v4176_v21 = vadd.f32 %v4954_v1, %v7640_v44  ;;  %v4956_v36 = vadd.f32 %v4120_v30, %v7549_v13  ;;  %vm4341_vm11 = vcmask 1044484  }
 0x3ef   :  { %v4207_v42 = vmul.f32 0.2, %v4175_v43  ;;  %v4177_v49 = vadd.f32 %v4955_v63, %v7638_v27  ;;  %4270 = vadd.xlane.f32.xlu0 %v4269_v55  ;;  %v4272_v2 = vadd.f32 %v4256_v41, %v4255_v4  ;;  %vm4191_vm12 = vcmp.gt.f32.partialorder %v4175_v43, 0.0 }
 0x3f0   :  { %v4208_v31 = vmul.f32 0.2, %v4176_v21  ;;  %v4178_v33 = vadd.f32 %v4956_v36, %v7640_v44  ;;  %vm4192_vm13 = vcmp.gt.f32.partialorder %v4176_v21, 0.0 }
 0x3f1   :  { %v4209_v23 = vmul.f32 0.2, %v4177_v49  ;;  %v4223_v22 = vsel %vm4191_vm12, %v4175_v43, %v4207_v42  ;;  %vm4193_vm14 = vcmp.gt.f32.partialorder %v4177_v49, 0.0  ;;  %vm4343_vm12 = vcmask 1045509  }
 0x3f2   :  { %v4210_v8 = vmul.f32 0.2, %v4178_v33  ;;  %v4124_v46 = vpop.f32.mrb[8].mxu1  ;;  %v4224_v53 = vsel %vm4192_vm13, %v4176_v21, %v4208_v31  ;;  %4239 = vst [vmem:[%s7768_s7 + $0x20] sm:$0xff] %v4223_v22  ;;  %v4257_v13 = vmul.f32 %v7652_v12, %v4223_v22  ;;  %vm4194_vm15 = vcmp.gt.f32.partialorder %v4178_v33, 0.0 }
 0x3f3   :  { %v4957_v19 = vadd.f32 %v4124_v46, %v7557_v29  ;;  %v4126_v37 = vpop.f32.mrb[9].mxu1  ;;  %4273 = vadd.xlane.f32.xlu0 %v4272_v2  ;;  %v4258_v50 = vmul.f32 %v7658_v6, %v4224_v53  ;;  %4240 = vst [vmem:[%s7768_s7 + $0x28] sm:$0xff] %v4224_v53  ;;  %v4225_v10 = vsel %vm4193_vm14, %v4177_v49, %v4209_v23  ;;  %v14_v46 = vstv %s7769_s6 }
 0x3f4   :  { %v4958_v58 = vadd.f32 %v4126_v37, %v7559_v59  ;;  %v4128_v54 = vpop.f32.mrb[10].mxu1  ;;  %v4226_v62 = vsel %vm4194_vm15, %v4178_v33, %v4210_v8  ;;  %4241 = vst [vmem:[%s7768_s7 + $0x30] sm:$0xff] %v4225_v10  ;;  %v4259_v60 = vmul.f32 %v7652_v12, %v4225_v10  ;;  %15 = vst [vmem:[#allocation2] sm:$0x1] %v14_v46  ;;  %vm4345_vm13 = vcmask 1046534  }
 0x3f5   :  { %v4179_v29 = vadd.f32 %v4957_v19, %v7638_v27  ;;  %v4959_v17 = vadd.f32 %v4128_v54, %v7564_v32  ;;  %v4130_v25 = vpop.f32.mrb[11].mxu1  ;;  %v4275_v15 = vadd.f32 %v4258_v50, %v4257_v13  ;;  %v4260_v11 = vmul.f32 %v7658_v6, %v4226_v62  ;;  %4242 = vst [vmem:[%s7768_s7 + $0x38] sm:$0xff] %v4226_v62 }
 0x3f6   :  { %v4180_v59 = vadd.f32 %v4958_v58, %v7640_v44  ;;  %v4960_v56 = vadd.f32 %v4130_v25, %v7569_v9  ;;  %vm4347_vm14 = vcmask 1047559   ;;  %vm4350_vm15 = vcmask 64512  }
 0x3f7   :  { %v4211_v14 = vmul.f32 0.2, %v4179_v29  ;;  %v4181_v38 = vadd.f32 %v4959_v17, %v7638_v27  ;;  %4276 = vadd.xlane.f32.xlu1 %v4275_v15  ;;  %v4278_v35 = vadd.f32 %v4260_v11, %v4259_v60  ;;  %vm4195_vm0 = vcmp.gt.f32.partialorder %v4179_v29, 0.0 }
 0x3f8   :  { %v4212_v16 = vmul.f32 0.2, %v4180_v59  ;;  %v4182_v32 = vadd.f32 %v4960_v56, %v7640_v44  ;;  %vm4196_vm1 = vcmp.gt.f32.partialorder %v4180_v59, 0.0 }
 0x3f9   :  { %v4213_v28 = vmul.f32 0.2, %v4181_v38  ;;  %v4227_v34 = vsel %vm4195_vm0, %v4179_v29, %v4211_v14  ;;  %vm4197_vm2 = vcmp.gt.f32.partialorder %v4181_v38, 0.0  ;;  %vm4362_vm0 = vcmask 7168  }
 0x3fa   :  { %v4214_v47 = vmul.f32 0.2, %v4182_v32  ;;  %v4134_v57 = vpop.f32.mrb[12].mxu1  ;;  %v4228_v51 = vsel %vm4196_vm1, %v4180_v59, %v4212_v16  ;;  %4243 = vst [vmem:[%s7768_s7 + $0x40] sm:$0xff] %v4227_v34  ;;  %v4261_v9 = vmul.f32 %v7652_v12, %v4227_v34  ;;  %vm4198_vm3 = vcmp.gt.f32.partialorder %v4182_v32, 0.0 }
 0x3fb   :  { %v4961_v18 = vadd.f32 %v4134_v57, %v7577_v40  ;;  %4279 = vadd.xlane.f32.xlu1 %v4278_v35  ;;  %v4136_v39 = vpop.f32.mrb[13].mxu1  ;;  %v4262_v0 = vmul.f32 %v7658_v6, %v4228_v51  ;;  %4244 = vst [vmem:[%s7768_s7 + $0x48] sm:$0xff] %v4228_v51  ;;  %v4229_v5 = vsel %vm4197_vm2, %v4181_v38, %v4213_v28  ;;  %v4948_v28 = vld [vmem:[#allocation2] ss:$0 sm:$0xff] }
 0x3fc   :  { %v4962_v7 = vadd.f32 %v4136_v39, %v7579_v45  ;;  %v4138_v24 = vpop.f32.mrb[14].mxu1  ;;  %v4230_v48 = vsel %vm4198_vm3, %v4182_v32, %v4214_v47  ;;  %4245 = vst [vmem:[%s7768_s7 + $0x50] sm:$0xff] %v4229_v5  ;;  %v4263_v1 = vmul.f32 %v7652_v12, %v4229_v5 }
 0x3fd   :  { %v4183_v40 = vadd.f32 %v4961_v18, %v7638_v27  ;;  %v4963_v3 = vadd.f32 %v4138_v24, %v7584_v26  ;;  %v4140_v61 = vpop.f32.mrb[15].mxu1  ;;  %v4281_v4 = vadd.f32 %v4262_v0, %v4261_v9  ;;  %v4264_v43 = vmul.f32 %v7658_v6, %v4230_v48  ;;  %4246 = vst [vmem:[%s7768_s7 + $0x58] sm:$0xff] %v4230_v48 }
 0x3fe   :  { %v4184_v45 = vadd.f32 %v4962_v7, %v7640_v44  ;;  %v4964_v63 = vadd.f32 %v4140_v61, %v7589_v52 }
 0x3ff   :  { %v4215_v30 = vmul.f32 0.2, %v4183_v40  ;;  %v4185_v55 = vadd.f32 %v4963_v3, %v7638_v27  ;;  %4282 = vadd.xlane.f32.xlu0 %v4281_v4  ;;  %v4284_v41 = vadd.f32 %v4264_v43, %v4263_v1  ;;  %vm4199_vm5 = vcmp.gt.f32.partialorder %v4183_v40, 0.0 }
 0x400   :  { %v4216_v21 = vmul.f32 0.2, %v4184_v45  ;;  %v4186_v26 = vadd.f32 %v4964_v63, %v7640_v44  ;;  %vm4200_vm6 = vcmp.gt.f32.partialorder %v4184_v45, 0.0 }
 0x401   :  { %v4217_v36 = vmul.f32 0.2, %v4185_v55  ;;  %4285 = vadd.xlane.f32.xlu1 %v4284_v41  ;;  %v4231_v42 = vsel %vm4199_vm5, %v4183_v40, %v4215_v30  ;;  %vm4201_vm7 = vcmp.gt.f32.partialorder %v4185_v55, 0.0 }
 0x402   :  { %v4218_v49 = vmul.f32 0.2, %v4186_v26  ;;  %v4232_v2 = vsel %vm4200_vm6, %v4184_v45, %v4216_v21  ;;  %4247 = vst [vmem:[%s7768_s7 + $0x60] sm:$0xff] %v4231_v42  ;;  %v4265_v52 = vmul.f32 %v7652_v12, %v4231_v42  ;;  %vm4202_vm8 = vcmp.gt.f32.partialorder %v4186_v26, 0.0 }
 0x403   :  { %v4266_v27 = vmul.f32 %v7658_v6, %v4232_v2  ;;  %4248 = vst [vmem:[%s7768_s7 + $0x68] sm:$0xff] %v4232_v2  ;;  %v4233_v44 = vsel %vm4201_vm7, %v4185_v55, %v4217_v36 }
 0x404   :  { %v4234_v31 = vsel %vm4202_vm8, %v4186_v26, %v4218_v49  ;;  %4249 = vst [vmem:[%s7768_s7 + $0x70] sm:$0xff] %v4233_v44  ;;  %v4267_v33 = vmul.f32 %v7652_v12, %v4233_v44 }
 0x405   :  { %v4287_v23 = vadd.f32 %v4266_v27, %v4265_v52  ;;  %v4268_v22 = vmul.f32 %v7658_v6, %v4234_v31  ;;  %4250 = vst [vmem:[%s7768_s7 + $0x78] sm:$0xff] %v4234_v31 }
 0x407   :  { %4288 = vadd.xlane.f32.xlu0 %v4287_v23  ;;  %v4290_v8 = vadd.f32 %v4268_v22, %v4267_v33 }
 0x409   :  { %4291 = vadd.xlane.f32.xlu1 %v4290_v8 }
 0x47c   :  { %v4271_v53 = vpop.xlane.xlu0 %4270 }
 0x47d   :  { %v4306_v10 = vrot.slane %v4271_v53, %v7633_v20 }
 0x480   :  { %v4274_v19 = vpop.xlane.xlu0 %4273 }
 0x481   :  { %v4310_v12 = vrot.slane %v4274_v19, %v7633_v20 }
 0x483   :  { %v4336_v60 = vsel %vm4335_vm4, %v4310_v12, %v4306_v10 }
 0x484   :  { %v4277_v13 = vpop.xlane.xlu1 %4276 }
 0x485   :  { %v4314_v6 = vrot.slane %v4277_v13, %v7633_v20 }
 0x487   :  { %v4338_v29 = vsel %vm4337_vm9, %v4314_v6, %v4336_v60 }
 0x488   :  { %v4280_v37 = vpop.xlane.xlu1 %4279 }
 0x489   :  { %v4318_v58 = vrot.slane %v4280_v37, %v7633_v20 }
 0x48b   :  { %v4340_v17 = vsel %vm4339_vm10, %v4318_v58, %v4338_v29 }
 0x48c   :  { %v4283_v50 = vpop.xlane.xlu0 %4282 }
 0x48d   :  { %v4322_v54 = vrot.slane %v4283_v50, %v7633_v20 }
 0x48e   :  { %v4286_v62 = vpop.xlane.xlu1 %4285 }
 0x48f   :  { %v4326_v25 = vrot.slane %v4286_v62, %v7633_v20  ;;  %v4342_v15 = vsel %vm4341_vm11, %v4322_v54, %v4340_v17 }
 0x491   :  { %v4344_v56 = vsel %vm4343_vm12, %v4326_v25, %v4342_v15 }
 0x494   :  { %v4289_v11 = vpop.xlane.xlu0 %4288 }
 0x495   :  { %v4330_v59 = vrot.slane %v4289_v11, %v7633_v20 }
 0x496   :  { %v4292_v14 = vpop.xlane.xlu1 %4291 }
 0x497   :  { %v4334_v38 = vrot.slane %v4292_v14, %v7633_v20  ;;  %v4346_v35 = vsel %vm4345_vm13, %v4330_v59, %v4344_v56 }
 0x499   :  { %v4348_v16 = vsel %vm4347_vm14, %v4334_v38, %v4346_v35 }
 0x49a   :  { %v4351_v32 = vsel %vm4350_vm15, %v4348_v16, 0.0 }
 0x49b   :  { %4352 = vadd.xlane.f32.xlu0 %v4351_v32 }
 0x528   :  { %v4353_v34 = vpop.xlane.xlu0 %4352 }
 0x529   :  { %v4361_v47 = vadd.f32 %v4948_v28, %v4353_v34 }
 0x52b   :  { %4363 = vst.msk [vmem:[%s7770_s8] sm:$0xff] %vm4362_vm0, %v4361_v47 }

</bundles_post_ra>
